<compile_context>
chip_gen: v5e
topology: v5e:2x2
jax: 0.10.0
libtpu: 0.0.40
codegen_flags: <defaults>
</compile_context>

<pallas_src>
import functools

import numpy as np
import jax
import jax.numpy as jnp
from jax import lax
from jax.experimental import pallas as pl
from jax.experimental.pallas import tpu as pltpu


# ----------------------------------------------------------------------------
# Host-side (cached) constant matrices
# ----------------------------------------------------------------------------

@functools.lru_cache(maxsize=None)
def _bilinear_matrix(out_size, in_size):
    """Interp matrix matching F.interpolate(mode='bilinear', align_corners=False)."""
    M = np.zeros((out_size, in_size), dtype=np.float32)
    scale = in_size / out_size
    for i in range(out_size):
        src = max((i + 0.5) * scale - 0.5, 0.0)
        i0 = min(int(np.floor(src)), in_size - 1)
        i1 = min(i0 + 1, in_size - 1)
        l1 = src - i0
        M[i, i0] += 1.0 - l1
        M[i, i1] += l1
    return M


@functools.lru_cache(maxsize=None)
def _even_select_matrix(w_in, w_out):
    """(w_in, w_out) 0/1 matrix selecting columns 0, 2, ..., 2*(w_out-1)."""
    S = np.zeros((w_in, w_out), dtype=np.float32)
    for ow in range(w_out):
        S[2 * ow, ow] = 1.0
    return S


# ----------------------------------------------------------------------------
# Fused ESA kernel (everything per batch element, all intermediates in VMEM)
# ----------------------------------------------------------------------------

def _esa_kernel(x_ref, w1_ref, b1_ref, w2_ref, b2_ref, sel_ref,
                wmax_ref, bmax_ref, w3_ref, b3_ref, w3b_ref, b3b_ref,
                wf_ref, bf_ref, wcolT_ref, w4_ref, b4_ref,
                o_ref,
                c1_scr, dense_scr, rows_scr, pA, pB, pC, s_scr,
                *, H, W, H2, W2, Ph, Pw, L, W_need, wrow):
    f32 = jnp.float32

    # ---- conv1 (1x1): c1_ = W1 @ x + b1  -> (f, H*W), spatial on lanes ----
    xv = x_ref[...]                                               # (C, H*W)
    c1_ = jnp.dot(w1_ref[...], xv, preferred_element_type=f32) + b1_ref[...]
    c1_scr[...] = c1_

    # ---- conv_f (1x1): gate-input accumulator starts at cf ----
    s_scr[...] = jnp.dot(wf_ref[...], c1_, preferred_element_type=f32) + bf_ref[...]

    # ---- conv2 (3x3, stride 2, VALID) via 9 flat-shifted GEMMs ----
    # dense[:, j] = sum_taps W2_tap @ c1_[:, j + dh*W + dw]; only columns of the
    # form j = 2*oh*W + 2*ow are used afterwards (others are never selected).
    dense = None
    for dh in range(3):
        for dw in range(3):
            off = dh * W + dw
            t = jnp.dot(w2_ref[dh * 3 + dw], c1_scr[:, off:off + L],
                        preferred_element_type=f32)
            dense = t if dense is None else dense + t
    dense_scr[...] = dense

    sel = sel_ref[...]                                            # (W_need, W2)
    for oh in range(H2):
        start = 2 * oh * W
        row = jnp.dot(dense_scr[:, start:start + W_need], sel,
                      preferred_element_type=f32) + b2_ref[...]   # (f, W2)
        rows_scr[:, oh * W2:(oh + 1) * W2] = row

    # ---- max_pool2d(kernel=7, stride=3, VALID) into zero-bordered pad buf ----
    PW2 = Pw + 2
    pA[...] = jnp.zeros(pA.shape, f32)
    pB[...] = jnp.zeros(pB.shape, f32)
    pC[...] = jnp.zeros(pC.shape, f32)
    for ph in range(Ph):
        for pw in range(Pw):
            m = None
            for kh in range(7):
                base = (3 * ph + kh) * W2 + 3 * pw
                r = jnp.max(rows_scr[:, base:base + 7], axis=1, keepdims=True)
                m = r if m is None else jnp.maximum(m, r)
            idx = (ph + 1) * PW2 + (pw + 1)
            pA[:, idx:idx + 1] = m

    # ---- 3x3, pad=1 convs on the tiny pooled map (zero border = padding) ----
    def conv3x3_pad1(src, dst, w_taps, b_col, relu):
        for oh in range(Ph):
            acc = None
            for dh in range(3):
                base = (oh + dh) * PW2
                for dw in range(3):
                    t = jnp.dot(w_taps[dh * 3 + dw],
                                src[:, base + dw:base + dw + Pw],
                                preferred_element_type=f32)
                    acc = t if acc is None else acc + t
            acc = acc + b_col[...]
            if relu:
                acc = jnp.maximum(acc, 0.0)
            dst[:, (oh + 1) * PW2 + 1:(oh + 1) * PW2 + 1 + Pw] = acc

    conv3x3_pad1(pA, pB, wmax_ref, bmax_ref, relu=True)   # v_range
    conv3x3_pad1(pB, pC, w3_ref, b3_ref, relu=True)       # c3 (first)
    conv3x3_pad1(pC, pA, w3b_ref, b3b_ref, relu=False)    # c3 (second) -> pA

    # ---- bilinear upsample (separable): width GEMM then per-row combine ----
    wcolT = wcolT_ref[...]                                # (Pw, W)
    urows = []
    for hi in range(Ph):
        base = (hi + 1) * PW2 + 1
        urows.append(jnp.dot(pA[:, base:base + Pw], wcolT,
                             preferred_element_type=f32))  # (f, W)
    for h in range(H):
        acc = None
        for hi in range(Ph):
            whi = wrow[h][hi]                              # compile-time float
            if whi == 0.0:
                continue
            t = whi * urows[hi]
            acc = t if acc is None else acc + t
        s_scr[:, h * W:(h + 1) * W] = s_scr[:, h * W:(h + 1) * W] + acc

    # ---- gate: out = x * sigmoid(W4 @ (c3_up + cf) + b4) ----
    c4 = jnp.dot(w4_ref[...], s_scr[...], preferred_element_type=f32) + b4_ref[...]
    o_ref[...] = (x_ref[...] * jax.nn.sigmoid(c4)).astype(o_ref.dtype)


# ----------------------------------------------------------------------------
# Wrapper: NCHW in / NCHW out, one pallas_call over the batch
# ----------------------------------------------------------------------------

def esa_forward(x_nchw, params):
    N, C, H, W = x_nchw.shape
    f = params["conv1"]["w"].shape[0]
    HW = H * W
    H2 = (H - 3) // 2 + 1
    W2 = (W - 3) // 2 + 1
    Ph = (H2 - 7) // 3 + 1
    Pw = (W2 - 7) // 3 + 1
    W_need = 2 * (W2 - 1) + 1                 # columns needed per dense row
    L = 2 * (H2 - 1) * W + W_need             # flat-shift slice length (<= H*W)
    dt = x_nchw.dtype

    x_flat = x_nchw.reshape(N, C, HW)

    def mat1x1(name):
        w = params[name]["w"]
        return w.reshape(w.shape[0], w.shape[1]).astype(dt)

    def taps3x3(name):
        w = params[name]["w"]                                   # (co, ci, 3, 3)
        return jnp.transpose(w, (2, 3, 0, 1)).reshape(9, w.shape[0], w.shape[1]).astype(dt)

    def bias_col(name):
        return params[name]["b"].reshape(-1, 1).astype(dt)

    w1, b1 = mat1x1("conv1"), bias_col("conv1")
    wf, bf = mat1x1("conv_f"), bias_col("conv_f")
    w4, b4 = mat1x1("conv4"), bias_col("conv4")
    w2, b2 = taps3x3("conv2"), bias_col("conv2")
    wmax, bmax = taps3x3("conv_max"), bias_col("conv_max")
    w3, b3 = taps3x3("conv3"), bias_col("conv3")
    w3b, b3b = taps3x3("conv3_"), bias_col("conv3_")

    sel = jnp.asarray(_even_select_matrix(W_need, W2))          # (W_need, W2)
    wcolT = jnp.asarray(np.ascontiguousarray(_bilinear_matrix(W, Pw).T))  # (Pw, W)
    wrow = tuple(map(tuple, _bilinear_matrix(H, Ph).tolist()))  # static floats

    kernel = functools.partial(
        _esa_kernel, H=H, W=W, H2=H2, W2=W2, Ph=Ph, Pw=Pw,
        L=L, W_need=W_need, wrow=wrow)

    def full(shape):
        return pl.BlockSpec(shape, lambda b, _s=shape: (0,) * len(_s))

    pad_len = (Ph + 2) * (Pw + 2)

    out = pl.pallas_call(
        kernel,
        out_shape=jax.ShapeDtypeStruct((N, C, HW), dt),
        grid=(N,),
        in_specs=[
            pl.BlockSpec((None, C, HW), lambda b: (b, 0, 0)),   # x (per batch)
            full(w1.shape), full(b1.shape),
            full(w2.shape), full(b2.shape),
            full(sel.shape),
            full(wmax.shape), full(bmax.shape),
            full(w3.shape), full(b3.shape),
            full(w3b.shape), full(b3b.shape),
            full(wf.shape), full(bf.shape),
            full(wcolT.shape),
            full(w4.shape), full(b4.shape),
        ],
        out_specs=pl.BlockSpec((None, C, HW), lambda b: (b, 0, 0)),
        scratch_shapes=[
            pltpu.VMEM((f, HW), jnp.float32),            # c1_ (flat)
            pltpu.VMEM((f, L), jnp.float32),             # conv2 dense accumulator
            pltpu.VMEM((f, H2 * W2), jnp.float32),       # conv2 output rows
            pltpu.VMEM((f, pad_len), jnp.float32),       # pA (v_max / c3 final)
            pltpu.VMEM((f, pad_len), jnp.float32),       # pB (v_range)
            pltpu.VMEM((f, pad_len), jnp.float32),       # pC (c3 intermediate)
            pltpu.VMEM((f, HW), jnp.float32),            # gate input (cf + c3_up)
        ],
        compiler_params=pltpu.CompilerParams(
            dimension_semantics=("parallel",)),
    )(x_flat, w1, b1, w2, b2, sel, wmax, bmax, w3, b3, w3b, b3b,
      wf, bf, wcolT, w4, b4)
    return out.reshape(N, C, H, W)


# ----------------------------------------------------------------------------
# Parameter init (PyTorch Conv2d default init) and pure-JAX reference
# ----------------------------------------------------------------------------

def init_params(key, n_feats, reduction=4, dtype=jnp.float32):
    f = n_feats // reduction
    shapes = {
        "conv1":    (f, n_feats, 1, 1),
        "conv_f":   (f, f, 1, 1),
        "conv_max": (f, f, 3, 3),
        "conv2":    (f, f, 3, 3),
        "conv3":    (f, f, 3, 3),
        "conv3_":   (f, f, 3, 3),
        "conv4":    (n_feats, f, 1, 1),
    }
    params = {}
    for name, shp in shapes.items():
        key, kw_, kb_ = jax.random.split(key, 3)
        fan_in = shp[1] * shp[2] * shp[3]
        s = 1.0 / np.sqrt(fan_in)
        params[name] = {
            "w": jax.random.uniform(kw_, shp, dtype, -s, s),
            "b": jax.random.uniform(kb_, (shp[0],), dtype, -s, s),
        }
    return params


def esa_reference(x_nchw, params):
    x = jnp.transpose(x_nchw, (0, 2, 3, 1))
    N, H, W, C = x.shape
    p = params

    def conv(inp, w, b, stride=1, pad=0):
        w_hwio = jnp.transpose(w, (2, 3, 1, 0))
        y = lax.conv_general_dilated(
            inp, w_hwio, (stride, stride), ((pad, pad), (pad, pad)),
            dimension_numbers=("NHWC", "HWIO", "NHWC"))
        return y + b

    relu = lambda t: jnp.maximum(t, 0.0)
    c1_ = conv(x, p["conv1"]["w"], p["conv1"]["b"])
    c1 = conv(c1_, p["conv2"]["w"], p["conv2"]["b"], stride=2, pad=0)
    v_max = lax.reduce_window(c1, -jnp.inf, lax.max,
                              (1, 7, 7, 1), (1, 3, 3, 1), "VALID")
    v_range = relu(conv(v_max, p["conv_max"]["w"], p["conv_max"]["b"], pad=1))
    c3 = relu(conv(v_range, p["conv3"]["w"], p["conv3"]["b"], pad=1))
    c3 = conv(c3, p["conv3_"]["w"], p["conv3_"]["b"], pad=1)
    Wr = jnp.asarray(_bilinear_matrix(H, c3.shape[1]))
    Wc = jnp.asarray(_bilinear_matrix(W, c3.shape[2]))
    c3 = jnp.einsum("ip,jq,npqc->nijc", Wr, Wc, c3)
    cf = conv(c1_, p["conv_f"]["w"], p["conv_f"]["b"])
    c4 = conv(c3 + cf, p["conv4"]["w"], p["conv4"]["b"])
    out = x * jax.nn.sigmoid(c4)
    return jnp.transpose(out, (0, 3, 1, 2))


# ----------------------------------------------------------------------------

if __name__ == "__main__":
    key = jax.random.PRNGKey(0)
    k_x, k_p = jax.random.split(key)

    batch, n_feats, H, W = 2, 16, 24, 24
    x = jax.random.normal(k_x, (batch, n_feats, H, W), jnp.float32)  # NCHW
    params = init_params(k_p, n_feats, reduction=4)

    out = jax.block_until_ready(esa_forward(x, params))
    ref = jax.block_until_ready(esa_reference(x, params))

    assert out.shape == x.shape
    np.testing.assert_allclose(np.asarray(out), np.asarray(ref),
                               rtol=1e-4, atol=1e-4)
    print("KERNEL_OK")
</pallas_src>

<mosaic_0001>
module attributes {stable_mosaic.version = 11 : i64} {
  func.func @_esa_kernel(%arg0: i32, %arg1: memref<1x16x576xf32, #tpu.memory_space<vmem>>, %arg2: memref<4x16xf32, #tpu.memory_space<vmem>>, %arg3: memref<4x1xf32, #tpu.memory_space<vmem>>, %arg4: memref<9x4x4xf32, #tpu.memory_space<vmem>>, %arg5: memref<4x1xf32, #tpu.memory_space<vmem>>, %arg6: memref<21x11xf32, #tpu.memory_space<vmem>>, %arg7: memref<9x4x4xf32, #tpu.memory_space<vmem>>, %arg8: memref<4x1xf32, #tpu.memory_space<vmem>>, %arg9: memref<9x4x4xf32, #tpu.memory_space<vmem>>, %arg10: memref<4x1xf32, #tpu.memory_space<vmem>>, %arg11: memref<9x4x4xf32, #tpu.memory_space<vmem>>, %arg12: memref<4x1xf32, #tpu.memory_space<vmem>>, %arg13: memref<4x4xf32, #tpu.memory_space<vmem>>, %arg14: memref<4x1xf32, #tpu.memory_space<vmem>>, %arg15: memref<2x24xf32, #tpu.memory_space<vmem>>, %arg16: memref<16x4xf32, #tpu.memory_space<vmem>>, %arg17: memref<16x1xf32, #tpu.memory_space<vmem>>, %arg18: memref<1x16x576xf32, #tpu.memory_space<vmem>>, %arg19: memref<4x576xf32, #tpu.memory_space<vmem>>, %arg20: memref<4x501xf32, #tpu.memory_space<vmem>>, %arg21: memref<4x121xf32, #tpu.memory_space<vmem>>, %arg22: memref<4x16xf32, #tpu.memory_space<vmem>>, %arg23: memref<4x16xf32, #tpu.memory_space<vmem>>, %arg24: memref<4x16xf32, #tpu.memory_space<vmem>>, %arg25: memref<4x576xf32, #tpu.memory_space<vmem>>) attributes {dimension_semantics = [#tpu.dimension_semantics<parallel>], iteration_bounds = array<i64: 2>, scalar_prefetch = 0 : i64, scratch_operands = 7 : i64, tpu.core_type = #tpu.core_type<tc>, window_params = [{transform_indices = @transform_0, window_bounds = array<i64: 1, 16, 576>}, {pipeline_mode = #tpu.pipeline_mode<synchronous>, transform_indices = @transform_1, window_bounds = array<i64: 4, 16>}, {pipeline_mode = #tpu.pipeline_mode<synchronous>, transform_indices = @transform_2, window_bounds = array<i64: 4, 1>}, {pipeline_mode = #tpu.pipeline_mode<synchronous>, transform_indices = @transform_3, window_bounds = array<i64: 9, 4, 4>}, {pipeline_mode = #tpu.pipeline_mode<synchronous>, transform_indices = @transform_4, window_bounds = array<i64: 4, 1>}, {pipeline_mode = #tpu.pipeline_mode<synchronous>, transform_indices = @transform_5, window_bounds = array<i64: 21, 11>}, {pipeline_mode = #tpu.pipeline_mode<synchronous>, transform_indices = @transform_6, window_bounds = array<i64: 9, 4, 4>}, {pipeline_mode = #tpu.pipeline_mode<synchronous>, transform_indices = @transform_7, window_bounds = array<i64: 4, 1>}, {pipeline_mode = #tpu.pipeline_mode<synchronous>, transform_indices = @transform_8, window_bounds = array<i64: 9, 4, 4>}, {pipeline_mode = #tpu.pipeline_mode<synchronous>, transform_indices = @transform_9, window_bounds = array<i64: 4, 1>}, {pipeline_mode = #tpu.pipeline_mode<synchronous>, transform_indices = @transform_10, window_bounds = array<i64: 9, 4, 4>}, {pipeline_mode = #tpu.pipeline_mode<synchronous>, transform_indices = @transform_11, window_bounds = array<i64: 4, 1>}, {pipeline_mode = #tpu.pipeline_mode<synchronous>, transform_indices = @transform_12, window_bounds = array<i64: 4, 4>}, {pipeline_mode = #tpu.pipeline_mode<synchronous>, transform_indices = @transform_13, window_bounds = array<i64: 4, 1>}, {pipeline_mode = #tpu.pipeline_mode<synchronous>, transform_indices = @transform_14, window_bounds = array<i64: 2, 24>}, {pipeline_mode = #tpu.pipeline_mode<synchronous>, transform_indices = @transform_15, window_bounds = array<i64: 16, 4>}, {pipeline_mode = #tpu.pipeline_mode<synchronous>, transform_indices = @transform_16, window_bounds = array<i64: 16, 1>}, {transform_indices = @transform_17, window_bounds = array<i64: 1, 16, 576>}]} {
    %c0 = arith.constant 0 : index
    %c0_0 = arith.constant 0 : index
    %c0_1 = arith.constant 0 : index
    %0 = vector.load %arg1[%c0, %c0_0, %c0_1] : memref<1x16x576xf32, #tpu.memory_space<vmem>>, vector<1x16x576xf32>
    %1 = vector.shape_cast %0 : vector<1x16x576xf32> to vector<16x576xf32>
    %c0_2 = arith.constant 0 : index
    %c0_3 = arith.constant 0 : index
    %2 = vector.load %arg2[%c0_2, %c0_3] : memref<4x16xf32, #tpu.memory_space<vmem>>, vector<4x16xf32>
    %cst = arith.constant dense<0.000000e+00> : vector<4x576xf32>
    %3 = tpu.matmul %2, %1, %cst {dimension_numbers = #tpu.dot_dimension_numbers<[1], [0], [0], [1], [0, 0, 1, 1], [], []>} : vector<4x16xf32>, vector<16x576xf32>, vector<4x576xf32> -> vector<4x576xf32>
    %c0_4 = arith.constant 0 : index
    %c0_5 = arith.constant 0 : index
    %4 = vector.load %arg3[%c0_4, %c0_5] : memref<4x1xf32, #tpu.memory_space<vmem>>, vector<4x1xf32>
    %5 = vector.broadcast %4 : vector<4x1xf32> to vector<4x576xf32>
    %6 = arith.addf %3, %5 : vector<4x576xf32>
    %c0_6 = arith.constant 0 : index
    %c0_7 = arith.constant 0 : index
    %7 = vector.load %arg19[%c0_6, %c0_7] : memref<4x576xf32, #tpu.memory_space<vmem>>, vector<4x576xf32>
    tpu.vector_store %arg19[%c0_6, %c0_7], %6 {strides = array<i32>} : memref<4x576xf32, #tpu.memory_space<vmem>>, vector<4x576xf32>,
    %c0_8 = arith.constant 0 : index
    %c0_9 = arith.constant 0 : index
    %8 = vector.load %arg13[%c0_8, %c0_9] : memref<4x4xf32, #tpu.memory_space<vmem>>, vector<4x4xf32>
    %cst_10 = arith.constant dense<0.000000e+00> : vector<4x576xf32>
    %9 = tpu.matmul %8, %6, %cst_10 {dimension_numbers = #tpu.dot_dimension_numbers<[1], [0], [0], [1], [0, 0, 1, 1], [], []>} : vector<4x4xf32>, vector<4x576xf32>, vector<4x576xf32> -> vector<4x576xf32>
    %c0_11 = arith.constant 0 : index
    %c0_12 = arith.constant 0 : index
    %10 = vector.load %arg14[%c0_11, %c0_12] : memref<4x1xf32, #tpu.memory_space<vmem>>, vector<4x1xf32>
    %11 = vector.broadcast %10 : vector<4x1xf32> to vector<4x576xf32>
    %12 = arith.addf %9, %11 : vector<4x576xf32>
    %c0_13 = arith.constant 0 : index
    %c0_14 = arith.constant 0 : index
    %13 = vector.load %arg25[%c0_13, %c0_14] : memref<4x576xf32, #tpu.memory_space<vmem>>, vector<4x576xf32>
    tpu.vector_store %arg25[%c0_13, %c0_14], %12 {strides = array<i32>} : memref<4x576xf32, #tpu.memory_space<vmem>>, vector<4x576xf32>,
    %c0_15 = arith.constant 0 : index
    %c0_16 = arith.constant 0 : index
    %c0_17 = arith.constant 0 : index
    %14 = vector.load %arg4[%c0_15, %c0_16, %c0_17] : memref<9x4x4xf32, #tpu.memory_space<vmem>>, vector<1x4x4xf32>
    %15 = vector.shape_cast %14 : vector<1x4x4xf32> to vector<4x4xf32>
    %c0_18 = arith.constant 0 : index
    %c0_19 = arith.constant 0 : index
    %16 = vector.load %arg19[%c0_18, %c0_19] : memref<4x576xf32, #tpu.memory_space<vmem>>, vector<4x501xf32>
    %cst_20 = arith.constant dense<0.000000e+00> : vector<4x501xf32>
    %17 = tpu.matmul %15, %16, %cst_20 {dimension_numbers = #tpu.dot_dimension_numbers<[1], [0], [0], [1], [0, 0, 1, 1], [], []>} : vector<4x4xf32>, vector<4x501xf32>, vector<4x501xf32> -> vector<4x501xf32>
    %c1 = arith.constant 1 : index
    %c0_21 = arith.constant 0 : index
    %c0_22 = arith.constant 0 : index
    %18 = vector.load %arg4[%c1, %c0_21, %c0_22] : memref<9x4x4xf32, #tpu.memory_space<vmem>>, vector<1x4x4xf32>
    %19 = vector.shape_cast %18 : vector<1x4x4xf32> to vector<4x4xf32>
    %c0_23 = arith.constant 0 : index
    %c1_24 = arith.constant 1 : index
    %20 = vector.load %arg19[%c0_23, %c1_24] : memref<4x576xf32, #tpu.memory_space<vmem>>, vector<4x501xf32>
    %cst_25 = arith.constant dense<0.000000e+00> : vector<4x501xf32>
    %21 = tpu.matmul %19, %20, %cst_25 {dimension_numbers = #tpu.dot_dimension_numbers<[1], [0], [0], [1], [0, 0, 1, 1], [], []>} : vector<4x4xf32>, vector<4x501xf32>, vector<4x501xf32> -> vector<4x501xf32>
    %22 = arith.addf %17, %21 : vector<4x501xf32>
    %c2 = arith.constant 2 : index
    %c0_26 = arith.constant 0 : index
    %c0_27 = arith.constant 0 : index
    %23 = vector.load %arg4[%c2, %c0_26, %c0_27] : memref<9x4x4xf32, #tpu.memory_space<vmem>>, vector<1x4x4xf32>
    %24 = vector.shape_cast %23 : vector<1x4x4xf32> to vector<4x4xf32>
    %c0_28 = arith.constant 0 : index
    %c2_29 = arith.constant 2 : index
    %25 = vector.load %arg19[%c0_28, %c2_29] : memref<4x576xf32, #tpu.memory_space<vmem>>, vector<4x501xf32>
    %cst_30 = arith.constant dense<0.000000e+00> : vector<4x501xf32>
    %26 = tpu.matmul %24, %25, %cst_30 {dimension_numbers = #tpu.dot_dimension_numbers<[1], [0], [0], [1], [0, 0, 1, 1], [], []>} : vector<4x4xf32>, vector<4x501xf32>, vector<4x501xf32> -> vector<4x501xf32>
    %27 = arith.addf %22, %26 : vector<4x501xf32>
    %c3 = arith.constant 3 : index
    %c0_31 = arith.constant 0 : index
    %c0_32 = arith.constant 0 : index
    %28 = vector.load %arg4[%c3, %c0_31, %c0_32] : memref<9x4x4xf32, #tpu.memory_space<vmem>>, vector<1x4x4xf32>
    %29 = vector.shape_cast %28 : vector<1x4x4xf32> to vector<4x4xf32>
    %c0_33 = arith.constant 0 : index
    %c24 = arith.constant 24 : index
    %30 = vector.load %arg19[%c0_33, %c24] : memref<4x576xf32, #tpu.memory_space<vmem>>, vector<4x501xf32>
    %cst_34 = arith.constant dense<0.000000e+00> : vector<4x501xf32>
    %31 = tpu.matmul %29, %30, %cst_34 {dimension_numbers = #tpu.dot_dimension_numbers<[1], [0], [0], [1], [0, 0, 1, 1], [], []>} : vector<4x4xf32>, vector<4x501xf32>, vector<4x501xf32> -> vector<4x501xf32>
    %32 = arith.addf %27, %31 : vector<4x501xf32>
    %c4 = arith.constant 4 : index
    %c0_35 = arith.constant 0 : index
    %c0_36 = arith.constant 0 : index
    %33 = vector.load %arg4[%c4, %c0_35, %c0_36] : memref<9x4x4xf32, #tpu.memory_space<vmem>>, vector<1x4x4xf32>
    %34 = vector.shape_cast %33 : vector<1x4x4xf32> to vector<4x4xf32>
    %c0_37 = arith.constant 0 : index
    %c25 = arith.constant 25 : index
    %35 = vector.load %arg19[%c0_37, %c25] : memref<4x576xf32, #tpu.memory_space<vmem>>, vector<4x501xf32>
    %cst_38 = arith.constant dense<0.000000e+00> : vector<4x501xf32>
    %36 = tpu.matmul %34, %35, %cst_38 {dimension_numbers = #tpu.dot_dimension_numbers<[1], [0], [0], [1], [0, 0, 1, 1], [], []>} : vector<4x4xf32>, vector<4x501xf32>, vector<4x501xf32> -> vector<4x501xf32>
    %37 = arith.addf %32, %36 : vector<4x501xf32>
    %c5 = arith.constant 5 : index
    %c0_39 = arith.constant 0 : index
    %c0_40 = arith.constant 0 : index
    %38 = vector.load %arg4[%c5, %c0_39, %c0_40] : memref<9x4x4xf32, #tpu.memory_space<vmem>>, vector<1x4x4xf32>
    %39 = vector.shape_cast %38 : vector<1x4x4xf32> to vector<4x4xf32>
    %c0_41 = arith.constant 0 : index
    %c26 = arith.constant 26 : index
    %40 = vector.load %arg19[%c0_41, %c26] : memref<4x576xf32, #tpu.memory_space<vmem>>, vector<4x501xf32>
    %cst_42 = arith.constant dense<0.000000e+00> : vector<4x501xf32>
    %41 = tpu.matmul %39, %40, %cst_42 {dimension_numbers = #tpu.dot_dimension_numbers<[1], [0], [0], [1], [0, 0, 1, 1], [], []>} : vector<4x4xf32>, vector<4x501xf32>, vector<4x501xf32> -> vector<4x501xf32>
    %42 = arith.addf %37, %41 : vector<4x501xf32>
    %c6 = arith.constant 6 : index
    %c0_43 = arith.constant 0 : index
    %c0_44 = arith.constant 0 : index
    %43 = vector.load %arg4[%c6, %c0_43, %c0_44] : memref<9x4x4xf32, #tpu.memory_space<vmem>>, vector<1x4x4xf32>
    %44 = vector.shape_cast %43 : vector<1x4x4xf32> to vector<4x4xf32>
    %c0_45 = arith.constant 0 : index
    %c48 = arith.constant 48 : index
    %45 = vector.load %arg19[%c0_45, %c48] : memref<4x576xf32, #tpu.memory_space<vmem>>, vector<4x501xf32>
    %cst_46 = arith.constant dense<0.000000e+00> : vector<4x501xf32>
    %46 = tpu.matmul %44, %45, %cst_46 {dimension_numbers = #tpu.dot_dimension_numbers<[1], [0], [0], [1], [0, 0, 1, 1], [], []>} : vector<4x4xf32>, vector<4x501xf32>, vector<4x501xf32> -> vector<4x501xf32>
    %47 = arith.addf %42, %46 : vector<4x501xf32>
    %c7 = arith.constant 7 : index
    %c0_47 = arith.constant 0 : index
    %c0_48 = arith.constant 0 : index
    %48 = vector.load %arg4[%c7, %c0_47, %c0_48] : memref<9x4x4xf32, #tpu.memory_space<vmem>>, vector<1x4x4xf32>
    %49 = vector.shape_cast %48 : vector<1x4x4xf32> to vector<4x4xf32>
    %c0_49 = arith.constant 0 : index
    %c49 = arith.constant 49 : index
    %50 = vector.load %arg19[%c0_49, %c49] : memref<4x576xf32, #tpu.memory_space<vmem>>, vector<4x501xf32>
    %cst_50 = arith.constant dense<0.000000e+00> : vector<4x501xf32>
    %51 = tpu.matmul %49, %50, %cst_50 {dimension_numbers = #tpu.dot_dimension_numbers<[1], [0], [0], [1], [0, 0, 1, 1], [], []>} : vector<4x4xf32>, vector<4x501xf32>, vector<4x501xf32> -> vector<4x501xf32>
    %52 = arith.addf %47, %51 : vector<4x501xf32>
    %c8 = arith.constant 8 : index
    %c0_51 = arith.constant 0 : index
    %c0_52 = arith.constant 0 : index
    %53 = vector.load %arg4[%c8, %c0_51, %c0_52] : memref<9x4x4xf32, #tpu.memory_space<vmem>>, vector<1x4x4xf32>
    %54 = vector.shape_cast %53 : vector<1x4x4xf32> to vector<4x4xf32>
    %c0_53 = arith.constant 0 : index
    %c50 = arith.constant 50 : index
    %55 = vector.load %arg19[%c0_53, %c50] : memref<4x576xf32, #tpu.memory_space<vmem>>, vector<4x501xf32>
    %cst_54 = arith.constant dense<0.000000e+00> : vector<4x501xf32>
    %56 = tpu.matmul %54, %55, %cst_54 {dimension_numbers = #tpu.dot_dimension_numbers<[1], [0], [0], [1], [0, 0, 1, 1], [], []>} : vector<4x4xf32>, vector<4x501xf32>, vector<4x501xf32> -> vector<4x501xf32>
    %57 = arith.addf %52, %56 : vector<4x501xf32>
    %c0_55 = arith.constant 0 : index
    %c0_56 = arith.constant 0 : index
    %58 = vector.load %arg20[%c0_55, %c0_56] : memref<4x501xf32, #tpu.memory_space<vmem>>, vector<4x501xf32>
    tpu.vector_store %arg20[%c0_55, %c0_56], %57 {strides = array<i32>} : memref<4x501xf32, #tpu.memory_space<vmem>>, vector<4x501xf32>,
    %c0_57 = arith.constant 0 : index
    %c0_58 = arith.constant 0 : index
    %59 = vector.load %arg6[%c0_57, %c0_58] : memref<21x11xf32, #tpu.memory_space<vmem>>, vector<21x11xf32>
    %c0_59 = arith.constant 0 : index
    %c0_60 = arith.constant 0 : index
    %60 = vector.load %arg20[%c0_59, %c0_60] : memref<4x501xf32, #tpu.memory_space<vmem>>, vector<4x21xf32>
    %cst_61 = arith.constant dense<0.000000e+00> : vector<4x11xf32>
    %61 = tpu.matmul %60, %59, %cst_61 {dimension_numbers = #tpu.dot_dimension_numbers<[1], [0], [0], [1], [0, 0, 1, 1], [], []>} : vector<4x21xf32>, vector<21x11xf32>, vector<4x11xf32> -> vector<4x11xf32>
    %c0_62 = arith.constant 0 : index
    %c0_63 = arith.constant 0 : index
    %62 = vector.load %arg5[%c0_62, %c0_63] : memref<4x1xf32, #tpu.memory_space<vmem>>, vector<4x1xf32>
    %63 = vector.broadcast %62 : vector<4x1xf32> to vector<4x11xf32>
    %64 = arith.addf %61, %63 : vector<4x11xf32>
    %c0_64 = arith.constant 0 : index
    %c0_65 = arith.constant 0 : index
    %65 = vector.load %arg21[%c0_64, %c0_65] : memref<4x121xf32, #tpu.memory_space<vmem>>, vector<4x11xf32>
    tpu.vector_store %arg21[%c0_64, %c0_65], %64 {strides = array<i32>} : memref<4x121xf32, #tpu.memory_space<vmem>>, vector<4x11xf32>,
    %c0_66 = arith.constant 0 : index
    %c48_67 = arith.constant 48 : index
    %66 = vector.load %arg20[%c0_66, %c48_67] : memref<4x501xf32, #tpu.memory_space<vmem>>, vector<4x21xf32>
    %cst_68 = arith.constant dense<0.000000e+00> : vector<4x11xf32>
    %67 = tpu.matmul %66, %59, %cst_68 {dimension_numbers = #tpu.dot_dimension_numbers<[1], [0], [0], [1], [0, 0, 1, 1], [], []>} : vector<4x21xf32>, vector<21x11xf32>, vector<4x11xf32> -> vector<4x11xf32>
    %c0_69 = arith.constant 0 : index
    %c0_70 = arith.constant 0 : index
    %68 = vector.load %arg5[%c0_69, %c0_70] : memref<4x1xf32, #tpu.memory_space<vmem>>, vector<4x1xf32>
    %69 = vector.broadcast %68 : vector<4x1xf32> to vector<4x11xf32>
    %70 = arith.addf %67, %69 : vector<4x11xf32>
    %c0_71 = arith.constant 0 : index
    %c11 = arith.constant 11 : index
    %71 = vector.load %arg21[%c0_71, %c11] : memref<4x121xf32, #tpu.memory_space<vmem>>, vector<4x11xf32>
    tpu.vector_store %arg21[%c0_71, %c11], %70 {strides = array<i32>} : memref<4x121xf32, #tpu.memory_space<vmem>>, vector<4x11xf32>,
    %c0_72 = arith.constant 0 : index
    %c96 = arith.constant 96 : index
    %72 = vector.load %arg20[%c0_72, %c96] : memref<4x501xf32, #tpu.memory_space<vmem>>, vector<4x21xf32>
    %cst_73 = arith.constant dense<0.000000e+00> : vector<4x11xf32>
    %73 = tpu.matmul %72, %59, %cst_73 {dimension_numbers = #tpu.dot_dimension_numbers<[1], [0], [0], [1], [0, 0, 1, 1], [], []>} : vector<4x21xf32>, vector<21x11xf32>, vector<4x11xf32> -> vector<4x11xf32>
    %c0_74 = arith.constant 0 : index
    %c0_75 = arith.constant 0 : index
    %74 = vector.load %arg5[%c0_74, %c0_75] : memref<4x1xf32, #tpu.memory_space<vmem>>, vector<4x1xf32>
    %75 = vector.broadcast %74 : vector<4x1xf32> to vector<4x11xf32>
    %76 = arith.addf %73, %75 : vector<4x11xf32>
    %c0_76 = arith.constant 0 : index
    %c22 = arith.constant 22 : index
    %77 = vector.load %arg21[%c0_76, %c22] : memref<4x121xf32, #tpu.memory_space<vmem>>, vector<4x11xf32>
    tpu.vector_store %arg21[%c0_76, %c22], %76 {strides = array<i32>} : memref<4x121xf32, #tpu.memory_space<vmem>>, vector<4x11xf32>,
    %c0_77 = arith.constant 0 : index
    %c144 = arith.constant 144 : index
    %78 = vector.load %arg20[%c0_77, %c144] : memref<4x501xf32, #tpu.memory_space<vmem>>, vector<4x21xf32>
    %cst_78 = arith.constant dense<0.000000e+00> : vector<4x11xf32>
    %79 = tpu.matmul %78, %59, %cst_78 {dimension_numbers = #tpu.dot_dimension_numbers<[1], [0], [0], [1], [0, 0, 1, 1], [], []>} : vector<4x21xf32>, vector<21x11xf32>, vector<4x11xf32> -> vector<4x11xf32>
    %c0_79 = arith.constant 0 : index
    %c0_80 = arith.constant 0 : index
    %80 = vector.load %arg5[%c0_79, %c0_80] : memref<4x1xf32, #tpu.memory_space<vmem>>, vector<4x1xf32>
    %81 = vector.broadcast %80 : vector<4x1xf32> to vector<4x11xf32>
    %82 = arith.addf %79, %81 : vector<4x11xf32>
    %c0_81 = arith.constant 0 : index
    %c33 = arith.constant 33 : index
    %83 = vector.load %arg21[%c0_81, %c33] : memref<4x121xf32, #tpu.memory_space<vmem>>, vector<4x11xf32>
    tpu.vector_store %arg21[%c0_81, %c33], %82 {strides = array<i32>} : memref<4x121xf32, #tpu.memory_space<vmem>>, vector<4x11xf32>,
    %c0_82 = arith.constant 0 : index
    %c192 = arith.constant 192 : index
    %84 = vector.load %arg20[%c0_82, %c192] : memref<4x501xf32, #tpu.memory_space<vmem>>, vector<4x21xf32>
    %cst_83 = arith.constant dense<0.000000e+00> : vector<4x11xf32>
    %85 = tpu.matmul %84, %59, %cst_83 {dimension_numbers = #tpu.dot_dimension_numbers<[1], [0], [0], [1], [0, 0, 1, 1], [], []>} : vector<4x21xf32>, vector<21x11xf32>, vector<4x11xf32> -> vector<4x11xf32>
    %c0_84 = arith.constant 0 : index
    %c0_85 = arith.constant 0 : index
    %86 = vector.load %arg5[%c0_84, %c0_85] : memref<4x1xf32, #tpu.memory_space<vmem>>, vector<4x1xf32>
    %87 = vector.broadcast %86 : vector<4x1xf32> to vector<4x11xf32>
    %88 = arith.addf %85, %87 : vector<4x11xf32>
    %c0_86 = arith.constant 0 : index
    %c44 = arith.constant 44 : index
    %89 = vector.load %arg21[%c0_86, %c44] : memref<4x121xf32, #tpu.memory_space<vmem>>, vector<4x11xf32>
    tpu.vector_store %arg21[%c0_86, %c44], %88 {strides = array<i32>} : memref<4x121xf32, #tpu.memory_space<vmem>>, vector<4x11xf32>,
    %c0_87 = arith.constant 0 : index
    %c240 = arith.constant 240 : index
    %90 = vector.load %arg20[%c0_87, %c240] : memref<4x501xf32, #tpu.memory_space<vmem>>, vector<4x21xf32>
    %cst_88 = arith.constant dense<0.000000e+00> : vector<4x11xf32>
    %91 = tpu.matmul %90, %59, %cst_88 {dimension_numbers = #tpu.dot_dimension_numbers<[1], [0], [0], [1], [0, 0, 1, 1], [], []>} : vector<4x21xf32>, vector<21x11xf32>, vector<4x11xf32> -> vector<4x11xf32>
    %c0_89 = arith.constant 0 : index
    %c0_90 = arith.constant 0 : index
    %92 = vector.load %arg5[%c0_89, %c0_90] : memref<4x1xf32, #tpu.memory_space<vmem>>, vector<4x1xf32>
    %93 = vector.broadcast %92 : vector<4x1xf32> to vector<4x11xf32>
    %94 = arith.addf %91, %93 : vector<4x11xf32>
    %c0_91 = arith.constant 0 : index
    %c55 = arith.constant 55 : index
    %95 = vector.load %arg21[%c0_91, %c55] : memref<4x121xf32, #tpu.memory_space<vmem>>, vector<4x11xf32>
    tpu.vector_store %arg21[%c0_91, %c55], %94 {strides = array<i32>} : memref<4x121xf32, #tpu.memory_space<vmem>>, vector<4x11xf32>,
    %c0_92 = arith.constant 0 : index
    %c288 = arith.constant 288 : index
    %96 = vector.load %arg20[%c0_92, %c288] : memref<4x501xf32, #tpu.memory_space<vmem>>, vector<4x21xf32>
    %cst_93 = arith.constant dense<0.000000e+00> : vector<4x11xf32>
    %97 = tpu.matmul %96, %59, %cst_93 {dimension_numbers = #tpu.dot_dimension_numbers<[1], [0], [0], [1], [0, 0, 1, 1], [], []>} : vector<4x21xf32>, vector<21x11xf32>, vector<4x11xf32> -> vector<4x11xf32>
    %c0_94 = arith.constant 0 : index
    %c0_95 = arith.constant 0 : index
    %98 = vector.load %arg5[%c0_94, %c0_95] : memref<4x1xf32, #tpu.memory_space<vmem>>, vector<4x1xf32>
    %99 = vector.broadcast %98 : vector<4x1xf32> to vector<4x11xf32>
    %100 = arith.addf %97, %99 : vector<4x11xf32>
    %c0_96 = arith.constant 0 : index
    %c66 = arith.constant 66 : index
    %101 = vector.load %arg21[%c0_96, %c66] : memref<4x121xf32, #tpu.memory_space<vmem>>, vector<4x11xf32>
    tpu.vector_store %arg21[%c0_96, %c66], %100 {strides = array<i32>} : memref<4x121xf32, #tpu.memory_space<vmem>>, vector<4x11xf32>,
    %c0_97 = arith.constant 0 : index
    %c336 = arith.constant 336 : index
    %102 = vector.load %arg20[%c0_97, %c336] : memref<4x501xf32, #tpu.memory_space<vmem>>, vector<4x21xf32>
    %cst_98 = arith.constant dense<0.000000e+00> : vector<4x11xf32>
    %103 = tpu.matmul %102, %59, %cst_98 {dimension_numbers = #tpu.dot_dimension_numbers<[1], [0], [0], [1], [0, 0, 1, 1], [], []>} : vector<4x21xf32>, vector<21x11xf32>, vector<4x11xf32> -> vector<4x11xf32>
    %c0_99 = arith.constant 0 : index
    %c0_100 = arith.constant 0 : index
    %104 = vector.load %arg5[%c0_99, %c0_100] : memref<4x1xf32, #tpu.memory_space<vmem>>, vector<4x1xf32>
    %105 = vector.broadcast %104 : vector<4x1xf32> to vector<4x11xf32>
    %106 = arith.addf %103, %105 : vector<4x11xf32>
    %c0_101 = arith.constant 0 : index
    %c77 = arith.constant 77 : index
    %107 = vector.load %arg21[%c0_101, %c77] : memref<4x121xf32, #tpu.memory_space<vmem>>, vector<4x11xf32>
    tpu.vector_store %arg21[%c0_101, %c77], %106 {strides = array<i32>} : memref<4x121xf32, #tpu.memory_space<vmem>>, vector<4x11xf32>,
    %c0_102 = arith.constant 0 : index
    %c384 = arith.constant 384 : index
    %108 = vector.load %arg20[%c0_102, %c384] : memref<4x501xf32, #tpu.memory_space<vmem>>, vector<4x21xf32>
    %cst_103 = arith.constant dense<0.000000e+00> : vector<4x11xf32>
    %109 = tpu.matmul %108, %59, %cst_103 {dimension_numbers = #tpu.dot_dimension_numbers<[1], [0], [0], [1], [0, 0, 1, 1], [], []>} : vector<4x21xf32>, vector<21x11xf32>, vector<4x11xf32> -> vector<4x11xf32>
    %c0_104 = arith.constant 0 : index
    %c0_105 = arith.constant 0 : index
    %110 = vector.load %arg5[%c0_104, %c0_105] : memref<4x1xf32, #tpu.memory_space<vmem>>, vector<4x1xf32>
    %111 = vector.broadcast %110 : vector<4x1xf32> to vector<4x11xf32>
    %112 = arith.addf %109, %111 : vector<4x11xf32>
    %c0_106 = arith.constant 0 : index
    %c88 = arith.constant 88 : index
    %113 = vector.load %arg21[%c0_106, %c88] : memref<4x121xf32, #tpu.memory_space<vmem>>, vector<4x11xf32>
    tpu.vector_store %arg21[%c0_106, %c88], %112 {strides = array<i32>} : memref<4x121xf32, #tpu.memory_space<vmem>>, vector<4x11xf32>,
    %c0_107 = arith.constant 0 : index
    %c432 = arith.constant 432 : index
    %114 = vector.load %arg20[%c0_107, %c432] : memref<4x501xf32, #tpu.memory_space<vmem>>, vector<4x21xf32>
    %cst_108 = arith.constant dense<0.000000e+00> : vector<4x11xf32>
    %115 = tpu.matmul %114, %59, %cst_108 {dimension_numbers = #tpu.dot_dimension_numbers<[1], [0], [0], [1], [0, 0, 1, 1], [], []>} : vector<4x21xf32>, vector<21x11xf32>, vector<4x11xf32> -> vector<4x11xf32>
    %c0_109 = arith.constant 0 : index
    %c0_110 = arith.constant 0 : index
    %116 = vector.load %arg5[%c0_109, %c0_110] : memref<4x1xf32, #tpu.memory_space<vmem>>, vector<4x1xf32>
    %117 = vector.broadcast %116 : vector<4x1xf32> to vector<4x11xf32>
    %118 = arith.addf %115, %117 : vector<4x11xf32>
    %c0_111 = arith.constant 0 : index
    %c99 = arith.constant 99 : index
    %119 = vector.load %arg21[%c0_111, %c99] : memref<4x121xf32, #tpu.memory_space<vmem>>, vector<4x11xf32>
    tpu.vector_store %arg21[%c0_111, %c99], %118 {strides = array<i32>} : memref<4x121xf32, #tpu.memory_space<vmem>>, vector<4x11xf32>,
    %c0_112 = arith.constant 0 : index
    %c480 = arith.constant 480 : index
    %120 = vector.load %arg20[%c0_112, %c480] : memref<4x501xf32, #tpu.memory_space<vmem>>, vector<4x21xf32>
    %cst_113 = arith.constant dense<0.000000e+00> : vector<4x11xf32>
    %121 = tpu.matmul %120, %59, %cst_113 {dimension_numbers = #tpu.dot_dimension_numbers<[1], [0], [0], [1], [0, 0, 1, 1], [], []>} : vector<4x21xf32>, vector<21x11xf32>, vector<4x11xf32> -> vector<4x11xf32>
    %c0_114 = arith.constant 0 : index
    %c0_115 = arith.constant 0 : index
    %122 = vector.load %arg5[%c0_114, %c0_115] : memref<4x1xf32, #tpu.memory_space<vmem>>, vector<4x1xf32>
    %123 = vector.broadcast %122 : vector<4x1xf32> to vector<4x11xf32>
    %124 = arith.addf %121, %123 : vector<4x11xf32>
    %c0_116 = arith.constant 0 : index
    %c110 = arith.constant 110 : index
    %125 = vector.load %arg21[%c0_116, %c110] : memref<4x121xf32, #tpu.memory_space<vmem>>, vector<4x11xf32>
    tpu.vector_store %arg21[%c0_116, %c110], %124 {strides = array<i32>} : memref<4x121xf32, #tpu.memory_space<vmem>>, vector<4x11xf32>,
    %cst_117 = arith.constant 0.000000e+00 : f32
    %126 = vector.broadcast %cst_117 : f32 to vector<4x16xf32>
    %c0_118 = arith.constant 0 : index
    %c0_119 = arith.constant 0 : index
    %127 = vector.load %arg22[%c0_118, %c0_119] : memref<4x16xf32, #tpu.memory_space<vmem>>, vector<4x16xf32>
    tpu.vector_store %arg22[%c0_118, %c0_119], %126 {strides = array<i32>} : memref<4x16xf32, #tpu.memory_space<vmem>>, vector<4x16xf32>,
    %cst_120 = arith.constant 0.000000e+00 : f32
    %128 = vector.broadcast %cst_120 : f32 to vector<4x16xf32>
    %c0_121 = arith.constant 0 : index
    %c0_122 = arith.constant 0 : index
    %129 = vector.load %arg23[%c0_121, %c0_122] : memref<4x16xf32, #tpu.memory_space<vmem>>, vector<4x16xf32>
    tpu.vector_store %arg23[%c0_121, %c0_122], %128 {strides = array<i32>} : memref<4x16xf32, #tpu.memory_space<vmem>>, vector<4x16xf32>,
    %cst_123 = arith.constant 0.000000e+00 : f32
    %130 = vector.broadcast %cst_123 : f32 to vector<4x16xf32>
    %c0_124 = arith.constant 0 : index
    %c0_125 = arith.constant 0 : index
    %131 = vector.load %arg24[%c0_124, %c0_125] : memref<4x16xf32, #tpu.memory_space<vmem>>, vector<4x16xf32>
    tpu.vector_store %arg24[%c0_124, %c0_125], %130 {strides = array<i32>} : memref<4x16xf32, #tpu.memory_space<vmem>>, vector<4x16xf32>,
    %c0_126 = arith.constant 0 : index
    %c0_127 = arith.constant 0 : index
    %132 = vector.load %arg21[%c0_126, %c0_127] : memref<4x121xf32, #tpu.memory_space<vmem>>, vector<4x7xf32>
    %cst_128 = arith.constant dense<0xFF800000> : vector<4xf32>
    %133 = vector.multi_reduction <maximumf>, %132, %cst_128 [1] : vector<4x7xf32> to vector<4xf32>
    %134 = vector.shape_cast %133 : vector<4xf32> to vector<4x1xf32>
    %c0_129 = arith.constant 0 : index
    %c11_130 = arith.constant 11 : index
    %135 = vector.load %arg21[%c0_129, %c11_130] : memref<4x121xf32, #tpu.memory_space<vmem>>, vector<4x7xf32>
    %cst_131 = arith.constant dense<0xFF800000> : vector<4xf32>
    %136 = vector.multi_reduction <maximumf>, %135, %cst_131 [1] : vector<4x7xf32> to vector<4xf32>
    %137 = vector.shape_cast %136 : vector<4xf32> to vector<4x1xf32>
    %138 = arith.maximumf %134, %137 : vector<4x1xf32>
    %c0_132 = arith.constant 0 : index
    %c22_133 = arith.constant 22 : index
    %139 = vector.load %arg21[%c0_132, %c22_133] : memref<4x121xf32, #tpu.memory_space<vmem>>, vector<4x7xf32>
    %cst_134 = arith.constant dense<0xFF800000> : vector<4xf32>
    %140 = vector.multi_reduction <maximumf>, %139, %cst_134 [1] : vector<4x7xf32> to vector<4xf32>
    %141 = vector.shape_cast %140 : vector<4xf32> to vector<4x1xf32>
    %142 = arith.maximumf %138, %141 : vector<4x1xf32>
    %c0_135 = arith.constant 0 : index
    %c33_136 = arith.constant 33 : index
    %143 = vector.load %arg21[%c0_135, %c33_136] : memref<4x121xf32, #tpu.memory_space<vmem>>, vector<4x7xf32>
    %cst_137 = arith.constant dense<0xFF800000> : vector<4xf32>
    %144 = vector.multi_reduction <maximumf>, %143, %cst_137 [1] : vector<4x7xf32> to vector<4xf32>
    %145 = vector.shape_cast %144 : vector<4xf32> to vector<4x1xf32>
    %146 = arith.maximumf %142, %145 : vector<4x1xf32>
    %c0_138 = arith.constant 0 : index
    %c44_139 = arith.constant 44 : index
    %147 = vector.load %arg21[%c0_138, %c44_139] : memref<4x121xf32, #tpu.memory_space<vmem>>, vector<4x7xf32>
    %cst_140 = arith.constant dense<0xFF800000> : vector<4xf32>
    %148 = vector.multi_reduction <maximumf>, %147, %cst_140 [1] : vector<4x7xf32> to vector<4xf32>
    %149 = vector.shape_cast %148 : vector<4xf32> to vector<4x1xf32>
    %150 = arith.maximumf %146, %149 : vector<4x1xf32>
    %c0_141 = arith.constant 0 : index
    %c55_142 = arith.constant 55 : index
    %151 = vector.load %arg21[%c0_141, %c55_142] : memref<4x121xf32, #tpu.memory_space<vmem>>, vector<4x7xf32>
    %cst_143 = arith.constant dense<0xFF800000> : vector<4xf32>
    %152 = vector.multi_reduction <maximumf>, %151, %cst_143 [1] : vector<4x7xf32> to vector<4xf32>
    %153 = vector.shape_cast %152 : vector<4xf32> to vector<4x1xf32>
    %154 = arith.maximumf %150, %153 : vector<4x1xf32>
    %c0_144 = arith.constant 0 : index
    %c66_145 = arith.constant 66 : index
    %155 = vector.load %arg21[%c0_144, %c66_145] : memref<4x121xf32, #tpu.memory_space<vmem>>, vector<4x7xf32>
    %cst_146 = arith.constant dense<0xFF800000> : vector<4xf32>
    %156 = vector.multi_reduction <maximumf>, %155, %cst_146 [1] : vector<4x7xf32> to vector<4xf32>
    %157 = vector.shape_cast %156 : vector<4xf32> to vector<4x1xf32>
    %158 = arith.maximumf %154, %157 : vector<4x1xf32>
    %c0_147 = arith.constant 0 : index
    %c5_148 = arith.constant 5 : index
    %159 = vector.load %arg22[%c0_147, %c5_148] : memref<4x16xf32, #tpu.memory_space<vmem>>, vector<4x1xf32>
    tpu.vector_store %arg22[%c0_147, %c5_148], %158 {strides = array<i32>} : memref<4x16xf32, #tpu.memory_space<vmem>>, vector<4x1xf32>,
    %c0_149 = arith.constant 0 : index
    %c3_150 = arith.constant 3 : index
    %160 = vector.load %arg21[%c0_149, %c3_150] : memref<4x121xf32, #tpu.memory_space<vmem>>, vector<4x7xf32>
    %cst_151 = arith.constant dense<0xFF800000> : vector<4xf32>
    %161 = vector.multi_reduction <maximumf>, %160, %cst_151 [1] : vector<4x7xf32> to vector<4xf32>
    %162 = vector.shape_cast %161 : vector<4xf32> to vector<4x1xf32>
    %c0_152 = arith.constant 0 : index
    %c14 = arith.constant 14 : index
    %163 = vector.load %arg21[%c0_152, %c14] : memref<4x121xf32, #tpu.memory_space<vmem>>, vector<4x7xf32>
    %cst_153 = arith.constant dense<0xFF800000> : vector<4xf32>
    %164 = vector.multi_reduction <maximumf>, %163, %cst_153 [1] : vector<4x7xf32> to vector<4xf32>
    %165 = vector.shape_cast %164 : vector<4xf32> to vector<4x1xf32>
    %166 = arith.maximumf %162, %165 : vector<4x1xf32>
    %c0_154 = arith.constant 0 : index
    %c25_155 = arith.constant 25 : index
    %167 = vector.load %arg21[%c0_154, %c25_155] : memref<4x121xf32, #tpu.memory_space<vmem>>, vector<4x7xf32>
    %cst_156 = arith.constant dense<0xFF800000> : vector<4xf32>
    %168 = vector.multi_reduction <maximumf>, %167, %cst_156 [1] : vector<4x7xf32> to vector<4xf32>
    %169 = vector.shape_cast %168 : vector<4xf32> to vector<4x1xf32>
    %170 = arith.maximumf %166, %169 : vector<4x1xf32>
    %c0_157 = arith.constant 0 : index
    %c36 = arith.constant 36 : index
    %171 = vector.load %arg21[%c0_157, %c36] : memref<4x121xf32, #tpu.memory_space<vmem>>, vector<4x7xf32>
    %cst_158 = arith.constant dense<0xFF800000> : vector<4xf32>
    %172 = vector.multi_reduction <maximumf>, %171, %cst_158 [1] : vector<4x7xf32> to vector<4xf32>
    %173 = vector.shape_cast %172 : vector<4xf32> to vector<4x1xf32>
    %174 = arith.maximumf %170, %173 : vector<4x1xf32>
    %c0_159 = arith.constant 0 : index
    %c47 = arith.constant 47 : index
    %175 = vector.load %arg21[%c0_159, %c47] : memref<4x121xf32, #tpu.memory_space<vmem>>, vector<4x7xf32>
    %cst_160 = arith.constant dense<0xFF800000> : vector<4xf32>
    %176 = vector.multi_reduction <maximumf>, %175, %cst_160 [1] : vector<4x7xf32> to vector<4xf32>
    %177 = vector.shape_cast %176 : vector<4xf32> to vector<4x1xf32>
    %178 = arith.maximumf %174, %177 : vector<4x1xf32>
    %c0_161 = arith.constant 0 : index
    %c58 = arith.constant 58 : index
    %179 = vector.load %arg21[%c0_161, %c58] : memref<4x121xf32, #tpu.memory_space<vmem>>, vector<4x7xf32>
    %cst_162 = arith.constant dense<0xFF800000> : vector<4xf32>
    %180 = vector.multi_reduction <maximumf>, %179, %cst_162 [1] : vector<4x7xf32> to vector<4xf32>
    %181 = vector.shape_cast %180 : vector<4xf32> to vector<4x1xf32>
    %182 = arith.maximumf %178, %181 : vector<4x1xf32>
    %c0_163 = arith.constant 0 : index
    %c69 = arith.constant 69 : index
    %183 = vector.load %arg21[%c0_163, %c69] : memref<4x121xf32, #tpu.memory_space<vmem>>, vector<4x7xf32>
    %cst_164 = arith.constant dense<0xFF800000> : vector<4xf32>
    %184 = vector.multi_reduction <maximumf>, %183, %cst_164 [1] : vector<4x7xf32> to vector<4xf32>
    %185 = vector.shape_cast %184 : vector<4xf32> to vector<4x1xf32>
    %186 = arith.maximumf %182, %185 : vector<4x1xf32>
    %c0_165 = arith.constant 0 : index
    %c6_166 = arith.constant 6 : index
    %187 = vector.load %arg22[%c0_165, %c6_166] : memref<4x16xf32, #tpu.memory_space<vmem>>, vector<4x1xf32>
    tpu.vector_store %arg22[%c0_165, %c6_166], %186 {strides = array<i32>} : memref<4x16xf32, #tpu.memory_space<vmem>>, vector<4x1xf32>,
    %c0_167 = arith.constant 0 : index
    %c33_168 = arith.constant 33 : index
    %188 = vector.load %arg21[%c0_167, %c33_168] : memref<4x121xf32, #tpu.memory_space<vmem>>, vector<4x7xf32>
    %cst_169 = arith.constant dense<0xFF800000> : vector<4xf32>
    %189 = vector.multi_reduction <maximumf>, %188, %cst_169 [1] : vector<4x7xf32> to vector<4xf32>
    %190 = vector.shape_cast %189 : vector<4xf32> to vector<4x1xf32>
    %c0_170 = arith.constant 0 : index
    %c44_171 = arith.constant 44 : index
    %191 = vector.load %arg21[%c0_170, %c44_171] : memref<4x121xf32, #tpu.memory_space<vmem>>, vector<4x7xf32>
    %cst_172 = arith.constant dense<0xFF800000> : vector<4xf32>
    %192 = vector.multi_reduction <maximumf>, %191, %cst_172 [1] : vector<4x7xf32> to vector<4xf32>
    %193 = vector.shape_cast %192 : vector<4xf32> to vector<4x1xf32>
    %194 = arith.maximumf %190, %193 : vector<4x1xf32>
    %c0_173 = arith.constant 0 : index
    %c55_174 = arith.constant 55 : index
    %195 = vector.load %arg21[%c0_173, %c55_174] : memref<4x121xf32, #tpu.memory_space<vmem>>, vector<4x7xf32>
    %cst_175 = arith.constant dense<0xFF800000> : vector<4xf32>
    %196 = vector.multi_reduction <maximumf>, %195, %cst_175 [1] : vector<4x7xf32> to vector<4xf32>
    %197 = vector.shape_cast %196 : vector<4xf32> to vector<4x1xf32>
    %198 = arith.maximumf %194, %197 : vector<4x1xf32>
    %c0_176 = arith.constant 0 : index
    %c66_177 = arith.constant 66 : index
    %199 = vector.load %arg21[%c0_176, %c66_177] : memref<4x121xf32, #tpu.memory_space<vmem>>, vector<4x7xf32>
    %cst_178 = arith.constant dense<0xFF800000> : vector<4xf32>
    %200 = vector.multi_reduction <maximumf>, %199, %cst_178 [1] : vector<4x7xf32> to vector<4xf32>
    %201 = vector.shape_cast %200 : vector<4xf32> to vector<4x1xf32>
    %202 = arith.maximumf %198, %201 : vector<4x1xf32>
    %c0_179 = arith.constant 0 : index
    %c77_180 = arith.constant 77 : index
    %203 = vector.load %arg21[%c0_179, %c77_180] : memref<4x121xf32, #tpu.memory_space<vmem>>, vector<4x7xf32>
    %cst_181 = arith.constant dense<0xFF800000> : vector<4xf32>
    %204 = vector.multi_reduction <maximumf>, %203, %cst_181 [1] : vector<4x7xf32> to vector<4xf32>
    %205 = vector.shape_cast %204 : vector<4xf32> to vector<4x1xf32>
    %206 = arith.maximumf %202, %205 : vector<4x1xf32>
    %c0_182 = arith.constant 0 : index
    %c88_183 = arith.constant 88 : index
    %207 = vector.load %arg21[%c0_182, %c88_183] : memref<4x121xf32, #tpu.memory_space<vmem>>, vector<4x7xf32>
    %cst_184 = arith.constant dense<0xFF800000> : vector<4xf32>
    %208 = vector.multi_reduction <maximumf>, %207, %cst_184 [1] : vector<4x7xf32> to vector<4xf32>
    %209 = vector.shape_cast %208 : vector<4xf32> to vector<4x1xf32>
    %210 = arith.maximumf %206, %209 : vector<4x1xf32>
    %c0_185 = arith.constant 0 : index
    %c99_186 = arith.constant 99 : index
    %211 = vector.load %arg21[%c0_185, %c99_186] : memref<4x121xf32, #tpu.memory_space<vmem>>, vector<4x7xf32>
    %cst_187 = arith.constant dense<0xFF800000> : vector<4xf32>
    %212 = vector.multi_reduction <maximumf>, %211, %cst_187 [1] : vector<4x7xf32> to vector<4xf32>
    %213 = vector.shape_cast %212 : vector<4xf32> to vector<4x1xf32>
    %214 = arith.maximumf %210, %213 : vector<4x1xf32>
    %c0_188 = arith.constant 0 : index
    %c9 = arith.constant 9 : index
    %215 = vector.load %arg22[%c0_188, %c9] : memref<4x16xf32, #tpu.memory_space<vmem>>, vector<4x1xf32>
    tpu.vector_store %arg22[%c0_188, %c9], %214 {strides = array<i32>} : memref<4x16xf32, #tpu.memory_space<vmem>>, vector<4x1xf32>,
    %c0_189 = arith.constant 0 : index
    %c36_190 = arith.constant 36 : index
    %216 = vector.load %arg21[%c0_189, %c36_190] : memref<4x121xf32, #tpu.memory_space<vmem>>, vector<4x7xf32>
    %cst_191 = arith.constant dense<0xFF800000> : vector<4xf32>
    %217 = vector.multi_reduction <maximumf>, %216, %cst_191 [1] : vector<4x7xf32> to vector<4xf32>
    %218 = vector.shape_cast %217 : vector<4xf32> to vector<4x1xf32>
    %c0_192 = arith.constant 0 : index
    %c47_193 = arith.constant 47 : index
    %219 = vector.load %arg21[%c0_192, %c47_193] : memref<4x121xf32, #tpu.memory_space<vmem>>, vector<4x7xf32>
    %cst_194 = arith.constant dense<0xFF800000> : vector<4xf32>
    %220 = vector.multi_reduction <maximumf>, %219, %cst_194 [1] : vector<4x7xf32> to vector<4xf32>
    %221 = vector.shape_cast %220 : vector<4xf32> to vector<4x1xf32>
    %222 = arith.maximumf %218, %221 : vector<4x1xf32>
    %c0_195 = arith.constant 0 : index
    %c58_196 = arith.constant 58 : index
    %223 = vector.load %arg21[%c0_195, %c58_196] : memref<4x121xf32, #tpu.memory_space<vmem>>, vector<4x7xf32>
    %cst_197 = arith.constant dense<0xFF800000> : vector<4xf32>
    %224 = vector.multi_reduction <maximumf>, %223, %cst_197 [1] : vector<4x7xf32> to vector<4xf32>
    %225 = vector.shape_cast %224 : vector<4xf32> to vector<4x1xf32>
    %226 = arith.maximumf %222, %225 : vector<4x1xf32>
    %c0_198 = arith.constant 0 : index
    %c69_199 = arith.constant 69 : index
    %227 = vector.load %arg21[%c0_198, %c69_199] : memref<4x121xf32, #tpu.memory_space<vmem>>, vector<4x7xf32>
    %cst_200 = arith.constant dense<0xFF800000> : vector<4xf32>
    %228 = vector.multi_reduction <maximumf>, %227, %cst_200 [1] : vector<4x7xf32> to vector<4xf32>
    %229 = vector.shape_cast %228 : vector<4xf32> to vector<4x1xf32>
    %230 = arith.maximumf %226, %229 : vector<4x1xf32>
    %c0_201 = arith.constant 0 : index
    %c80 = arith.constant 80 : index
    %231 = vector.load %arg21[%c0_201, %c80] : memref<4x121xf32, #tpu.memory_space<vmem>>, vector<4x7xf32>
    %cst_202 = arith.constant dense<0xFF800000> : vector<4xf32>
    %232 = vector.multi_reduction <maximumf>, %231, %cst_202 [1] : vector<4x7xf32> to vector<4xf32>
    %233 = vector.shape_cast %232 : vector<4xf32> to vector<4x1xf32>
    %234 = arith.maximumf %230, %233 : vector<4x1xf32>
    %c0_203 = arith.constant 0 : index
    %c91 = arith.constant 91 : index
    %235 = vector.load %arg21[%c0_203, %c91] : memref<4x121xf32, #tpu.memory_space<vmem>>, vector<4x7xf32>
    %cst_204 = arith.constant dense<0xFF800000> : vector<4xf32>
    %236 = vector.multi_reduction <maximumf>, %235, %cst_204 [1] : vector<4x7xf32> to vector<4xf32>
    %237 = vector.shape_cast %236 : vector<4xf32> to vector<4x1xf32>
    %238 = arith.maximumf %234, %237 : vector<4x1xf32>
    %c0_205 = arith.constant 0 : index
    %c102 = arith.constant 102 : index
    %239 = vector.load %arg21[%c0_205, %c102] : memref<4x121xf32, #tpu.memory_space<vmem>>, vector<4x7xf32>
    %cst_206 = arith.constant dense<0xFF800000> : vector<4xf32>
    %240 = vector.multi_reduction <maximumf>, %239, %cst_206 [1] : vector<4x7xf32> to vector<4xf32>
    %241 = vector.shape_cast %240 : vector<4xf32> to vector<4x1xf32>
    %242 = arith.maximumf %238, %241 : vector<4x1xf32>
    %c0_207 = arith.constant 0 : index
    %c10 = arith.constant 10 : index
    %243 = vector.load %arg22[%c0_207, %c10] : memref<4x16xf32, #tpu.memory_space<vmem>>, vector<4x1xf32>
    tpu.vector_store %arg22[%c0_207, %c10], %242 {strides = array<i32>} : memref<4x16xf32, #tpu.memory_space<vmem>>, vector<4x1xf32>,
    %c0_208 = arith.constant 0 : index
    %c0_209 = arith.constant 0 : index
    %c0_210 = arith.constant 0 : index
    %244 = vector.load %arg7[%c0_208, %c0_209, %c0_210] : memref<9x4x4xf32, #tpu.memory_space<vmem>>, vector<1x4x4xf32>
    %245 = vector.shape_cast %244 : vector<1x4x4xf32> to vector<4x4xf32>
    %c0_211 = arith.constant 0 : index
    %c0_212 = arith.constant 0 : index
    %246 = vector.load %arg22[%c0_211, %c0_212] : memref<4x16xf32, #tpu.memory_space<vmem>>, vector<4x2xf32>
    %cst_213 = arith.constant dense<0.000000e+00> : vector<4x2xf32>
    %247 = tpu.matmul %245, %246, %cst_213 {dimension_numbers = #tpu.dot_dimension_numbers<[1], [0], [0], [1], [0, 0, 1, 1], [], []>} : vector<4x4xf32>, vector<4x2xf32>, vector<4x2xf32> -> vector<4x2xf32>
    %c1_214 = arith.constant 1 : index
    %c0_215 = arith.constant 0 : index
    %c0_216 = arith.constant 0 : index
    %248 = vector.load %arg7[%c1_214, %c0_215, %c0_216] : memref<9x4x4xf32, #tpu.memory_space<vmem>>, vector<1x4x4xf32>
    %249 = vector.shape_cast %248 : vector<1x4x4xf32> to vector<4x4xf32>
    %c0_217 = arith.constant 0 : index
    %c1_218 = arith.constant 1 : index
    %250 = vector.load %arg22[%c0_217, %c1_218] : memref<4x16xf32, #tpu.memory_space<vmem>>, vector<4x2xf32>
    %cst_219 = arith.constant dense<0.000000e+00> : vector<4x2xf32>
    %251 = tpu.matmul %249, %250, %cst_219 {dimension_numbers = #tpu.dot_dimension_numbers<[1], [0], [0], [1], [0, 0, 1, 1], [], []>} : vector<4x4xf32>, vector<4x2xf32>, vector<4x2xf32> -> vector<4x2xf32>
    %252 = arith.addf %247, %251 : vector<4x2xf32>
    %c2_220 = arith.constant 2 : index
    %c0_221 = arith.constant 0 : index
    %c0_222 = arith.constant 0 : index
    %253 = vector.load %arg7[%c2_220, %c0_221, %c0_222] : memref<9x4x4xf32, #tpu.memory_space<vmem>>, vector<1x4x4xf32>
    %254 = vector.shape_cast %253 : vector<1x4x4xf32> to vector<4x4xf32>
    %c0_223 = arith.constant 0 : index
    %c2_224 = arith.constant 2 : index
    %255 = vector.load %arg22[%c0_223, %c2_224] : memref<4x16xf32, #tpu.memory_space<vmem>>, vector<4x2xf32>
    %cst_225 = arith.constant dense<0.000000e+00> : vector<4x2xf32>
    %256 = tpu.matmul %254, %255, %cst_225 {dimension_numbers = #tpu.dot_dimension_numbers<[1], [0], [0], [1], [0, 0, 1, 1], [], []>} : vector<4x4xf32>, vector<4x2xf32>, vector<4x2xf32> -> vector<4x2xf32>
    %257 = arith.addf %252, %256 : vector<4x2xf32>
    %c3_226 = arith.constant 3 : index
    %c0_227 = arith.constant 0 : index
    %c0_228 = arith.constant 0 : index
    %258 = vector.load %arg7[%c3_226, %c0_227, %c0_228] : memref<9x4x4xf32, #tpu.memory_space<vmem>>, vector<1x4x4xf32>
    %259 = vector.shape_cast %258 : vector<1x4x4xf32> to vector<4x4xf32>
    %c0_229 = arith.constant 0 : index
    %c4_230 = arith.constant 4 : index
    %260 = vector.load %arg22[%c0_229, %c4_230] : memref<4x16xf32, #tpu.memory_space<vmem>>, vector<4x2xf32>
    %cst_231 = arith.constant dense<0.000000e+00> : vector<4x2xf32>
    %261 = tpu.matmul %259, %260, %cst_231 {dimension_numbers = #tpu.dot_dimension_numbers<[1], [0], [0], [1], [0, 0, 1, 1], [], []>} : vector<4x4xf32>, vector<4x2xf32>, vector<4x2xf32> -> vector<4x2xf32>
    %262 = arith.addf %257, %261 : vector<4x2xf32>
    %c4_232 = arith.constant 4 : index
    %c0_233 = arith.constant 0 : index
    %c0_234 = arith.constant 0 : index
    %263 = vector.load %arg7[%c4_232, %c0_233, %c0_234] : memref<9x4x4xf32, #tpu.memory_space<vmem>>, vector<1x4x4xf32>
    %264 = vector.shape_cast %263 : vector<1x4x4xf32> to vector<4x4xf32>
    %c0_235 = arith.constant 0 : index
    %c5_236 = arith.constant 5 : index
    %265 = vector.load %arg22[%c0_235, %c5_236] : memref<4x16xf32, #tpu.memory_space<vmem>>, vector<4x2xf32>
    %cst_237 = arith.constant dense<0.000000e+00> : vector<4x2xf32>
    %266 = tpu.matmul %264, %265, %cst_237 {dimension_numbers = #tpu.dot_dimension_numbers<[1], [0], [0], [1], [0, 0, 1, 1], [], []>} : vector<4x4xf32>, vector<4x2xf32>, vector<4x2xf32> -> vector<4x2xf32>
    %267 = arith.addf %262, %266 : vector<4x2xf32>
    %c5_238 = arith.constant 5 : index
    %c0_239 = arith.constant 0 : index
    %c0_240 = arith.constant 0 : index
    %268 = vector.load %arg7[%c5_238, %c0_239, %c0_240] : memref<9x4x4xf32, #tpu.memory_space<vmem>>, vector<1x4x4xf32>
    %269 = vector.shape_cast %268 : vector<1x4x4xf32> to vector<4x4xf32>
    %c0_241 = arith.constant 0 : index
    %c6_242 = arith.constant 6 : index
    %270 = vector.load %arg22[%c0_241, %c6_242] : memref<4x16xf32, #tpu.memory_space<vmem>>, vector<4x2xf32>
    %cst_243 = arith.constant dense<0.000000e+00> : vector<4x2xf32>
    %271 = tpu.matmul %269, %270, %cst_243 {dimension_numbers = #tpu.dot_dimension_numbers<[1], [0], [0], [1], [0, 0, 1, 1], [], []>} : vector<4x4xf32>, vector<4x2xf32>, vector<4x2xf32> -> vector<4x2xf32>
    %272 = arith.addf %267, %271 : vector<4x2xf32>
    %c6_244 = arith.constant 6 : index
    %c0_245 = arith.constant 0 : index
    %c0_246 = arith.constant 0 : index
    %273 = vector.load %arg7[%c6_244, %c0_245, %c0_246] : memref<9x4x4xf32, #tpu.memory_space<vmem>>, vector<1x4x4xf32>
    %274 = vector.shape_cast %273 : vector<1x4x4xf32> to vector<4x4xf32>
    %c0_247 = arith.constant 0 : index
    %c8_248 = arith.constant 8 : index
    %275 = vector.load %arg22[%c0_247, %c8_248] : memref<4x16xf32, #tpu.memory_space<vmem>>, vector<4x2xf32>
    %cst_249 = arith.constant dense<0.000000e+00> : vector<4x2xf32>
    %276 = tpu.matmul %274, %275, %cst_249 {dimension_numbers = #tpu.dot_dimension_numbers<[1], [0], [0], [1], [0, 0, 1, 1], [], []>} : vector<4x4xf32>, vector<4x2xf32>, vector<4x2xf32> -> vector<4x2xf32>
    %277 = arith.addf %272, %276 : vector<4x2xf32>
    %c7_250 = arith.constant 7 : index
    %c0_251 = arith.constant 0 : index
    %c0_252 = arith.constant 0 : index
    %278 = vector.load %arg7[%c7_250, %c0_251, %c0_252] : memref<9x4x4xf32, #tpu.memory_space<vmem>>, vector<1x4x4xf32>
    %279 = vector.shape_cast %278 : vector<1x4x4xf32> to vector<4x4xf32>
    %c0_253 = arith.constant 0 : index
    %c9_254 = arith.constant 9 : index
    %280 = vector.load %arg22[%c0_253, %c9_254] : memref<4x16xf32, #tpu.memory_space<vmem>>, vector<4x2xf32>
    %cst_255 = arith.constant dense<0.000000e+00> : vector<4x2xf32>
    %281 = tpu.matmul %279, %280, %cst_255 {dimension_numbers = #tpu.dot_dimension_numbers<[1], [0], [0], [1], [0, 0, 1, 1], [], []>} : vector<4x4xf32>, vector<4x2xf32>, vector<4x2xf32> -> vector<4x2xf32>
    %282 = arith.addf %277, %281 : vector<4x2xf32>
    %c8_256 = arith.constant 8 : index
    %c0_257 = arith.constant 0 : index
    %c0_258 = arith.constant 0 : index
    %283 = vector.load %arg7[%c8_256, %c0_257, %c0_258] : memref<9x4x4xf32, #tpu.memory_space<vmem>>, vector<1x4x4xf32>
    %284 = vector.shape_cast %283 : vector<1x4x4xf32> to vector<4x4xf32>
    %c0_259 = arith.constant 0 : index
    %c10_260 = arith.constant 10 : index
    %285 = vector.load %arg22[%c0_259, %c10_260] : memref<4x16xf32, #tpu.memory_space<vmem>>, vector<4x2xf32>
    %cst_261 = arith.constant dense<0.000000e+00> : vector<4x2xf32>
    %286 = tpu.matmul %284, %285, %cst_261 {dimension_numbers = #tpu.dot_dimension_numbers<[1], [0], [0], [1], [0, 0, 1, 1], [], []>} : vector<4x4xf32>, vector<4x2xf32>, vector<4x2xf32> -> vector<4x2xf32>
    %287 = arith.addf %282, %286 : vector<4x2xf32>
    %c0_262 = arith.constant 0 : index
    %c0_263 = arith.constant 0 : index
    %288 = vector.load %arg8[%c0_262, %c0_263] : memref<4x1xf32, #tpu.memory_space<vmem>>, vector<4x1xf32>
    %289 = vector.broadcast %288 : vector<4x1xf32> to vector<4x2xf32>
    %290 = arith.addf %287, %289 : vector<4x2xf32>
    %cst_264 = arith.constant 0.000000e+00 : f32
    %291 = vector.broadcast %cst_264 : f32 to vector<4x2xf32>
    %292 = arith.maximumf %290, %291 : vector<4x2xf32>
    %c0_265 = arith.constant 0 : index
    %c5_266 = arith.constant 5 : index
    %293 = vector.load %arg23[%c0_265, %c5_266] : memref<4x16xf32, #tpu.memory_space<vmem>>, vector<4x2xf32>
    tpu.vector_store %arg23[%c0_265, %c5_266], %292 {strides = array<i32>} : memref<4x16xf32, #tpu.memory_space<vmem>>, vector<4x2xf32>,
    %c0_267 = arith.constant 0 : index
    %c0_268 = arith.constant 0 : index
    %c0_269 = arith.constant 0 : index
    %294 = vector.load %arg7[%c0_267, %c0_268, %c0_269] : memref<9x4x4xf32, #tpu.memory_space<vmem>>, vector<1x4x4xf32>
    %295 = vector.shape_cast %294 : vector<1x4x4xf32> to vector<4x4xf32>
    %c0_270 = arith.constant 0 : index
    %c4_271 = arith.constant 4 : index
    %296 = vector.load %arg22[%c0_270, %c4_271] : memref<4x16xf32, #tpu.memory_space<vmem>>, vector<4x2xf32>
    %cst_272 = arith.constant dense<0.000000e+00> : vector<4x2xf32>
    %297 = tpu.matmul %295, %296, %cst_272 {dimension_numbers = #tpu.dot_dimension_numbers<[1], [0], [0], [1], [0, 0, 1, 1], [], []>} : vector<4x4xf32>, vector<4x2xf32>, vector<4x2xf32> -> vector<4x2xf32>
    %c1_273 = arith.constant 1 : index
    %c0_274 = arith.constant 0 : index
    %c0_275 = arith.constant 0 : index
    %298 = vector.load %arg7[%c1_273, %c0_274, %c0_275] : memref<9x4x4xf32, #tpu.memory_space<vmem>>, vector<1x4x4xf32>
    %299 = vector.shape_cast %298 : vector<1x4x4xf32> to vector<4x4xf32>
    %c0_276 = arith.constant 0 : index
    %c5_277 = arith.constant 5 : index
    %300 = vector.load %arg22[%c0_276, %c5_277] : memref<4x16xf32, #tpu.memory_space<vmem>>, vector<4x2xf32>
    %cst_278 = arith.constant dense<0.000000e+00> : vector<4x2xf32>
    %301 = tpu.matmul %299, %300, %cst_278 {dimension_numbers = #tpu.dot_dimension_numbers<[1], [0], [0], [1], [0, 0, 1, 1], [], []>} : vector<4x4xf32>, vector<4x2xf32>, vector<4x2xf32> -> vector<4x2xf32>
    %302 = arith.addf %297, %301 : vector<4x2xf32>
    %c2_279 = arith.constant 2 : index
    %c0_280 = arith.constant 0 : index
    %c0_281 = arith.constant 0 : index
    %303 = vector.load %arg7[%c2_279, %c0_280, %c0_281] : memref<9x4x4xf32, #tpu.memory_space<vmem>>, vector<1x4x4xf32>
    %304 = vector.shape_cast %303 : vector<1x4x4xf32> to vector<4x4xf32>
    %c0_282 = arith.constant 0 : index
    %c6_283 = arith.constant 6 : index
    %305 = vector.load %arg22[%c0_282, %c6_283] : memref<4x16xf32, #tpu.memory_space<vmem>>, vector<4x2xf32>
    %cst_284 = arith.constant dense<0.000000e+00> : vector<4x2xf32>
    %306 = tpu.matmul %304, %305, %cst_284 {dimension_numbers = #tpu.dot_dimension_numbers<[1], [0], [0], [1], [0, 0, 1, 1], [], []>} : vector<4x4xf32>, vector<4x2xf32>, vector<4x2xf32> -> vector<4x2xf32>
    %307 = arith.addf %302, %306 : vector<4x2xf32>
    %c3_285 = arith.constant 3 : index
    %c0_286 = arith.constant 0 : index
    %c0_287 = arith.constant 0 : index
    %308 = vector.load %arg7[%c3_285, %c0_286, %c0_287] : memref<9x4x4xf32, #tpu.memory_space<vmem>>, vector<1x4x4xf32>
    %309 = vector.shape_cast %308 : vector<1x4x4xf32> to vector<4x4xf32>
    %c0_288 = arith.constant 0 : index
    %c8_289 = arith.constant 8 : index
    %310 = vector.load %arg22[%c0_288, %c8_289] : memref<4x16xf32, #tpu.memory_space<vmem>>, vector<4x2xf32>
    %cst_290 = arith.constant dense<0.000000e+00> : vector<4x2xf32>
    %311 = tpu.matmul %309, %310, %cst_290 {dimension_numbers = #tpu.dot_dimension_numbers<[1], [0], [0], [1], [0, 0, 1, 1], [], []>} : vector<4x4xf32>, vector<4x2xf32>, vector<4x2xf32> -> vector<4x2xf32>
    %312 = arith.addf %307, %311 : vector<4x2xf32>
    %c4_291 = arith.constant 4 : index
    %c0_292 = arith.constant 0 : index
    %c0_293 = arith.constant 0 : index
    %313 = vector.load %arg7[%c4_291, %c0_292, %c0_293] : memref<9x4x4xf32, #tpu.memory_space<vmem>>, vector<1x4x4xf32>
    %314 = vector.shape_cast %313 : vector<1x4x4xf32> to vector<4x4xf32>
    %c0_294 = arith.constant 0 : index
    %c9_295 = arith.constant 9 : index
    %315 = vector.load %arg22[%c0_294, %c9_295] : memref<4x16xf32, #tpu.memory_space<vmem>>, vector<4x2xf32>
    %cst_296 = arith.constant dense<0.000000e+00> : vector<4x2xf32>
    %316 = tpu.matmul %314, %315, %cst_296 {dimension_numbers = #tpu.dot_dimension_numbers<[1], [0], [0], [1], [0, 0, 1, 1], [], []>} : vector<4x4xf32>, vector<4x2xf32>, vector<4x2xf32> -> vector<4x2xf32>
    %317 = arith.addf %312, %316 : vector<4x2xf32>
    %c5_297 = arith.constant 5 : index
    %c0_298 = arith.constant 0 : index
    %c0_299 = arith.constant 0 : index
    %318 = vector.load %arg7[%c5_297, %c0_298, %c0_299] : memref<9x4x4xf32, #tpu.memory_space<vmem>>, vector<1x4x4xf32>
    %319 = vector.shape_cast %318 : vector<1x4x4xf32> to vector<4x4xf32>
    %c0_300 = arith.constant 0 : index
    %c10_301 = arith.constant 10 : index
    %320 = vector.load %arg22[%c0_300, %c10_301] : memref<4x16xf32, #tpu.memory_space<vmem>>, vector<4x2xf32>
    %cst_302 = arith.constant dense<0.000000e+00> : vector<4x2xf32>
    %321 = tpu.matmul %319, %320, %cst_302 {dimension_numbers = #tpu.dot_dimension_numbers<[1], [0], [0], [1], [0, 0, 1, 1], [], []>} : vector<4x4xf32>, vector<4x2xf32>, vector<4x2xf32> -> vector<4x2xf32>
    %322 = arith.addf %317, %321 : vector<4x2xf32>
    %c6_303 = arith.constant 6 : index
    %c0_304 = arith.constant 0 : index
    %c0_305 = arith.constant 0 : index
    %323 = vector.load %arg7[%c6_303, %c0_304, %c0_305] : memref<9x4x4xf32, #tpu.memory_space<vmem>>, vector<1x4x4xf32>
    %324 = vector.shape_cast %323 : vector<1x4x4xf32> to vector<4x4xf32>
    %c0_306 = arith.constant 0 : index
    %c12 = arith.constant 12 : index
    %325 = vector.load %arg22[%c0_306, %c12] : memref<4x16xf32, #tpu.memory_space<vmem>>, vector<4x2xf32>
    %cst_307 = arith.constant dense<0.000000e+00> : vector<4x2xf32>
    %326 = tpu.matmul %324, %325, %cst_307 {dimension_numbers = #tpu.dot_dimension_numbers<[1], [0], [0], [1], [0, 0, 1, 1], [], []>} : vector<4x4xf32>, vector<4x2xf32>, vector<4x2xf32> -> vector<4x2xf32>
    %327 = arith.addf %322, %326 : vector<4x2xf32>
    %c7_308 = arith.constant 7 : index
    %c0_309 = arith.constant 0 : index
    %c0_310 = arith.constant 0 : index
    %328 = vector.load %arg7[%c7_308, %c0_309, %c0_310] : memref<9x4x4xf32, #tpu.memory_space<vmem>>, vector<1x4x4xf32>
    %329 = vector.shape_cast %328 : vector<1x4x4xf32> to vector<4x4xf32>
    %c0_311 = arith.constant 0 : index
    %c13 = arith.constant 13 : index
    %330 = vector.load %arg22[%c0_311, %c13] : memref<4x16xf32, #tpu.memory_space<vmem>>, vector<4x2xf32>
    %cst_312 = arith.constant dense<0.000000e+00> : vector<4x2xf32>
    %331 = tpu.matmul %329, %330, %cst_312 {dimension_numbers = #tpu.dot_dimension_numbers<[1], [0], [0], [1], [0, 0, 1, 1], [], []>} : vector<4x4xf32>, vector<4x2xf32>, vector<4x2xf32> -> vector<4x2xf32>
    %332 = arith.addf %327, %331 : vector<4x2xf32>
    %c8_313 = arith.constant 8 : index
    %c0_314 = arith.constant 0 : index
    %c0_315 = arith.constant 0 : index
    %333 = vector.load %arg7[%c8_313, %c0_314, %c0_315] : memref<9x4x4xf32, #tpu.memory_space<vmem>>, vector<1x4x4xf32>
    %334 = vector.shape_cast %333 : vector<1x4x4xf32> to vector<4x4xf32>
    %c0_316 = arith.constant 0 : index
    %c14_317 = arith.constant 14 : index
    %335 = vector.load %arg22[%c0_316, %c14_317] : memref<4x16xf32, #tpu.memory_space<vmem>>, vector<4x2xf32>
    %cst_318 = arith.constant dense<0.000000e+00> : vector<4x2xf32>
    %336 = tpu.matmul %334, %335, %cst_318 {dimension_numbers = #tpu.dot_dimension_numbers<[1], [0], [0], [1], [0, 0, 1, 1], [], []>} : vector<4x4xf32>, vector<4x2xf32>, vector<4x2xf32> -> vector<4x2xf32>
    %337 = arith.addf %332, %336 : vector<4x2xf32>
    %c0_319 = arith.constant 0 : index
    %c0_320 = arith.constant 0 : index
    %338 = vector.load %arg8[%c0_319, %c0_320] : memref<4x1xf32, #tpu.memory_space<vmem>>, vector<4x1xf32>
    %339 = vector.broadcast %338 : vector<4x1xf32> to vector<4x2xf32>
    %340 = arith.addf %337, %339 : vector<4x2xf32>
    %cst_321 = arith.constant 0.000000e+00 : f32
    %341 = vector.broadcast %cst_321 : f32 to vector<4x2xf32>
    %342 = arith.maximumf %340, %341 : vector<4x2xf32>
    %c0_322 = arith.constant 0 : index
    %c9_323 = arith.constant 9 : index
    %343 = vector.load %arg23[%c0_322, %c9_323] : memref<4x16xf32, #tpu.memory_space<vmem>>, vector<4x2xf32>
    tpu.vector_store %arg23[%c0_322, %c9_323], %342 {strides = array<i32>} : memref<4x16xf32, #tpu.memory_space<vmem>>, vector<4x2xf32>,
    %c0_324 = arith.constant 0 : index
    %c0_325 = arith.constant 0 : index
    %c0_326 = arith.constant 0 : index
    %344 = vector.load %arg9[%c0_324, %c0_325, %c0_326] : memref<9x4x4xf32, #tpu.memory_space<vmem>>, vector<1x4x4xf32>
    %345 = vector.shape_cast %344 : vector<1x4x4xf32> to vector<4x4xf32>
    %c0_327 = arith.constant 0 : index
    %c0_328 = arith.constant 0 : index
    %346 = vector.load %arg23[%c0_327, %c0_328] : memref<4x16xf32, #tpu.memory_space<vmem>>, vector<4x2xf32>
    %cst_329 = arith.constant dense<0.000000e+00> : vector<4x2xf32>
    %347 = tpu.matmul %345, %346, %cst_329 {dimension_numbers = #tpu.dot_dimension_numbers<[1], [0], [0], [1], [0, 0, 1, 1], [], []>} : vector<4x4xf32>, vector<4x2xf32>, vector<4x2xf32> -> vector<4x2xf32>
    %c1_330 = arith.constant 1 : index
    %c0_331 = arith.constant 0 : index
    %c0_332 = arith.constant 0 : index
    %348 = vector.load %arg9[%c1_330, %c0_331, %c0_332] : memref<9x4x4xf32, #tpu.memory_space<vmem>>, vector<1x4x4xf32>
    %349 = vector.shape_cast %348 : vector<1x4x4xf32> to vector<4x4xf32>
    %c0_333 = arith.constant 0 : index
    %c1_334 = arith.constant 1 : index
    %350 = vector.load %arg23[%c0_333, %c1_334] : memref<4x16xf32, #tpu.memory_space<vmem>>, vector<4x2xf32>
    %cst_335 = arith.constant dense<0.000000e+00> : vector<4x2xf32>
    %351 = tpu.matmul %349, %350, %cst_335 {dimension_numbers = #tpu.dot_dimension_numbers<[1], [0], [0], [1], [0, 0, 1, 1], [], []>} : vector<4x4xf32>, vector<4x2xf32>, vector<4x2xf32> -> vector<4x2xf32>
    %352 = arith.addf %347, %351 : vector<4x2xf32>
    %c2_336 = arith.constant 2 : index
    %c0_337 = arith.constant 0 : index
    %c0_338 = arith.constant 0 : index
    %353 = vector.load %arg9[%c2_336, %c0_337, %c0_338] : memref<9x4x4xf32, #tpu.memory_space<vmem>>, vector<1x4x4xf32>
    %354 = vector.shape_cast %353 : vector<1x4x4xf32> to vector<4x4xf32>
    %c0_339 = arith.constant 0 : index
    %c2_340 = arith.constant 2 : index
    %355 = vector.load %arg23[%c0_339, %c2_340] : memref<4x16xf32, #tpu.memory_space<vmem>>, vector<4x2xf32>
    %cst_341 = arith.constant dense<0.000000e+00> : vector<4x2xf32>
    %356 = tpu.matmul %354, %355, %cst_341 {dimension_numbers = #tpu.dot_dimension_numbers<[1], [0], [0], [1], [0, 0, 1, 1], [], []>} : vector<4x4xf32>, vector<4x2xf32>, vector<4x2xf32> -> vector<4x2xf32>
    %357 = arith.addf %352, %356 : vector<4x2xf32>
    %c3_342 = arith.constant 3 : index
    %c0_343 = arith.constant 0 : index
    %c0_344 = arith.constant 0 : index
    %358 = vector.load %arg9[%c3_342, %c0_343, %c0_344] : memref<9x4x4xf32, #tpu.memory_space<vmem>>, vector<1x4x4xf32>
    %359 = vector.shape_cast %358 : vector<1x4x4xf32> to vector<4x4xf32>
    %c0_345 = arith.constant 0 : index
    %c4_346 = arith.constant 4 : index
    %360 = vector.load %arg23[%c0_345, %c4_346] : memref<4x16xf32, #tpu.memory_space<vmem>>, vector<4x2xf32>
    %cst_347 = arith.constant dense<0.000000e+00> : vector<4x2xf32>
    %361 = tpu.matmul %359, %360, %cst_347 {dimension_numbers = #tpu.dot_dimension_numbers<[1], [0], [0], [1], [0, 0, 1, 1], [], []>} : vector<4x4xf32>, vector<4x2xf32>, vector<4x2xf32> -> vector<4x2xf32>
    %362 = arith.addf %357, %361 : vector<4x2xf32>
    %c4_348 = arith.constant 4 : index
    %c0_349 = arith.constant 0 : index
    %c0_350 = arith.constant 0 : index
    %363 = vector.load %arg9[%c4_348, %c0_349, %c0_350] : memref<9x4x4xf32, #tpu.memory_space<vmem>>, vector<1x4x4xf32>
    %364 = vector.shape_cast %363 : vector<1x4x4xf32> to vector<4x4xf32>
    %c0_351 = arith.constant 0 : index
    %c5_352 = arith.constant 5 : index
    %365 = vector.load %arg23[%c0_351, %c5_352] : memref<4x16xf32, #tpu.memory_space<vmem>>, vector<4x2xf32>
    %cst_353 = arith.constant dense<0.000000e+00> : vector<4x2xf32>
    %366 = tpu.matmul %364, %365, %cst_353 {dimension_numbers = #tpu.dot_dimension_numbers<[1], [0], [0], [1], [0, 0, 1, 1], [], []>} : vector<4x4xf32>, vector<4x2xf32>, vector<4x2xf32> -> vector<4x2xf32>
    %367 = arith.addf %362, %366 : vector<4x2xf32>
    %c5_354 = arith.constant 5 : index
    %c0_355 = arith.constant 0 : index
    %c0_356 = arith.constant 0 : index
    %368 = vector.load %arg9[%c5_354, %c0_355, %c0_356] : memref<9x4x4xf32, #tpu.memory_space<vmem>>, vector<1x4x4xf32>
    %369 = vector.shape_cast %368 : vector<1x4x4xf32> to vector<4x4xf32>
    %c0_357 = arith.constant 0 : index
    %c6_358 = arith.constant 6 : index
    %370 = vector.load %arg23[%c0_357, %c6_358] : memref<4x16xf32, #tpu.memory_space<vmem>>, vector<4x2xf32>
    %cst_359 = arith.constant dense<0.000000e+00> : vector<4x2xf32>
    %371 = tpu.matmul %369, %370, %cst_359 {dimension_numbers = #tpu.dot_dimension_numbers<[1], [0], [0], [1], [0, 0, 1, 1], [], []>} : vector<4x4xf32>, vector<4x2xf32>, vector<4x2xf32> -> vector<4x2xf32>
    %372 = arith.addf %367, %371 : vector<4x2xf32>
    %c6_360 = arith.constant 6 : index
    %c0_361 = arith.constant 0 : index
    %c0_362 = arith.constant 0 : index
    %373 = vector.load %arg9[%c6_360, %c0_361, %c0_362] : memref<9x4x4xf32, #tpu.memory_space<vmem>>, vector<1x4x4xf32>
    %374 = vector.shape_cast %373 : vector<1x4x4xf32> to vector<4x4xf32>
    %c0_363 = arith.constant 0 : index
    %c8_364 = arith.constant 8 : index
    %375 = vector.load %arg23[%c0_363, %c8_364] : memref<4x16xf32, #tpu.memory_space<vmem>>, vector<4x2xf32>
    %cst_365 = arith.constant dense<0.000000e+00> : vector<4x2xf32>
    %376 = tpu.matmul %374, %375, %cst_365 {dimension_numbers = #tpu.dot_dimension_numbers<[1], [0], [0], [1], [0, 0, 1, 1], [], []>} : vector<4x4xf32>, vector<4x2xf32>, vector<4x2xf32> -> vector<4x2xf32>
    %377 = arith.addf %372, %376 : vector<4x2xf32>
    %c7_366 = arith.constant 7 : index
    %c0_367 = arith.constant 0 : index
    %c0_368 = arith.constant 0 : index
    %378 = vector.load %arg9[%c7_366, %c0_367, %c0_368] : memref<9x4x4xf32, #tpu.memory_space<vmem>>, vector<1x4x4xf32>
    %379 = vector.shape_cast %378 : vector<1x4x4xf32> to vector<4x4xf32>
    %c0_369 = arith.constant 0 : index
    %c9_370 = arith.constant 9 : index
    %380 = vector.load %arg23[%c0_369, %c9_370] : memref<4x16xf32, #tpu.memory_space<vmem>>, vector<4x2xf32>
    %cst_371 = arith.constant dense<0.000000e+00> : vector<4x2xf32>
    %381 = tpu.matmul %379, %380, %cst_371 {dimension_numbers = #tpu.dot_dimension_numbers<[1], [0], [0], [1], [0, 0, 1, 1], [], []>} : vector<4x4xf32>, vector<4x2xf32>, vector<4x2xf32> -> vector<4x2xf32>
    %382 = arith.addf %377, %381 : vector<4x2xf32>
    %c8_372 = arith.constant 8 : index
    %c0_373 = arith.constant 0 : index
    %c0_374 = arith.constant 0 : index
    %383 = vector.load %arg9[%c8_372, %c0_373, %c0_374] : memref<9x4x4xf32, #tpu.memory_space<vmem>>, vector<1x4x4xf32>
    %384 = vector.shape_cast %383 : vector<1x4x4xf32> to vector<4x4xf32>
    %c0_375 = arith.constant 0 : index
    %c10_376 = arith.constant 10 : index
    %385 = vector.load %arg23[%c0_375, %c10_376] : memref<4x16xf32, #tpu.memory_space<vmem>>, vector<4x2xf32>
    %cst_377 = arith.constant dense<0.000000e+00> : vector<4x2xf32>
    %386 = tpu.matmul %384, %385, %cst_377 {dimension_numbers = #tpu.dot_dimension_numbers<[1], [0], [0], [1], [0, 0, 1, 1], [], []>} : vector<4x4xf32>, vector<4x2xf32>, vector<4x2xf32> -> vector<4x2xf32>
    %387 = arith.addf %382, %386 : vector<4x2xf32>
    %c0_378 = arith.constant 0 : index
    %c0_379 = arith.constant 0 : index
    %388 = vector.load %arg10[%c0_378, %c0_379] : memref<4x1xf32, #tpu.memory_space<vmem>>, vector<4x1xf32>
    %389 = vector.broadcast %388 : vector<4x1xf32> to vector<4x2xf32>
    %390 = arith.addf %387, %389 : vector<4x2xf32>
    %cst_380 = arith.constant 0.000000e+00 : f32
    %391 = vector.broadcast %cst_380 : f32 to vector<4x2xf32>
    %392 = arith.maximumf %390, %391 : vector<4x2xf32>
    %c0_381 = arith.constant 0 : index
    %c5_382 = arith.constant 5 : index
    %393 = vector.load %arg24[%c0_381, %c5_382] : memref<4x16xf32, #tpu.memory_space<vmem>>, vector<4x2xf32>
    tpu.vector_store %arg24[%c0_381, %c5_382], %392 {strides = array<i32>} : memref<4x16xf32, #tpu.memory_space<vmem>>, vector<4x2xf32>,
    %c0_383 = arith.constant 0 : index
    %c0_384 = arith.constant 0 : index
    %c0_385 = arith.constant 0 : index
    %394 = vector.load %arg9[%c0_383, %c0_384, %c0_385] : memref<9x4x4xf32, #tpu.memory_space<vmem>>, vector<1x4x4xf32>
    %395 = vector.shape_cast %394 : vector<1x4x4xf32> to vector<4x4xf32>
    %c0_386 = arith.constant 0 : index
    %c4_387 = arith.constant 4 : index
    %396 = vector.load %arg23[%c0_386, %c4_387] : memref<4x16xf32, #tpu.memory_space<vmem>>, vector<4x2xf32>
    %cst_388 = arith.constant dense<0.000000e+00> : vector<4x2xf32>
    %397 = tpu.matmul %395, %396, %cst_388 {dimension_numbers = #tpu.dot_dimension_numbers<[1], [0], [0], [1], [0, 0, 1, 1], [], []>} : vector<4x4xf32>, vector<4x2xf32>, vector<4x2xf32> -> vector<4x2xf32>
    %c1_389 = arith.constant 1 : index
    %c0_390 = arith.constant 0 : index
    %c0_391 = arith.constant 0 : index
    %398 = vector.load %arg9[%c1_389, %c0_390, %c0_391] : memref<9x4x4xf32, #tpu.memory_space<vmem>>, vector<1x4x4xf32>
    %399 = vector.shape_cast %398 : vector<1x4x4xf32> to vector<4x4xf32>
    %c0_392 = arith.constant 0 : index
    %c5_393 = arith.constant 5 : index
    %400 = vector.load %arg23[%c0_392, %c5_393] : memref<4x16xf32, #tpu.memory_space<vmem>>, vector<4x2xf32>
    %cst_394 = arith.constant dense<0.000000e+00> : vector<4x2xf32>
    %401 = tpu.matmul %399, %400, %cst_394 {dimension_numbers = #tpu.dot_dimension_numbers<[1], [0], [0], [1], [0, 0, 1, 1], [], []>} : vector<4x4xf32>, vector<4x2xf32>, vector<4x2xf32> -> vector<4x2xf32>
    %402 = arith.addf %397, %401 : vector<4x2xf32>
    %c2_395 = arith.constant 2 : index
    %c0_396 = arith.constant 0 : index
    %c0_397 = arith.constant 0 : index
    %403 = vector.load %arg9[%c2_395, %c0_396, %c0_397] : memref<9x4x4xf32, #tpu.memory_space<vmem>>, vector<1x4x4xf32>
    %404 = vector.shape_cast %403 : vector<1x4x4xf32> to vector<4x4xf32>
    %c0_398 = arith.constant 0 : index
    %c6_399 = arith.constant 6 : index
    %405 = vector.load %arg23[%c0_398, %c6_399] : memref<4x16xf32, #tpu.memory_space<vmem>>, vector<4x2xf32>
    %cst_400 = arith.constant dense<0.000000e+00> : vector<4x2xf32>
    %406 = tpu.matmul %404, %405, %cst_400 {dimension_numbers = #tpu.dot_dimension_numbers<[1], [0], [0], [1], [0, 0, 1, 1], [], []>} : vector<4x4xf32>, vector<4x2xf32>, vector<4x2xf32> -> vector<4x2xf32>
    %407 = arith.addf %402, %406 : vector<4x2xf32>
    %c3_401 = arith.constant 3 : index
    %c0_402 = arith.constant 0 : index
    %c0_403 = arith.constant 0 : index
    %408 = vector.load %arg9[%c3_401, %c0_402, %c0_403] : memref<9x4x4xf32, #tpu.memory_space<vmem>>, vector<1x4x4xf32>
    %409 = vector.shape_cast %408 : vector<1x4x4xf32> to vector<4x4xf32>
    %c0_404 = arith.constant 0 : index
    %c8_405 = arith.constant 8 : index
    %410 = vector.load %arg23[%c0_404, %c8_405] : memref<4x16xf32, #tpu.memory_space<vmem>>, vector<4x2xf32>
    %cst_406 = arith.constant dense<0.000000e+00> : vector<4x2xf32>
    %411 = tpu.matmul %409, %410, %cst_406 {dimension_numbers = #tpu.dot_dimension_numbers<[1], [0], [0], [1], [0, 0, 1, 1], [], []>} : vector<4x4xf32>, vector<4x2xf32>, vector<4x2xf32> -> vector<4x2xf32>
    %412 = arith.addf %407, %411 : vector<4x2xf32>
    %c4_407 = arith.constant 4 : index
    %c0_408 = arith.constant 0 : index
    %c0_409 = arith.constant 0 : index
    %413 = vector.load %arg9[%c4_407, %c0_408, %c0_409] : memref<9x4x4xf32, #tpu.memory_space<vmem>>, vector<1x4x4xf32>
    %414 = vector.shape_cast %413 : vector<1x4x4xf32> to vector<4x4xf32>
    %c0_410 = arith.constant 0 : index
    %c9_411 = arith.constant 9 : index
    %415 = vector.load %arg23[%c0_410, %c9_411] : memref<4x16xf32, #tpu.memory_space<vmem>>, vector<4x2xf32>
    %cst_412 = arith.constant dense<0.000000e+00> : vector<4x2xf32>
    %416 = tpu.matmul %414, %415, %cst_412 {dimension_numbers = #tpu.dot_dimension_numbers<[1], [0], [0], [1], [0, 0, 1, 1], [], []>} : vector<4x4xf32>, vector<4x2xf32>, vector<4x2xf32> -> vector<4x2xf32>
    %417 = arith.addf %412, %416 : vector<4x2xf32>
    %c5_413 = arith.constant 5 : index
    %c0_414 = arith.constant 0 : index
    %c0_415 = arith.constant 0 : index
    %418 = vector.load %arg9[%c5_413, %c0_414, %c0_415] : memref<9x4x4xf32, #tpu.memory_space<vmem>>, vector<1x4x4xf32>
    %419 = vector.shape_cast %418 : vector<1x4x4xf32> to vector<4x4xf32>
    %c0_416 = arith.constant 0 : index
    %c10_417 = arith.constant 10 : index
    %420 = vector.load %arg23[%c0_416, %c10_417] : memref<4x16xf32, #tpu.memory_space<vmem>>, vector<4x2xf32>
    %cst_418 = arith.constant dense<0.000000e+00> : vector<4x2xf32>
    %421 = tpu.matmul %419, %420, %cst_418 {dimension_numbers = #tpu.dot_dimension_numbers<[1], [0], [0], [1], [0, 0, 1, 1], [], []>} : vector<4x4xf32>, vector<4x2xf32>, vector<4x2xf32> -> vector<4x2xf32>
    %422 = arith.addf %417, %421 : vector<4x2xf32>
    %c6_419 = arith.constant 6 : index
    %c0_420 = arith.constant 0 : index
    %c0_421 = arith.constant 0 : index
    %423 = vector.load %arg9[%c6_419, %c0_420, %c0_421] : memref<9x4x4xf32, #tpu.memory_space<vmem>>, vector<1x4x4xf32>
    %424 = vector.shape_cast %423 : vector<1x4x4xf32> to vector<4x4xf32>
    %c0_422 = arith.constant 0 : index
    %c12_423 = arith.constant 12 : index
    %425 = vector.load %arg23[%c0_422, %c12_423] : memref<4x16xf32, #tpu.memory_space<vmem>>, vector<4x2xf32>
    %cst_424 = arith.constant dense<0.000000e+00> : vector<4x2xf32>
    %426 = tpu.matmul %424, %425, %cst_424 {dimension_numbers = #tpu.dot_dimension_numbers<[1], [0], [0], [1], [0, 0, 1, 1], [], []>} : vector<4x4xf32>, vector<4x2xf32>, vector<4x2xf32> -> vector<4x2xf32>
    %427 = arith.addf %422, %426 : vector<4x2xf32>
    %c7_425 = arith.constant 7 : index
    %c0_426 = arith.constant 0 : index
    %c0_427 = arith.constant 0 : index
    %428 = vector.load %arg9[%c7_425, %c0_426, %c0_427] : memref<9x4x4xf32, #tpu.memory_space<vmem>>, vector<1x4x4xf32>
    %429 = vector.shape_cast %428 : vector<1x4x4xf32> to vector<4x4xf32>
    %c0_428 = arith.constant 0 : index
    %c13_429 = arith.constant 13 : index
    %430 = vector.load %arg23[%c0_428, %c13_429] : memref<4x16xf32, #tpu.memory_space<vmem>>, vector<4x2xf32>
    %cst_430 = arith.constant dense<0.000000e+00> : vector<4x2xf32>
    %431 = tpu.matmul %429, %430, %cst_430 {dimension_numbers = #tpu.dot_dimension_numbers<[1], [0], [0], [1], [0, 0, 1, 1], [], []>} : vector<4x4xf32>, vector<4x2xf32>, vector<4x2xf32> -> vector<4x2xf32>
    %432 = arith.addf %427, %431 : vector<4x2xf32>
    %c8_431 = arith.constant 8 : index
    %c0_432 = arith.constant 0 : index
    %c0_433 = arith.constant 0 : index
    %433 = vector.load %arg9[%c8_431, %c0_432, %c0_433] : memref<9x4x4xf32, #tpu.memory_space<vmem>>, vector<1x4x4xf32>
    %434 = vector.shape_cast %433 : vector<1x4x4xf32> to vector<4x4xf32>
    %c0_434 = arith.constant 0 : index
    %c14_435 = arith.constant 14 : index
    %435 = vector.load %arg23[%c0_434, %c14_435] : memref<4x16xf32, #tpu.memory_space<vmem>>, vector<4x2xf32>
    %cst_436 = arith.constant dense<0.000000e+00> : vector<4x2xf32>
    %436 = tpu.matmul %434, %435, %cst_436 {dimension_numbers = #tpu.dot_dimension_numbers<[1], [0], [0], [1], [0, 0, 1, 1], [], []>} : vector<4x4xf32>, vector<4x2xf32>, vector<4x2xf32> -> vector<4x2xf32>
    %437 = arith.addf %432, %436 : vector<4x2xf32>
    %c0_437 = arith.constant 0 : index
    %c0_438 = arith.constant 0 : index
    %438 = vector.load %arg10[%c0_437, %c0_438] : memref<4x1xf32, #tpu.memory_space<vmem>>, vector<4x1xf32>
    %439 = vector.broadcast %438 : vector<4x1xf32> to vector<4x2xf32>
    %440 = arith.addf %437, %439 : vector<4x2xf32>
    %cst_439 = arith.constant 0.000000e+00 : f32
    %441 = vector.broadcast %cst_439 : f32 to vector<4x2xf32>
    %442 = arith.maximumf %440, %441 : vector<4x2xf32>
    %c0_440 = arith.constant 0 : index
    %c9_441 = arith.constant 9 : index
    %443 = vector.load %arg24[%c0_440, %c9_441] : memref<4x16xf32, #tpu.memory_space<vmem>>, vector<4x2xf32>
    tpu.vector_store %arg24[%c0_440, %c9_441], %442 {strides = array<i32>} : memref<4x16xf32, #tpu.memory_space<vmem>>, vector<4x2xf32>,
    %c0_442 = arith.constant 0 : index
    %c0_443 = arith.constant 0 : index
    %c0_444 = arith.constant 0 : index
    %444 = vector.load %arg11[%c0_442, %c0_443, %c0_444] : memref<9x4x4xf32, #tpu.memory_space<vmem>>, vector<1x4x4xf32>
    %445 = vector.shape_cast %444 : vector<1x4x4xf32> to vector<4x4xf32>
    %c0_445 = arith.constant 0 : index
    %c0_446 = arith.constant 0 : index
    %446 = vector.load %arg24[%c0_445, %c0_446] : memref<4x16xf32, #tpu.memory_space<vmem>>, vector<4x2xf32>
    %cst_447 = arith.constant dense<0.000000e+00> : vector<4x2xf32>
    %447 = tpu.matmul %445, %446, %cst_447 {dimension_numbers = #tpu.dot_dimension_numbers<[1], [0], [0], [1], [0, 0, 1, 1], [], []>} : vector<4x4xf32>, vector<4x2xf32>, vector<4x2xf32> -> vector<4x2xf32>
    %c1_448 = arith.constant 1 : index
    %c0_449 = arith.constant 0 : index
    %c0_450 = arith.constant 0 : index
    %448 = vector.load %arg11[%c1_448, %c0_449, %c0_450] : memref<9x4x4xf32, #tpu.memory_space<vmem>>, vector<1x4x4xf32>
    %449 = vector.shape_cast %448 : vector<1x4x4xf32> to vector<4x4xf32>
    %c0_451 = arith.constant 0 : index
    %c1_452 = arith.constant 1 : index
    %450 = vector.load %arg24[%c0_451, %c1_452] : memref<4x16xf32, #tpu.memory_space<vmem>>, vector<4x2xf32>
    %cst_453 = arith.constant dense<0.000000e+00> : vector<4x2xf32>
    %451 = tpu.matmul %449, %450, %cst_453 {dimension_numbers = #tpu.dot_dimension_numbers<[1], [0], [0], [1], [0, 0, 1, 1], [], []>} : vector<4x4xf32>, vector<4x2xf32>, vector<4x2xf32> -> vector<4x2xf32>
    %452 = arith.addf %447, %451 : vector<4x2xf32>
    %c2_454 = arith.constant 2 : index
    %c0_455 = arith.constant 0 : index
    %c0_456 = arith.constant 0 : index
    %453 = vector.load %arg11[%c2_454, %c0_455, %c0_456] : memref<9x4x4xf32, #tpu.memory_space<vmem>>, vector<1x4x4xf32>
    %454 = vector.shape_cast %453 : vector<1x4x4xf32> to vector<4x4xf32>
    %c0_457 = arith.constant 0 : index
    %c2_458 = arith.constant 2 : index
    %455 = vector.load %arg24[%c0_457, %c2_458] : memref<4x16xf32, #tpu.memory_space<vmem>>, vector<4x2xf32>
    %cst_459 = arith.constant dense<0.000000e+00> : vector<4x2xf32>
    %456 = tpu.matmul %454, %455, %cst_459 {dimension_numbers = #tpu.dot_dimension_numbers<[1], [0], [0], [1], [0, 0, 1, 1], [], []>} : vector<4x4xf32>, vector<4x2xf32>, vector<4x2xf32> -> vector<4x2xf32>
    %457 = arith.addf %452, %456 : vector<4x2xf32>
    %c3_460 = arith.constant 3 : index
    %c0_461 = arith.constant 0 : index
    %c0_462 = arith.constant 0 : index
    %458 = vector.load %arg11[%c3_460, %c0_461, %c0_462] : memref<9x4x4xf32, #tpu.memory_space<vmem>>, vector<1x4x4xf32>
    %459 = vector.shape_cast %458 : vector<1x4x4xf32> to vector<4x4xf32>
    %c0_463 = arith.constant 0 : index
    %c4_464 = arith.constant 4 : index
    %460 = vector.load %arg24[%c0_463, %c4_464] : memref<4x16xf32, #tpu.memory_space<vmem>>, vector<4x2xf32>
    %cst_465 = arith.constant dense<0.000000e+00> : vector<4x2xf32>
    %461 = tpu.matmul %459, %460, %cst_465 {dimension_numbers = #tpu.dot_dimension_numbers<[1], [0], [0], [1], [0, 0, 1, 1], [], []>} : vector<4x4xf32>, vector<4x2xf32>, vector<4x2xf32> -> vector<4x2xf32>
    %462 = arith.addf %457, %461 : vector<4x2xf32>
    %c4_466 = arith.constant 4 : index
    %c0_467 = arith.constant 0 : index
    %c0_468 = arith.constant 0 : index
    %463 = vector.load %arg11[%c4_466, %c0_467, %c0_468] : memref<9x4x4xf32, #tpu.memory_space<vmem>>, vector<1x4x4xf32>
    %464 = vector.shape_cast %463 : vector<1x4x4xf32> to vector<4x4xf32>
    %c0_469 = arith.constant 0 : index
    %c5_470 = arith.constant 5 : index
    %465 = vector.load %arg24[%c0_469, %c5_470] : memref<4x16xf32, #tpu.memory_space<vmem>>, vector<4x2xf32>
    %cst_471 = arith.constant dense<0.000000e+00> : vector<4x2xf32>
    %466 = tpu.matmul %464, %465, %cst_471 {dimension_numbers = #tpu.dot_dimension_numbers<[1], [0], [0], [1], [0, 0, 1, 1], [], []>} : vector<4x4xf32>, vector<4x2xf32>, vector<4x2xf32> -> vector<4x2xf32>
    %467 = arith.addf %462, %466 : vector<4x2xf32>
    %c5_472 = arith.constant 5 : index
    %c0_473 = arith.constant 0 : index
    %c0_474 = arith.constant 0 : index
    %468 = vector.load %arg11[%c5_472, %c0_473, %c0_474] : memref<9x4x4xf32, #tpu.memory_space<vmem>>, vector<1x4x4xf32>
    %469 = vector.shape_cast %468 : vector<1x4x4xf32> to vector<4x4xf32>
    %c0_475 = arith.constant 0 : index
    %c6_476 = arith.constant 6 : index
    %470 = vector.load %arg24[%c0_475, %c6_476] : memref<4x16xf32, #tpu.memory_space<vmem>>, vector<4x2xf32>
    %cst_477 = arith.constant dense<0.000000e+00> : vector<4x2xf32>
    %471 = tpu.matmul %469, %470, %cst_477 {dimension_numbers = #tpu.dot_dimension_numbers<[1], [0], [0], [1], [0, 0, 1, 1], [], []>} : vector<4x4xf32>, vector<4x2xf32>, vector<4x2xf32> -> vector<4x2xf32>
    %472 = arith.addf %467, %471 : vector<4x2xf32>
    %c6_478 = arith.constant 6 : index
    %c0_479 = arith.constant 0 : index
    %c0_480 = arith.constant 0 : index
    %473 = vector.load %arg11[%c6_478, %c0_479, %c0_480] : memref<9x4x4xf32, #tpu.memory_space<vmem>>, vector<1x4x4xf32>
    %474 = vector.shape_cast %473 : vector<1x4x4xf32> to vector<4x4xf32>
    %c0_481 = arith.constant 0 : index
    %c8_482 = arith.constant 8 : index
    %475 = vector.load %arg24[%c0_481, %c8_482] : memref<4x16xf32, #tpu.memory_space<vmem>>, vector<4x2xf32>
    %cst_483 = arith.constant dense<0.000000e+00> : vector<4x2xf32>
    %476 = tpu.matmul %474, %475, %cst_483 {dimension_numbers = #tpu.dot_dimension_numbers<[1], [0], [0], [1], [0, 0, 1, 1], [], []>} : vector<4x4xf32>, vector<4x2xf32>, vector<4x2xf32> -> vector<4x2xf32>
    %477 = arith.addf %472, %476 : vector<4x2xf32>
    %c7_484 = arith.constant 7 : index
    %c0_485 = arith.constant 0 : index
    %c0_486 = arith.constant 0 : index
    %478 = vector.load %arg11[%c7_484, %c0_485, %c0_486] : memref<9x4x4xf32, #tpu.memory_space<vmem>>, vector<1x4x4xf32>
    %479 = vector.shape_cast %478 : vector<1x4x4xf32> to vector<4x4xf32>
    %c0_487 = arith.constant 0 : index
    %c9_488 = arith.constant 9 : index
    %480 = vector.load %arg24[%c0_487, %c9_488] : memref<4x16xf32, #tpu.memory_space<vmem>>, vector<4x2xf32>
    %cst_489 = arith.constant dense<0.000000e+00> : vector<4x2xf32>
    %481 = tpu.matmul %479, %480, %cst_489 {dimension_numbers = #tpu.dot_dimension_numbers<[1], [0], [0], [1], [0, 0, 1, 1], [], []>} : vector<4x4xf32>, vector<4x2xf32>, vector<4x2xf32> -> vector<4x2xf32>
    %482 = arith.addf %477, %481 : vector<4x2xf32>
    %c8_490 = arith.constant 8 : index
    %c0_491 = arith.constant 0 : index
    %c0_492 = arith.constant 0 : index
    %483 = vector.load %arg11[%c8_490, %c0_491, %c0_492] : memref<9x4x4xf32, #tpu.memory_space<vmem>>, vector<1x4x4xf32>
    %484 = vector.shape_cast %483 : vector<1x4x4xf32> to vector<4x4xf32>
    %c0_493 = arith.constant 0 : index
    %c10_494 = arith.constant 10 : index
    %485 = vector.load %arg24[%c0_493, %c10_494] : memref<4x16xf32, #tpu.memory_space<vmem>>, vector<4x2xf32>
    %cst_495 = arith.constant dense<0.000000e+00> : vector<4x2xf32>
    %486 = tpu.matmul %484, %485, %cst_495 {dimension_numbers = #tpu.dot_dimension_numbers<[1], [0], [0], [1], [0, 0, 1, 1], [], []>} : vector<4x4xf32>, vector<4x2xf32>, vector<4x2xf32> -> vector<4x2xf32>
    %487 = arith.addf %482, %486 : vector<4x2xf32>
    %c0_496 = arith.constant 0 : index
    %c0_497 = arith.constant 0 : index
    %488 = vector.load %arg12[%c0_496, %c0_497] : memref<4x1xf32, #tpu.memory_space<vmem>>, vector<4x1xf32>
    %489 = vector.broadcast %488 : vector<4x1xf32> to vector<4x2xf32>
    %490 = arith.addf %487, %489 : vector<4x2xf32>
    %c0_498 = arith.constant 0 : index
    %c5_499 = arith.constant 5 : index
    %491 = vector.load %arg22[%c0_498, %c5_499] : memref<4x16xf32, #tpu.memory_space<vmem>>, vector<4x2xf32>
    tpu.vector_store %arg22[%c0_498, %c5_499], %490 {strides = array<i32>} : memref<4x16xf32, #tpu.memory_space<vmem>>, vector<4x2xf32>,
    %c0_500 = arith.constant 0 : index
    %c0_501 = arith.constant 0 : index
    %c0_502 = arith.constant 0 : index
    %492 = vector.load %arg11[%c0_500, %c0_501, %c0_502] : memref<9x4x4xf32, #tpu.memory_space<vmem>>, vector<1x4x4xf32>
    %493 = vector.shape_cast %492 : vector<1x4x4xf32> to vector<4x4xf32>
    %c0_503 = arith.constant 0 : index
    %c4_504 = arith.constant 4 : index
    %494 = vector.load %arg24[%c0_503, %c4_504] : memref<4x16xf32, #tpu.memory_space<vmem>>, vector<4x2xf32>
    %cst_505 = arith.constant dense<0.000000e+00> : vector<4x2xf32>
    %495 = tpu.matmul %493, %494, %cst_505 {dimension_numbers = #tpu.dot_dimension_numbers<[1], [0], [0], [1], [0, 0, 1, 1], [], []>} : vector<4x4xf32>, vector<4x2xf32>, vector<4x2xf32> -> vector<4x2xf32>
    %c1_506 = arith.constant 1 : index
    %c0_507 = arith.constant 0 : index
    %c0_508 = arith.constant 0 : index
    %496 = vector.load %arg11[%c1_506, %c0_507, %c0_508] : memref<9x4x4xf32, #tpu.memory_space<vmem>>, vector<1x4x4xf32>
    %497 = vector.shape_cast %496 : vector<1x4x4xf32> to vector<4x4xf32>
    %c0_509 = arith.constant 0 : index
    %c5_510 = arith.constant 5 : index
    %498 = vector.load %arg24[%c0_509, %c5_510] : memref<4x16xf32, #tpu.memory_space<vmem>>, vector<4x2xf32>
    %cst_511 = arith.constant dense<0.000000e+00> : vector<4x2xf32>
    %499 = tpu.matmul %497, %498, %cst_511 {dimension_numbers = #tpu.dot_dimension_numbers<[1], [0], [0], [1], [0, 0, 1, 1], [], []>} : vector<4x4xf32>, vector<4x2xf32>, vector<4x2xf32> -> vector<4x2xf32>
    %500 = arith.addf %495, %499 : vector<4x2xf32>
    %c2_512 = arith.constant 2 : index
    %c0_513 = arith.constant 0 : index
    %c0_514 = arith.constant 0 : index
    %501 = vector.load %arg11[%c2_512, %c0_513, %c0_514] : memref<9x4x4xf32, #tpu.memory_space<vmem>>, vector<1x4x4xf32>
    %502 = vector.shape_cast %501 : vector<1x4x4xf32> to vector<4x4xf32>
    %c0_515 = arith.constant 0 : index
    %c6_516 = arith.constant 6 : index
    %503 = vector.load %arg24[%c0_515, %c6_516] : memref<4x16xf32, #tpu.memory_space<vmem>>, vector<4x2xf32>
    %cst_517 = arith.constant dense<0.000000e+00> : vector<4x2xf32>
    %504 = tpu.matmul %502, %503, %cst_517 {dimension_numbers = #tpu.dot_dimension_numbers<[1], [0], [0], [1], [0, 0, 1, 1], [], []>} : vector<4x4xf32>, vector<4x2xf32>, vector<4x2xf32> -> vector<4x2xf32>
    %505 = arith.addf %500, %504 : vector<4x2xf32>
    %c3_518 = arith.constant 3 : index
    %c0_519 = arith.constant 0 : index
    %c0_520 = arith.constant 0 : index
    %506 = vector.load %arg11[%c3_518, %c0_519, %c0_520] : memref<9x4x4xf32, #tpu.memory_space<vmem>>, vector<1x4x4xf32>
    %507 = vector.shape_cast %506 : vector<1x4x4xf32> to vector<4x4xf32>
    %c0_521 = arith.constant 0 : index
    %c8_522 = arith.constant 8 : index
    %508 = vector.load %arg24[%c0_521, %c8_522] : memref<4x16xf32, #tpu.memory_space<vmem>>, vector<4x2xf32>
    %cst_523 = arith.constant dense<0.000000e+00> : vector<4x2xf32>
    %509 = tpu.matmul %507, %508, %cst_523 {dimension_numbers = #tpu.dot_dimension_numbers<[1], [0], [0], [1], [0, 0, 1, 1], [], []>} : vector<4x4xf32>, vector<4x2xf32>, vector<4x2xf32> -> vector<4x2xf32>
    %510 = arith.addf %505, %509 : vector<4x2xf32>
    %c4_524 = arith.constant 4 : index
    %c0_525 = arith.constant 0 : index
    %c0_526 = arith.constant 0 : index
    %511 = vector.load %arg11[%c4_524, %c0_525, %c0_526] : memref<9x4x4xf32, #tpu.memory_space<vmem>>, vector<1x4x4xf32>
    %512 = vector.shape_cast %511 : vector<1x4x4xf32> to vector<4x4xf32>
    %c0_527 = arith.constant 0 : index
    %c9_528 = arith.constant 9 : index
    %513 = vector.load %arg24[%c0_527, %c9_528] : memref<4x16xf32, #tpu.memory_space<vmem>>, vector<4x2xf32>
    %cst_529 = arith.constant dense<0.000000e+00> : vector<4x2xf32>
    %514 = tpu.matmul %512, %513, %cst_529 {dimension_numbers = #tpu.dot_dimension_numbers<[1], [0], [0], [1], [0, 0, 1, 1], [], []>} : vector<4x4xf32>, vector<4x2xf32>, vector<4x2xf32> -> vector<4x2xf32>
    %515 = arith.addf %510, %514 : vector<4x2xf32>
    %c5_530 = arith.constant 5 : index
    %c0_531 = arith.constant 0 : index
    %c0_532 = arith.constant 0 : index
    %516 = vector.load %arg11[%c5_530, %c0_531, %c0_532] : memref<9x4x4xf32, #tpu.memory_space<vmem>>, vector<1x4x4xf32>
    %517 = vector.shape_cast %516 : vector<1x4x4xf32> to vector<4x4xf32>
    %c0_533 = arith.constant 0 : index
    %c10_534 = arith.constant 10 : index
    %518 = vector.load %arg24[%c0_533, %c10_534] : memref<4x16xf32, #tpu.memory_space<vmem>>, vector<4x2xf32>
    %cst_535 = arith.constant dense<0.000000e+00> : vector<4x2xf32>
    %519 = tpu.matmul %517, %518, %cst_535 {dimension_numbers = #tpu.dot_dimension_numbers<[1], [0], [0], [1], [0, 0, 1, 1], [], []>} : vector<4x4xf32>, vector<4x2xf32>, vector<4x2xf32> -> vector<4x2xf32>
    %520 = arith.addf %515, %519 : vector<4x2xf32>
    %c6_536 = arith.constant 6 : index
    %c0_537 = arith.constant 0 : index
    %c0_538 = arith.constant 0 : index
    %521 = vector.load %arg11[%c6_536, %c0_537, %c0_538] : memref<9x4x4xf32, #tpu.memory_space<vmem>>, vector<1x4x4xf32>
    %522 = vector.shape_cast %521 : vector<1x4x4xf32> to vector<4x4xf32>
    %c0_539 = arith.constant 0 : index
    %c12_540 = arith.constant 12 : index
    %523 = vector.load %arg24[%c0_539, %c12_540] : memref<4x16xf32, #tpu.memory_space<vmem>>, vector<4x2xf32>
    %cst_541 = arith.constant dense<0.000000e+00> : vector<4x2xf32>
    %524 = tpu.matmul %522, %523, %cst_541 {dimension_numbers = #tpu.dot_dimension_numbers<[1], [0], [0], [1], [0, 0, 1, 1], [], []>} : vector<4x4xf32>, vector<4x2xf32>, vector<4x2xf32> -> vector<4x2xf32>
    %525 = arith.addf %520, %524 : vector<4x2xf32>
    %c7_542 = arith.constant 7 : index
    %c0_543 = arith.constant 0 : index
    %c0_544 = arith.constant 0 : index
    %526 = vector.load %arg11[%c7_542, %c0_543, %c0_544] : memref<9x4x4xf32, #tpu.memory_space<vmem>>, vector<1x4x4xf32>
    %527 = vector.shape_cast %526 : vector<1x4x4xf32> to vector<4x4xf32>
    %c0_545 = arith.constant 0 : index
    %c13_546 = arith.constant 13 : index
    %528 = vector.load %arg24[%c0_545, %c13_546] : memref<4x16xf32, #tpu.memory_space<vmem>>, vector<4x2xf32>
    %cst_547 = arith.constant dense<0.000000e+00> : vector<4x2xf32>
    %529 = tpu.matmul %527, %528, %cst_547 {dimension_numbers = #tpu.dot_dimension_numbers<[1], [0], [0], [1], [0, 0, 1, 1], [], []>} : vector<4x4xf32>, vector<4x2xf32>, vector<4x2xf32> -> vector<4x2xf32>
    %530 = arith.addf %525, %529 : vector<4x2xf32>
    %c8_548 = arith.constant 8 : index
    %c0_549 = arith.constant 0 : index
    %c0_550 = arith.constant 0 : index
    %531 = vector.load %arg11[%c8_548, %c0_549, %c0_550] : memref<9x4x4xf32, #tpu.memory_space<vmem>>, vector<1x4x4xf32>
    %532 = vector.shape_cast %531 : vector<1x4x4xf32> to vector<4x4xf32>
    %c0_551 = arith.constant 0 : index
    %c14_552 = arith.constant 14 : index
    %533 = vector.load %arg24[%c0_551, %c14_552] : memref<4x16xf32, #tpu.memory_space<vmem>>, vector<4x2xf32>
    %cst_553 = arith.constant dense<0.000000e+00> : vector<4x2xf32>
    %534 = tpu.matmul %532, %533, %cst_553 {dimension_numbers = #tpu.dot_dimension_numbers<[1], [0], [0], [1], [0, 0, 1, 1], [], []>} : vector<4x4xf32>, vector<4x2xf32>, vector<4x2xf32> -> vector<4x2xf32>
    %535 = arith.addf %530, %534 : vector<4x2xf32>
    %c0_554 = arith.constant 0 : index
    %c0_555 = arith.constant 0 : index
    %536 = vector.load %arg12[%c0_554, %c0_555] : memref<4x1xf32, #tpu.memory_space<vmem>>, vector<4x1xf32>
    %537 = vector.broadcast %536 : vector<4x1xf32> to vector<4x2xf32>
    %538 = arith.addf %535, %537 : vector<4x2xf32>
    %c0_556 = arith.constant 0 : index
    %c9_557 = arith.constant 9 : index
    %539 = vector.load %arg22[%c0_556, %c9_557] : memref<4x16xf32, #tpu.memory_space<vmem>>, vector<4x2xf32>
    tpu.vector_store %arg22[%c0_556, %c9_557], %538 {strides = array<i32>} : memref<4x16xf32, #tpu.memory_space<vmem>>, vector<4x2xf32>,
    %c0_558 = arith.constant 0 : index
    %c0_559 = arith.constant 0 : index
    %540 = vector.load %arg15[%c0_558, %c0_559] : memref<2x24xf32, #tpu.memory_space<vmem>>, vector<2x24xf32>
    %c0_560 = arith.constant 0 : index
    %c5_561 = arith.constant 5 : index
    %541 = vector.load %arg22[%c0_560, %c5_561] : memref<4x16xf32, #tpu.memory_space<vmem>>, vector<4x2xf32>
    %cst_562 = arith.constant dense<0.000000e+00> : vector<4x24xf32>
    %542 = tpu.matmul %541, %540, %cst_562 {dimension_numbers = #tpu.dot_dimension_numbers<[1], [0], [0], [1], [0, 0, 1, 1], [], []>} : vector<4x2xf32>, vector<2x24xf32>, vector<4x24xf32> -> vector<4x24xf32>
    %c0_563 = arith.constant 0 : index
    %c9_564 = arith.constant 9 : index
    %543 = vector.load %arg22[%c0_563, %c9_564] : memref<4x16xf32, #tpu.memory_space<vmem>>, vector<4x2xf32>
    %cst_565 = arith.constant dense<0.000000e+00> : vector<4x24xf32>
    %544 = tpu.matmul %543, %540, %cst_565 {dimension_numbers = #tpu.dot_dimension_numbers<[1], [0], [0], [1], [0, 0, 1, 1], [], []>} : vector<4x2xf32>, vector<2x24xf32>, vector<4x24xf32> -> vector<4x24xf32>
    %cst_566 = arith.constant 1.000000e+00 : f32
    %545 = vector.broadcast %cst_566 : f32 to vector<4x24xf32>
    %546 = arith.mulf %545, %542 : vector<4x24xf32>
    %c0_567 = arith.constant 0 : index
    %c0_568 = arith.constant 0 : index
    %547 = vector.load %arg25[%c0_567, %c0_568] : memref<4x576xf32, #tpu.memory_space<vmem>>, vector<4x24xf32>
    %548 = arith.addf %547, %546 : vector<4x24xf32>
    %c0_569 = arith.constant 0 : index
    %c0_570 = arith.constant 0 : index
    %549 = vector.load %arg25[%c0_569, %c0_570] : memref<4x576xf32, #tpu.memory_space<vmem>>, vector<4x24xf32>
    tpu.vector_store %arg25[%c0_569, %c0_570], %548 {strides = array<i32>} : memref<4x576xf32, #tpu.memory_space<vmem>>, vector<4x24xf32>,
    %cst_571 = arith.constant 1.000000e+00 : f32
    %550 = vector.broadcast %cst_571 : f32 to vector<4x24xf32>
    %551 = arith.mulf %550, %542 : vector<4x24xf32>
    %c0_572 = arith.constant 0 : index
    %c24_573 = arith.constant 24 : index
    %552 = vector.load %arg25[%c0_572, %c24_573] : memref<4x576xf32, #tpu.memory_space<vmem>>, vector<4x24xf32>
    %553 = arith.addf %552, %551 : vector<4x24xf32>
    %c0_574 = arith.constant 0 : index
    %c24_575 = arith.constant 24 : index
    %554 = vector.load %arg25[%c0_574, %c24_575] : memref<4x576xf32, #tpu.memory_space<vmem>>, vector<4x24xf32>
    tpu.vector_store %arg25[%c0_574, %c24_575], %553 {strides = array<i32>} : memref<4x576xf32, #tpu.memory_space<vmem>>, vector<4x24xf32>,
    %cst_576 = arith.constant 1.000000e+00 : f32
    %555 = vector.broadcast %cst_576 : f32 to vector<4x24xf32>
    %556 = arith.mulf %555, %542 : vector<4x24xf32>
    %c0_577 = arith.constant 0 : index
    %c48_578 = arith.constant 48 : index
    %557 = vector.load %arg25[%c0_577, %c48_578] : memref<4x576xf32, #tpu.memory_space<vmem>>, vector<4x24xf32>
    %558 = arith.addf %557, %556 : vector<4x24xf32>
    %c0_579 = arith.constant 0 : index
    %c48_580 = arith.constant 48 : index
    %559 = vector.load %arg25[%c0_579, %c48_580] : memref<4x576xf32, #tpu.memory_space<vmem>>, vector<4x24xf32>
    tpu.vector_store %arg25[%c0_579, %c48_580], %558 {strides = array<i32>} : memref<4x576xf32, #tpu.memory_space<vmem>>, vector<4x24xf32>,
    %cst_581 = arith.constant 1.000000e+00 : f32
    %560 = vector.broadcast %cst_581 : f32 to vector<4x24xf32>
    %561 = arith.mulf %560, %542 : vector<4x24xf32>
    %c0_582 = arith.constant 0 : index
    %c72 = arith.constant 72 : index
    %562 = vector.load %arg25[%c0_582, %c72] : memref<4x576xf32, #tpu.memory_space<vmem>>, vector<4x24xf32>
    %563 = arith.addf %562, %561 : vector<4x24xf32>
    %c0_583 = arith.constant 0 : index
    %c72_584 = arith.constant 72 : index
    %564 = vector.load %arg25[%c0_583, %c72_584] : memref<4x576xf32, #tpu.memory_space<vmem>>, vector<4x24xf32>
    tpu.vector_store %arg25[%c0_583, %c72_584], %563 {strides = array<i32>} : memref<4x576xf32, #tpu.memory_space<vmem>>, vector<4x24xf32>,
    %cst_585 = arith.constant 1.000000e+00 : f32
    %565 = vector.broadcast %cst_585 : f32 to vector<4x24xf32>
    %566 = arith.mulf %565, %542 : vector<4x24xf32>
    %c0_586 = arith.constant 0 : index
    %c96_587 = arith.constant 96 : index
    %567 = vector.load %arg25[%c0_586, %c96_587] : memref<4x576xf32, #tpu.memory_space<vmem>>, vector<4x24xf32>
    %568 = arith.addf %567, %566 : vector<4x24xf32>
    %c0_588 = arith.constant 0 : index
    %c96_589 = arith.constant 96 : index
    %569 = vector.load %arg25[%c0_588, %c96_589] : memref<4x576xf32, #tpu.memory_space<vmem>>, vector<4x24xf32>
    tpu.vector_store %arg25[%c0_588, %c96_589], %568 {strides = array<i32>} : memref<4x576xf32, #tpu.memory_space<vmem>>, vector<4x24xf32>,
    %cst_590 = arith.constant 1.000000e+00 : f32
    %570 = vector.broadcast %cst_590 : f32 to vector<4x24xf32>
    %571 = arith.mulf %570, %542 : vector<4x24xf32>
    %c0_591 = arith.constant 0 : index
    %c120 = arith.constant 120 : index
    %572 = vector.load %arg25[%c0_591, %c120] : memref<4x576xf32, #tpu.memory_space<vmem>>, vector<4x24xf32>
    %573 = arith.addf %572, %571 : vector<4x24xf32>
    %c0_592 = arith.constant 0 : index
    %c120_593 = arith.constant 120 : index
    %574 = vector.load %arg25[%c0_592, %c120_593] : memref<4x576xf32, #tpu.memory_space<vmem>>, vector<4x24xf32>
    tpu.vector_store %arg25[%c0_592, %c120_593], %573 {strides = array<i32>} : memref<4x576xf32, #tpu.memory_space<vmem>>, vector<4x24xf32>,
    %cst_594 = arith.constant 0.958333313 : f32
    %575 = vector.broadcast %cst_594 : f32 to vector<4x24xf32>
    %576 = arith.mulf %575, %542 : vector<4x24xf32>
    %cst_595 = arith.constant 0.0416666679 : f32
    %577 = vector.broadcast %cst_595 : f32 to vector<4x24xf32>
    %578 = arith.mulf %577, %544 : vector<4x24xf32>
    %579 = arith.addf %576, %578 : vector<4x24xf32>
    %c0_596 = arith.constant 0 : index
    %c144_597 = arith.constant 144 : index
    %580 = vector.load %arg25[%c0_596, %c144_597] : memref<4x576xf32, #tpu.memory_space<vmem>>, vector<4x24xf32>
    %581 = arith.addf %580, %579 : vector<4x24xf32>
    %c0_598 = arith.constant 0 : index
    %c144_599 = arith.constant 144 : index
    %582 = vector.load %arg25[%c0_598, %c144_599] : memref<4x576xf32, #tpu.memory_space<vmem>>, vector<4x24xf32>
    tpu.vector_store %arg25[%c0_598, %c144_599], %581 {strides = array<i32>} : memref<4x576xf32, #tpu.memory_space<vmem>>, vector<4x24xf32>,
    %cst_600 = arith.constant 8.750000e-01 : f32
    %583 = vector.broadcast %cst_600 : f32 to vector<4x24xf32>
    %584 = arith.mulf %583, %542 : vector<4x24xf32>
    %cst_601 = arith.constant 1.250000e-01 : f32
    %585 = vector.broadcast %cst_601 : f32 to vector<4x24xf32>
    %586 = arith.mulf %585, %544 : vector<4x24xf32>
    %587 = arith.addf %584, %586 : vector<4x24xf32>
    %c0_602 = arith.constant 0 : index
    %c168 = arith.constant 168 : index
    %588 = vector.load %arg25[%c0_602, %c168] : memref<4x576xf32, #tpu.memory_space<vmem>>, vector<4x24xf32>
    %589 = arith.addf %588, %587 : vector<4x24xf32>
    %c0_603 = arith.constant 0 : index
    %c168_604 = arith.constant 168 : index
    %590 = vector.load %arg25[%c0_603, %c168_604] : memref<4x576xf32, #tpu.memory_space<vmem>>, vector<4x24xf32>
    tpu.vector_store %arg25[%c0_603, %c168_604], %589 {strides = array<i32>} : memref<4x576xf32, #tpu.memory_space<vmem>>, vector<4x24xf32>,
    %cst_605 = arith.constant 0.791666686 : f32
    %591 = vector.broadcast %cst_605 : f32 to vector<4x24xf32>
    %592 = arith.mulf %591, %542 : vector<4x24xf32>
    %cst_606 = arith.constant 0.208333328 : f32
    %593 = vector.broadcast %cst_606 : f32 to vector<4x24xf32>
    %594 = arith.mulf %593, %544 : vector<4x24xf32>
    %595 = arith.addf %592, %594 : vector<4x24xf32>
    %c0_607 = arith.constant 0 : index
    %c192_608 = arith.constant 192 : index
    %596 = vector.load %arg25[%c0_607, %c192_608] : memref<4x576xf32, #tpu.memory_space<vmem>>, vector<4x24xf32>
    %597 = arith.addf %596, %595 : vector<4x24xf32>
    %c0_609 = arith.constant 0 : index
    %c192_610 = arith.constant 192 : index
    %598 = vector.load %arg25[%c0_609, %c192_610] : memref<4x576xf32, #tpu.memory_space<vmem>>, vector<4x24xf32>
    tpu.vector_store %arg25[%c0_609, %c192_610], %597 {strides = array<i32>} : memref<4x576xf32, #tpu.memory_space<vmem>>, vector<4x24xf32>,
    %cst_611 = arith.constant 0.708333313 : f32
    %599 = vector.broadcast %cst_611 : f32 to vector<4x24xf32>
    %600 = arith.mulf %599, %542 : vector<4x24xf32>
    %cst_612 = arith.constant 0.291666657 : f32
    %601 = vector.broadcast %cst_612 : f32 to vector<4x24xf32>
    %602 = arith.mulf %601, %544 : vector<4x24xf32>
    %603 = arith.addf %600, %602 : vector<4x24xf32>
    %c0_613 = arith.constant 0 : index
    %c216 = arith.constant 216 : index
    %604 = vector.load %arg25[%c0_613, %c216] : memref<4x576xf32, #tpu.memory_space<vmem>>, vector<4x24xf32>
    %605 = arith.addf %604, %603 : vector<4x24xf32>
    %c0_614 = arith.constant 0 : index
    %c216_615 = arith.constant 216 : index
    %606 = vector.load %arg25[%c0_614, %c216_615] : memref<4x576xf32, #tpu.memory_space<vmem>>, vector<4x24xf32>
    tpu.vector_store %arg25[%c0_614, %c216_615], %605 {strides = array<i32>} : memref<4x576xf32, #tpu.memory_space<vmem>>, vector<4x24xf32>,
    %cst_616 = arith.constant 6.250000e-01 : f32
    %607 = vector.broadcast %cst_616 : f32 to vector<4x24xf32>
    %608 = arith.mulf %607, %542 : vector<4x24xf32>
    %cst_617 = arith.constant 3.750000e-01 : f32
    %609 = vector.broadcast %cst_617 : f32 to vector<4x24xf32>
    %610 = arith.mulf %609, %544 : vector<4x24xf32>
    %611 = arith.addf %608, %610 : vector<4x24xf32>
    %c0_618 = arith.constant 0 : index
    %c240_619 = arith.constant 240 : index
    %612 = vector.load %arg25[%c0_618, %c240_619] : memref<4x576xf32, #tpu.memory_space<vmem>>, vector<4x24xf32>
    %613 = arith.addf %612, %611 : vector<4x24xf32>
    %c0_620 = arith.constant 0 : index
    %c240_621 = arith.constant 240 : index
    %614 = vector.load %arg25[%c0_620, %c240_621] : memref<4x576xf32, #tpu.memory_space<vmem>>, vector<4x24xf32>
    tpu.vector_store %arg25[%c0_620, %c240_621], %613 {strides = array<i32>} : memref<4x576xf32, #tpu.memory_space<vmem>>, vector<4x24xf32>,
    %cst_622 = arith.constant 0.541666687 : f32
    %615 = vector.broadcast %cst_622 : f32 to vector<4x24xf32>
    %616 = arith.mulf %615, %542 : vector<4x24xf32>
    %cst_623 = arith.constant 0.458333343 : f32
    %617 = vector.broadcast %cst_623 : f32 to vector<4x24xf32>
    %618 = arith.mulf %617, %544 : vector<4x24xf32>
    %619 = arith.addf %616, %618 : vector<4x24xf32>
    %c0_624 = arith.constant 0 : index
    %c264 = arith.constant 264 : index
    %620 = vector.load %arg25[%c0_624, %c264] : memref<4x576xf32, #tpu.memory_space<vmem>>, vector<4x24xf32>
    %621 = arith.addf %620, %619 : vector<4x24xf32>
    %c0_625 = arith.constant 0 : index
    %c264_626 = arith.constant 264 : index
    %622 = vector.load %arg25[%c0_625, %c264_626] : memref<4x576xf32, #tpu.memory_space<vmem>>, vector<4x24xf32>
    tpu.vector_store %arg25[%c0_625, %c264_626], %621 {strides = array<i32>} : memref<4x576xf32, #tpu.memory_space<vmem>>, vector<4x24xf32>,
    %cst_627 = arith.constant 0.458333343 : f32
    %623 = vector.broadcast %cst_627 : f32 to vector<4x24xf32>
    %624 = arith.mulf %623, %542 : vector<4x24xf32>
    %cst_628 = arith.constant 0.541666687 : f32
    %625 = vector.broadcast %cst_628 : f32 to vector<4x24xf32>
    %626 = arith.mulf %625, %544 : vector<4x24xf32>
    %627 = arith.addf %624, %626 : vector<4x24xf32>
    %c0_629 = arith.constant 0 : index
    %c288_630 = arith.constant 288 : index
    %628 = vector.load %arg25[%c0_629, %c288_630] : memref<4x576xf32, #tpu.memory_space<vmem>>, vector<4x24xf32>
    %629 = arith.addf %628, %627 : vector<4x24xf32>
    %c0_631 = arith.constant 0 : index
    %c288_632 = arith.constant 288 : index
    %630 = vector.load %arg25[%c0_631, %c288_632] : memref<4x576xf32, #tpu.memory_space<vmem>>, vector<4x24xf32>
    tpu.vector_store %arg25[%c0_631, %c288_632], %629 {strides = array<i32>} : memref<4x576xf32, #tpu.memory_space<vmem>>, vector<4x24xf32>,
    %cst_633 = arith.constant 3.750000e-01 : f32
    %631 = vector.broadcast %cst_633 : f32 to vector<4x24xf32>
    %632 = arith.mulf %631, %542 : vector<4x24xf32>
    %cst_634 = arith.constant 6.250000e-01 : f32
    %633 = vector.broadcast %cst_634 : f32 to vector<4x24xf32>
    %634 = arith.mulf %633, %544 : vector<4x24xf32>
    %635 = arith.addf %632, %634 : vector<4x24xf32>
    %c0_635 = arith.constant 0 : index
    %c312 = arith.constant 312 : index
    %636 = vector.load %arg25[%c0_635, %c312] : memref<4x576xf32, #tpu.memory_space<vmem>>, vector<4x24xf32>
    %637 = arith.addf %636, %635 : vector<4x24xf32>
    %c0_636 = arith.constant 0 : index
    %c312_637 = arith.constant 312 : index
    %638 = vector.load %arg25[%c0_636, %c312_637] : memref<4x576xf32, #tpu.memory_space<vmem>>, vector<4x24xf32>
    tpu.vector_store %arg25[%c0_636, %c312_637], %637 {strides = array<i32>} : memref<4x576xf32, #tpu.memory_space<vmem>>, vector<4x24xf32>,
    %cst_638 = arith.constant 0.291666657 : f32
    %639 = vector.broadcast %cst_638 : f32 to vector<4x24xf32>
    %640 = arith.mulf %639, %542 : vector<4x24xf32>
    %cst_639 = arith.constant 0.708333313 : f32
    %641 = vector.broadcast %cst_639 : f32 to vector<4x24xf32>
    %642 = arith.mulf %641, %544 : vector<4x24xf32>
    %643 = arith.addf %640, %642 : vector<4x24xf32>
    %c0_640 = arith.constant 0 : index
    %c336_641 = arith.constant 336 : index
    %644 = vector.load %arg25[%c0_640, %c336_641] : memref<4x576xf32, #tpu.memory_space<vmem>>, vector<4x24xf32>
    %645 = arith.addf %644, %643 : vector<4x24xf32>
    %c0_642 = arith.constant 0 : index
    %c336_643 = arith.constant 336 : index
    %646 = vector.load %arg25[%c0_642, %c336_643] : memref<4x576xf32, #tpu.memory_space<vmem>>, vector<4x24xf32>
    tpu.vector_store %arg25[%c0_642, %c336_643], %645 {strides = array<i32>} : memref<4x576xf32, #tpu.memory_space<vmem>>, vector<4x24xf32>,
    %cst_644 = arith.constant 0.208333328 : f32
    %647 = vector.broadcast %cst_644 : f32 to vector<4x24xf32>
    %648 = arith.mulf %647, %542 : vector<4x24xf32>
    %cst_645 = arith.constant 0.791666686 : f32
    %649 = vector.broadcast %cst_645 : f32 to vector<4x24xf32>
    %650 = arith.mulf %649, %544 : vector<4x24xf32>
    %651 = arith.addf %648, %650 : vector<4x24xf32>
    %c0_646 = arith.constant 0 : index
    %c360 = arith.constant 360 : index
    %652 = vector.load %arg25[%c0_646, %c360] : memref<4x576xf32, #tpu.memory_space<vmem>>, vector<4x24xf32>
    %653 = arith.addf %652, %651 : vector<4x24xf32>
    %c0_647 = arith.constant 0 : index
    %c360_648 = arith.constant 360 : index
    %654 = vector.load %arg25[%c0_647, %c360_648] : memref<4x576xf32, #tpu.memory_space<vmem>>, vector<4x24xf32>
    tpu.vector_store %arg25[%c0_647, %c360_648], %653 {strides = array<i32>} : memref<4x576xf32, #tpu.memory_space<vmem>>, vector<4x24xf32>,
    %cst_649 = arith.constant 1.250000e-01 : f32
    %655 = vector.broadcast %cst_649 : f32 to vector<4x24xf32>
    %656 = arith.mulf %655, %542 : vector<4x24xf32>
    %cst_650 = arith.constant 8.750000e-01 : f32
    %657 = vector.broadcast %cst_650 : f32 to vector<4x24xf32>
    %658 = arith.mulf %657, %544 : vector<4x24xf32>
    %659 = arith.addf %656, %658 : vector<4x24xf32>
    %c0_651 = arith.constant 0 : index
    %c384_652 = arith.constant 384 : index
    %660 = vector.load %arg25[%c0_651, %c384_652] : memref<4x576xf32, #tpu.memory_space<vmem>>, vector<4x24xf32>
    %661 = arith.addf %660, %659 : vector<4x24xf32>
    %c0_653 = arith.constant 0 : index
    %c384_654 = arith.constant 384 : index
    %662 = vector.load %arg25[%c0_653, %c384_654] : memref<4x576xf32, #tpu.memory_space<vmem>>, vector<4x24xf32>
    tpu.vector_store %arg25[%c0_653, %c384_654], %661 {strides = array<i32>} : memref<4x576xf32, #tpu.memory_space<vmem>>, vector<4x24xf32>,
    %cst_655 = arith.constant 0.0416666679 : f32
    %663 = vector.broadcast %cst_655 : f32 to vector<4x24xf32>
    %664 = arith.mulf %663, %542 : vector<4x24xf32>
    %cst_656 = arith.constant 0.958333313 : f32
    %665 = vector.broadcast %cst_656 : f32 to vector<4x24xf32>
    %666 = arith.mulf %665, %544 : vector<4x24xf32>
    %667 = arith.addf %664, %666 : vector<4x24xf32>
    %c0_657 = arith.constant 0 : index
    %c408 = arith.constant 408 : index
    %668 = vector.load %arg25[%c0_657, %c408] : memref<4x576xf32, #tpu.memory_space<vmem>>, vector<4x24xf32>
    %669 = arith.addf %668, %667 : vector<4x24xf32>
    %c0_658 = arith.constant 0 : index
    %c408_659 = arith.constant 408 : index
    %670 = vector.load %arg25[%c0_658, %c408_659] : memref<4x576xf32, #tpu.memory_space<vmem>>, vector<4x24xf32>
    tpu.vector_store %arg25[%c0_658, %c408_659], %669 {strides = array<i32>} : memref<4x576xf32, #tpu.memory_space<vmem>>, vector<4x24xf32>,
    %cst_660 = arith.constant 1.000000e+00 : f32
    %671 = vector.broadcast %cst_660 : f32 to vector<4x24xf32>
    %672 = arith.mulf %671, %544 : vector<4x24xf32>
    %c0_661 = arith.constant 0 : index
    %c432_662 = arith.constant 432 : index
    %673 = vector.load %arg25[%c0_661, %c432_662] : memref<4x576xf32, #tpu.memory_space<vmem>>, vector<4x24xf32>
    %674 = arith.addf %673, %672 : vector<4x24xf32>
    %c0_663 = arith.constant 0 : index
    %c432_664 = arith.constant 432 : index
    %675 = vector.load %arg25[%c0_663, %c432_664] : memref<4x576xf32, #tpu.memory_space<vmem>>, vector<4x24xf32>
    tpu.vector_store %arg25[%c0_663, %c432_664], %674 {strides = array<i32>} : memref<4x576xf32, #tpu.memory_space<vmem>>, vector<4x24xf32>,
    %cst_665 = arith.constant 1.000000e+00 : f32
    %676 = vector.broadcast %cst_665 : f32 to vector<4x24xf32>
    %677 = arith.mulf %676, %544 : vector<4x24xf32>
    %c0_666 = arith.constant 0 : index
    %c456 = arith.constant 456 : index
    %678 = vector.load %arg25[%c0_666, %c456] : memref<4x576xf32, #tpu.memory_space<vmem>>, vector<4x24xf32>
    %679 = arith.addf %678, %677 : vector<4x24xf32>
    %c0_667 = arith.constant 0 : index
    %c456_668 = arith.constant 456 : index
    %680 = vector.load %arg25[%c0_667, %c456_668] : memref<4x576xf32, #tpu.memory_space<vmem>>, vector<4x24xf32>
    tpu.vector_store %arg25[%c0_667, %c456_668], %679 {strides = array<i32>} : memref<4x576xf32, #tpu.memory_space<vmem>>, vector<4x24xf32>,
    %cst_669 = arith.constant 1.000000e+00 : f32
    %681 = vector.broadcast %cst_669 : f32 to vector<4x24xf32>
    %682 = arith.mulf %681, %544 : vector<4x24xf32>
    %c0_670 = arith.constant 0 : index
    %c480_671 = arith.constant 480 : index
    %683 = vector.load %arg25[%c0_670, %c480_671] : memref<4x576xf32, #tpu.memory_space<vmem>>, vector<4x24xf32>
    %684 = arith.addf %683, %682 : vector<4x24xf32>
    %c0_672 = arith.constant 0 : index
    %c480_673 = arith.constant 480 : index
    %685 = vector.load %arg25[%c0_672, %c480_673] : memref<4x576xf32, #tpu.memory_space<vmem>>, vector<4x24xf32>
    tpu.vector_store %arg25[%c0_672, %c480_673], %684 {strides = array<i32>} : memref<4x576xf32, #tpu.memory_space<vmem>>, vector<4x24xf32>,
    %cst_674 = arith.constant 1.000000e+00 : f32
    %686 = vector.broadcast %cst_674 : f32 to vector<4x24xf32>
    %687 = arith.mulf %686, %544 : vector<4x24xf32>
    %c0_675 = arith.constant 0 : index
    %c504 = arith.constant 504 : index
    %688 = vector.load %arg25[%c0_675, %c504] : memref<4x576xf32, #tpu.memory_space<vmem>>, vector<4x24xf32>
    %689 = arith.addf %688, %687 : vector<4x24xf32>
    %c0_676 = arith.constant 0 : index
    %c504_677 = arith.constant 504 : index
    %690 = vector.load %arg25[%c0_676, %c504_677] : memref<4x576xf32, #tpu.memory_space<vmem>>, vector<4x24xf32>
    tpu.vector_store %arg25[%c0_676, %c504_677], %689 {strides = array<i32>} : memref<4x576xf32, #tpu.memory_space<vmem>>, vector<4x24xf32>,
    %cst_678 = arith.constant 1.000000e+00 : f32
    %691 = vector.broadcast %cst_678 : f32 to vector<4x24xf32>
    %692 = arith.mulf %691, %544 : vector<4x24xf32>
    %c0_679 = arith.constant 0 : index
    %c528 = arith.constant 528 : index
    %693 = vector.load %arg25[%c0_679, %c528] : memref<4x576xf32, #tpu.memory_space<vmem>>, vector<4x24xf32>
    %694 = arith.addf %693, %692 : vector<4x24xf32>
    %c0_680 = arith.constant 0 : index
    %c528_681 = arith.constant 528 : index
    %695 = vector.load %arg25[%c0_680, %c528_681] : memref<4x576xf32, #tpu.memory_space<vmem>>, vector<4x24xf32>
    tpu.vector_store %arg25[%c0_680, %c528_681], %694 {strides = array<i32>} : memref<4x576xf32, #tpu.memory_space<vmem>>, vector<4x24xf32>,
    %cst_682 = arith.constant 1.000000e+00 : f32
    %696 = vector.broadcast %cst_682 : f32 to vector<4x24xf32>
    %697 = arith.mulf %696, %544 : vector<4x24xf32>
    %c0_683 = arith.constant 0 : index
    %c552 = arith.constant 552 : index
    %698 = vector.load %arg25[%c0_683, %c552] : memref<4x576xf32, #tpu.memory_space<vmem>>, vector<4x24xf32>
    %699 = arith.addf %698, %697 : vector<4x24xf32>
    %c0_684 = arith.constant 0 : index
    %c552_685 = arith.constant 552 : index
    %700 = vector.load %arg25[%c0_684, %c552_685] : memref<4x576xf32, #tpu.memory_space<vmem>>, vector<4x24xf32>
    tpu.vector_store %arg25[%c0_684, %c552_685], %699 {strides = array<i32>} : memref<4x576xf32, #tpu.memory_space<vmem>>, vector<4x24xf32>,
    %c0_686 = arith.constant 0 : index
    %c0_687 = arith.constant 0 : index
    %701 = vector.load %arg16[%c0_686, %c0_687] : memref<16x4xf32, #tpu.memory_space<vmem>>, vector<16x4xf32>
    %c0_688 = arith.constant 0 : index
    %c0_689 = arith.constant 0 : index
    %702 = vector.load %arg25[%c0_688, %c0_689] : memref<4x576xf32, #tpu.memory_space<vmem>>, vector<4x576xf32>
    %cst_690 = arith.constant dense<0.000000e+00> : vector<16x576xf32>
    %703 = tpu.matmul %701, %702, %cst_690 {dimension_numbers = #tpu.dot_dimension_numbers<[1], [0], [0], [1], [0, 0, 1, 1], [], []>} : vector<16x4xf32>, vector<4x576xf32>, vector<16x576xf32> -> vector<16x576xf32>
    %c0_691 = arith.constant 0 : index
    %c0_692 = arith.constant 0 : index
    %704 = vector.load %arg17[%c0_691, %c0_692] : memref<16x1xf32, #tpu.memory_space<vmem>>, vector<16x1xf32>
    %705 = vector.broadcast %704 : vector<16x1xf32> to vector<16x576xf32>
    %706 = arith.addf %703, %705 : vector<16x576xf32>
    %c0_693 = arith.constant 0 : index
    %c0_694 = arith.constant 0 : index
    %c0_695 = arith.constant 0 : index
    %707 = vector.load %arg1[%c0_693, %c0_694, %c0_695] : memref<1x16x576xf32, #tpu.memory_space<vmem>>, vector<1x16x576xf32>
    %708 = vector.shape_cast %707 : vector<1x16x576xf32> to vector<16x576xf32>
    %709 = arith.negf %706 : vector<16x576xf32>
    %710 = math.exp %709 : vector<16x576xf32>
    %cst_696 = arith.constant 1.000000e+00 : f32
    %711 = vector.broadcast %cst_696 : f32 to vector<16x576xf32>
    %712 = arith.addf %711, %710 : vector<16x576xf32>
    %713 = arith.divf %711, %712 : vector<16x576xf32>
    %714 = arith.mulf %708, %713 : vector<16x576xf32>
    %c0_697 = arith.constant 0 : index
    %c0_698 = arith.constant 0 : index
    %c0_699 = arith.constant 0 : index
    %715 = vector.load %arg18[%c0_697, %c0_698, %c0_699] : memref<1x16x576xf32, #tpu.memory_space<vmem>>, vector<1x16x576xf32>
    %716 = vector.shape_cast %715 : vector<1x16x576xf32> to vector<16x576xf32>
    %717 = vector.shape_cast %714 : vector<16x576xf32> to vector<1x16x576xf32>
    tpu.vector_store %arg18[%c0_697, %c0_698, %c0_699], %717 {strides = array<i32>} : memref<1x16x576xf32, #tpu.memory_space<vmem>>, vector<1x16x576xf32>,
    return
  }
  func.func @transform_0(%arg0: i32) -> (i32, i32, i32) {
    %c0_i32 = arith.constant 0 : i32
    %c0_i32_0 = arith.constant 0 : i32
    %c0_i32_1 = arith.constant 0 : i32
    return %arg0, %c0_i32, %c0_i32_0 : i32, i32, i32
  }
  func.func @transform_1(%arg0: i32) -> (i32, i32) {
    %c0_i32 = arith.constant 0 : i32
    %c0_i32_0 = arith.constant 0 : i32
    %c0_i32_1 = arith.constant 0 : i32
    return %c0_i32, %c0_i32_0 : i32, i32
  }
  func.func @transform_2(%arg0: i32) -> (i32, i32) {
    %c0_i32 = arith.constant 0 : i32
    %c0_i32_0 = arith.constant 0 : i32
    %c0_i32_1 = arith.constant 0 : i32
    return %c0_i32, %c0_i32_0 : i32, i32
  }
  func.func @transform_3(%arg0: i32) -> (i32, i32, i32) {
    %c0_i32 = arith.constant 0 : i32
    %c0_i32_0 = arith.constant 0 : i32
    %c0_i32_1 = arith.constant 0 : i32
    %c0_i32_2 = arith.constant 0 : i32
    return %c0_i32, %c0_i32_0, %c0_i32_1 : i32, i32, i32
  }
  func.func @transform_4(%arg0: i32) -> (i32, i32) {
    %c0_i32 = arith.constant 0 : i32
    %c0_i32_0 = arith.constant 0 : i32
    %c0_i32_1 = arith.constant 0 : i32
    return %c0_i32, %c0_i32_0 : i32, i32
  }
  func.func @transform_5(%arg0: i32) -> (i32, i32) {
    %c0_i32 = arith.constant 0 : i32
    %c0_i32_0 = arith.constant 0 : i32
    %c0_i32_1 = arith.constant 0 : i32
    return %c0_i32, %c0_i32_0 : i32, i32
  }
  func.func @transform_6(%arg0: i32) -> (i32, i32, i32) {
    %c0_i32 = arith.constant 0 : i32
    %c0_i32_0 = arith.constant 0 : i32
    %c0_i32_1 = arith.constant 0 : i32
    %c0_i32_2 = arith.constant 0 : i32
    return %c0_i32, %c0_i32_0, %c0_i32_1 : i32, i32, i32
  }
  func.func @transform_7(%arg0: i32) -> (i32, i32) {
    %c0_i32 = arith.constant 0 : i32
    %c0_i32_0 = arith.constant 0 : i32
    %c0_i32_1 = arith.constant 0 : i32
    return %c0_i32, %c0_i32_0 : i32, i32
  }
  func.func @transform_8(%arg0: i32) -> (i32, i32, i32) {
    %c0_i32 = arith.constant 0 : i32
    %c0_i32_0 = arith.constant 0 : i32
    %c0_i32_1 = arith.constant 0 : i32
    %c0_i32_2 = arith.constant 0 : i32
    return %c0_i32, %c0_i32_0, %c0_i32_1 : i32, i32, i32
  }
  func.func @transform_9(%arg0: i32) -> (i32, i32) {
    %c0_i32 = arith.constant 0 : i32
    %c0_i32_0 = arith.constant 0 : i32
    %c0_i32_1 = arith.constant 0 : i32
    return %c0_i32, %c0_i32_0 : i32, i32
  }
  func.func @transform_10(%arg0: i32) -> (i32, i32, i32) {
    %c0_i32 = arith.constant 0 : i32
    %c0_i32_0 = arith.constant 0 : i32
    %c0_i32_1 = arith.constant 0 : i32
    %c0_i32_2 = arith.constant 0 : i32
    return %c0_i32, %c0_i32_0, %c0_i32_1 : i32, i32, i32
  }
  func.func @transform_11(%arg0: i32) -> (i32, i32) {
    %c0_i32 = arith.constant 0 : i32
    %c0_i32_0 = arith.constant 0 : i32
    %c0_i32_1 = arith.constant 0 : i32
    return %c0_i32, %c0_i32_0 : i32, i32
  }
  func.func @transform_12(%arg0: i32) -> (i32, i32) {
    %c0_i32 = arith.constant 0 : i32
    %c0_i32_0 = arith.constant 0 : i32
    %c0_i32_1 = arith.constant 0 : i32
    return %c0_i32, %c0_i32_0 : i32, i32
  }
  func.func @transform_13(%arg0: i32) -> (i32, i32) {
    %c0_i32 = arith.constant 0 : i32
    %c0_i32_0 = arith.constant 0 : i32
    %c0_i32_1 = arith.constant 0 : i32
    return %c0_i32, %c0_i32_0 : i32, i32
  }
  func.func @transform_14(%arg0: i32) -> (i32, i32) {
    %c0_i32 = arith.constant 0 : i32
    %c0_i32_0 = arith.constant 0 : i32
    %c0_i32_1 = arith.constant 0 : i32
    return %c0_i32, %c0_i32_0 : i32, i32
  }
  func.func @transform_15(%arg0: i32) -> (i32, i32) {
    %c0_i32 = arith.constant 0 : i32
    %c0_i32_0 = arith.constant 0 : i32
    %c0_i32_1 = arith.constant 0 : i32
    return %c0_i32, %c0_i32_0 : i32, i32
  }
  func.func @transform_16(%arg0: i32) -> (i32, i32) {
    %c0_i32 = arith.constant 0 : i32
    %c0_i32_0 = arith.constant 0 : i32
    %c0_i32_1 = arith.constant 0 : i32
    return %c0_i32, %c0_i32_0 : i32, i32
  }
  func.func @transform_17(%arg0: i32) -> (i32, i32, i32) {
    %c0_i32 = arith.constant 0 : i32
    %c0_i32_0 = arith.constant 0 : i32
    %c0_i32_1 = arith.constant 0 : i32
    return %arg0, %c0_i32, %c0_i32_0 : i32, i32, i32
  }
}

</mosaic_0001>

<bundles_post_ra>
// kernel: tpu_custom_call.1
= control target key start
LH: loop header
LB: loop body
LE: loop exit
PB: predicated region body
PF: predicated region fallthrough
CT: control target
= control target key end

     0   :  { %s6702_s0 = inlined_call_operand.hbm [shape: f32[2,16,576], index: 0, kind: input, shape index: {}]   ;;  %s6703_s1 = inlined_call_operand.vmem [shape: f32[4,16], index: 1, kind: input, shape index: {}]   ;;  %s6704_s2 = inlined_call_operand.vmem [shape: f32[4,1], index: 2, kind: input, shape index: {}]   ;;  %s6705_s3 = inlined_call_operand.vmem [shape: f32[9,4,4], index: 3, kind: input, shape index: {}]   ;;  %s6706_s4 = inlined_call_operand.vmem [shape: f32[4,1], index: 4, kind: input, shape index: {}]   ;;  %s6707_s5 = inlined_call_operand.vmem [shape: f32[21,11], index: 5, kind: input, shape index: {}]   ;;  %s6708_s6 = inlined_call_operand.vmem [shape: f32[9,4,4], index: 6, kind: input, shape index: {}]   ;;  %s6709_s7 = inlined_call_operand.vmem [shape: f32[4,1], index: 7, kind: input, shape index: {}]   ;;  %s6710_s8 = inlined_call_operand.vmem [shape: f32[9,4,4], index: 8, kind: input, shape index: {}]   ;;  %s6711_s9 = inlined_call_operand.vmem [shape: f32[4,1], index: 9, kind: input, shape index: {}]   ;;  %s6712_s10 = inlined_call_operand.vmem [shape: f32[9,4,4], index: 10, kind: input, shape index: {}]   ;;  %s6713_s11 = inlined_call_operand.vmem [shape: f32[4,1], index: 11, kind: input, shape index: {}]   ;;  %s6714_s12 = inlined_call_operand.vmem [shape: f32[4,4], index: 12, kind: input, shape index: {}]   ;;  %s6715_s13 = inlined_call_operand.vmem [shape: f32[4,1], index: 13, kind: input, shape index: {}]   ;;  %s6716_s14 = inlined_call_operand.vmem [shape: f32[2,24], index: 14, kind: input, shape index: {}]   ;;  %s6717_s15 = inlined_call_operand.vmem [shape: f32[16,4], index: 15, kind: input, shape index: {}]   ;;  %s6718_s16 = inlined_call_operand.vmem [shape: f32[16,1], index: 16, kind: input, shape index: {}]   ;;  %s6719_s17 = inlined_call_operand.hbm [shape: f32[2,16,576], index: 17, kind: output, shape index: {}]  }
   0x1   :  { %6767 = sst [smem:[#allocation22_spill]] %s6702_s0 }
   0x2   :  { %6768 = sst [smem:[#allocation23_spill]] %s6703_s1 }
   0x3   :  { %6769 = sst [smem:[#allocation24_spill]] %s6704_s2 }
   0x4   :  { %6770 = sst [smem:[#allocation25_spill]] %s6705_s3 }
   0x5   :  { %6771 = sst [smem:[#allocation26_spill]] %s6716_s14 }
   0x6   :  { %6772 = sst [smem:[#allocation27_spill]] %s6717_s15 }
   0x7   :  { %6773 = sst [smem:[#allocation28_spill]] %s6718_s16 }
   0x8   :  { %6774 = sst [smem:[#allocation29_spill]] %s6719_s17 }
   0x9   :  { %22 = vsyncpa [#allocation10], 0 }
   0xa   :  { %24 = vsyncpa [#allocation10 + $0x1], 0 }
   0xb   :  { %25 = vsyncpa [#allocation11], 0 }
   0xc   :  { %27 = vsyncpa [#allocation11 + $0x1], 0  ;;  %s5626_s24 = smov 0   ;;  %s5628_s25 = smov 0  }
   0xd   :  { %s5630_s26 = smov 0   ;;  %s5632_s27 = smov 0  }
   0xe LB: > { %6775 = sst [smem:[#allocation15_spill]] %s5477_s24  ;;  %s5647_s28 = sadd.s32 4294967295, %s5489_s27   ;;  %s5489_s27 = sphi %s5632_s27, %s6823_s27   ;;  %s5485_s26 = sphi %s5630_s26, %s6825_s26   ;;  %s5481_s25 = sphi %s5628_s25, %s6827_s25   ;;  %s5477_s24 = sphi %s5626_s24, %s6826_s24  }
   0xf   : > { %6776 = sst [smem:[#allocation16_spill]] %s5485_s26  ;;  %s4945_s29 = sadd.s32 4294967294, %s5489_s27  }
  0x10   : > { %6777 = sst [smem:[#allocation17_spill]] %s5647_s28  ;;  %s5651_s0 = sadd.s32 1, %s5489_s27  }
  0x11   : > { %6778 = sst [smem:[#allocation18_spill]] %s5651_s0  ;;  %s40_s30 = sadd.s32 1, %s5485_s26 }
  0x12   : > { %s37_s18 = ssub.s32 %s5489_s27, %s5651_s0  ;;  %p47_p0 = scmp.ne.s32.totalorder %s5485_s26, %s5481_s25 }
  0x13   : > { %p38_p1 = scmp.eq.s32.totalorder %s37_s18, 0  ;;  %p48_p2 = scmp.eq.s32.totalorder %s5489_s27, 0 }
  0x14   : > { %p53_p3 = scmp.ne.s32.totalorder %s5481_s25, %s5477_s24  ;;  %p54_p4 = scmp.eq.s32.totalorder %s5647_s28, 0 }
  0x15   : > { %s5663_s19 = scalar_select %p38_p1, %s5485_s26, %s40_s30  }
  0x16   : > { %p49_p5 = por %p48_p2, %p47_p0  ;;  %p5665_p6 = por %p54_p4, %p53_p3 }
  0x17   : > { %6779 = sst [smem:[#allocation19_spill]] %s5663_s19  ;;  %p413_p7 = scmp.eq.s32.totalorder %s5647_s28, 1 }
  0x18   : > { %p419_p8 = scmp.eq.s32.totalorder %s4945_s29, 1  ;;  %p4947_p9 = scmp.ge.s32.totalorder %s5489_s27, 2 }
  0x19   : > { %p5271_p10 = scmp.lt.s32.totalorder %s5489_s27, 2  ;;  %p5672_p11 = por %p413_p7, %p47_p0 }
  0x1a   : > { %p5676_p12 = por %p419_p8, %p53_p3  ;;  %s487_s22 = sand.u32 1, %s5485_s26  }
  0x1b   : > { %s6781_s20 = scalar_select %p5672_p11, 1, 0 }
  0x1c   : > { %s6783_s21 = scalar_select %p5676_p12, 1, 0 }
  0x1d   : > { %6782 = sst [smem:[#allocation20_spill]] %s6781_s20  ;;  %s5256_s23 = smul.u32 80, %s5489_s27 }
  0x1e   : > { %6784 = sst [smem:[#allocation21_spill]] %s6783_s21  ;;  %s5255_s30 = smul.u32 80, %s487_s22 }
  0x1f   : > { %s6785_s0 = sld [smem:[#allocation22_spill]]  ;;  %p5685_p13 = pnand %p5271_p10, %p49_p5 }
  0x20   : > { %s491_s28 = scalar_lea.vmem [#allocation9], %s5255_s30  ;;  %s488_s15 = scalar_lea.sflag [#allocation10], %s487_s22 }
  0x21   : > { %s499_s20 = sshll.u32 %s491_s28, 4  ;;  %p5397_p1 = pneg %p5685_p13  ;;  %s500_s20 = int_to_ptr.vmem [resolvable:$true] %s499_s20 }
  0x25   : > { %s496_s24 = scalar_lea.hbm %s6785_s0, %s5256_s23  ;;  %s5400_s18 = scalar_lea.hbm %s6785_s0, 160 }
  0x26   : > { %s497_s29 = sshll.u32 %s496_s24, 4  ;;  %s498_s29 = int_to_ptr.hbm [resolvable:$true] %s497_s29 }
  0x27   : > { %s5393_s16 = sshra.s32 %s498_s29, 4  ;;  %s5394_s16 = int_to_ptr.hbm [resolvable:$true] %s5393_s16 }
  0x28   : > { %s5395_s26 = scalar_lea.hbm %s5394_s16, 80  ;;  %p5401_p4 = scmp.lt.s32.totalorder %s5394_s16, %s6785_s0 }
  0x29   : > { %p5396_p0 = scmp.ne.s32.totalorder %s5394_s16, %s5395_s26  ;;  %p5402_p5 = scmp.lt.s32.totalorder %s5400_s18, %s5395_s26 }
  0x2b   : > { %p5398_p2 = pnand %p5397_p1, %p5396_p0  ;;  %p5403_p7 = por %p5402_p5, %p5401_p4 }
  0x2d   : > { %p5399_p3 = pneg %p5398_p2 }
  0x2f   : > { %p5404_p8 = pnand %p5403_p7, %p5399_p3 }
  0x31   : > { %5407 = shalt.err (!%p5404_p8)
}
  0x32   : > { %s5491_s24 = smov 640   ;;  %s5492_s28 = smov 40  }
  0x33   : > { %5266 = dma.hbm_to_vmem [thread:$0]  (!%p5685_p13), %s498_s29, 1280, %s500_s20, %s488_s15, %s5491_s24, %s5491_s24, %s5492_s28  }
  0x34   : > { %p4949_p10 = scmp.ge.s32.totalorder %s5489_s27, 1  ;;  %p507_p0 = scmp.lt.s32.totalorder %s5489_s27, 3 }
  0x36   : > { %p508_p1 = pnand %p4949_p10, %p507_p0 }
  0x37   : > { %s5702_s22 = sand.u32 (!%p508_p1), 1, %s5481_s25  }
  0x38   : > { %511 = sbr.rel (%p508_p1) target bundleno = 3077 (0xc05), region = 88  ;;  %s514_s16 = scalar_lea.sflag (!%p508_p1), [#allocation10], %s5702_s22 }
  0x39   : > { %s6732_s14 = smul.u32 (!%p508_p1), 80, %s5702_s22 }
  0x3b   : > { %s5708_s26 = scalar_lea.vmem (!%p508_p1), [#allocation9], %s6732_s14 }
  0x3d   : > { %5468 = dma.done.wait (%p5665_p6), %s514_s16, 1280  }
  0x3e   : > { %5470 = vsyncadd (%p5665_p6), %s514_s16, 4294966016  ;;  %v5493_v0 = vmov 0   ;;  %v574_v1 = vld [vmem:[%s5708_s26 + $0x28] sm:$0xff]  ;;  %v575_v2 = vld [vmem:[%s5708_s26 + $0x30] sm:$0xff]  ;;  %s6787_s1 = sld [smem:[#allocation23_spill]]  ;;  %vm586_vm0 = vcmask 130048  }
  0x3f   : > { %5350 = vset.pattern.permute.xlu0 %v5493_v0  ;;  %5352 = vset.pattern.permute.xlu2 %v5493_v0  ;;  %v569_v3 = vld [vmem:[%s5708_s26] sm:$0xff]  ;;  %v570_v4 = vld [vmem:[%s5708_s26 + $0x8] sm:$0xff]  ;;  %v572_v7 = vld [vmem:[%s5708_s26 + $0x18] sm:$0xff]  ;;  %s6788_s2 = sld [smem:[#allocation24_spill]]  ;;  %vm696_vm1 = vcmask 1043456   ;;  %vm703_vm2 = vcmask 519168  }
  0x40   : > { %5351 = vset.pattern.permute.xlu1 %v5493_v0  ;;  %604 = vmatpush.msra.mxu0 %v574_v1  ;;  %v577_v5 = vld [vmem:[%s5708_s26 + $0x40] sm:$0xff]  ;;  %v576_v8 = vld [vmem:[%s5708_s26 + $0x38] sm:$0xff]  ;;  %v578_v9 = vld [vmem:[%s5708_s26 + $0x48] sm:$0xff]  ;;  %s6753_s30 = smov 127   ;;  %s6745_s29 = smov 126   ;;  %vm712_vm3 = vcmask 31744  }
  0x41   : > { %624 = vmatpush.msra.mxu2 %v575_v2  ;;  %664 = vmatpush.msra.mxu3 %v577_v5  ;;  %v571_v10 = vld [vmem:[%s5708_s26 + $0x10] sm:$0xff]  ;;  %v573_v12 = vld [vmem:[%s5708_s26 + $0x20] sm:$0xff]  ;;  %s6733_s19 = smov 104   ;;  %s5497_s23 = smov 103   ;;  %vm862_vm4 = vcmask 1039360   ;;  %vm1076_vm5 = vcmask 1031168  }
  0x42   : > { %605 = vmatpush.msra.mxu0 %v569_v3  ;;  %s5498_s18 = smov 102   ;;  %s6735_s24 = smov 80   ;;  %vm1203_vm6 = vcmask 850944   ;;  %vm1331_vm7 = vcmask 842752   ;;  %vm1459_vm8 = vcmask 834560   ;;  %vm1587_vm9 = vcmask 654336  }
  0x43   : > { %625 = vmatpush.msra.mxu2 %v570_v4  ;;  %665 = vmatpush.msra.mxu3 %v572_v7  ;;  %s5500_s28 = smov 79   ;;  %s5501_s16 = smov 78   ;;  %vm1715_vm10 = vcmask 646144   ;;  %vm1843_vm11 = vcmask 637952   ;;  %vm1971_vm12 = vcmask 1044480   ;;  %vm1967_vm13 = vcmask 171008  }
  0x44   : > { %v579_v6 = vld [vmem:[%s6787_s1] sm:$0xf]  ;;  %684 = vmatpush.msrb.mxu0 %v578_v9  ;;  %s6789_s3 = sld [smem:[#allocation25_spill]]  ;;  %vm1954_vm14 = vcmask 957444   ;;  %s6736_s15 = smov 64  }
  0x45   : > { %4950 = vmatmul.msk.f32.vlgmr.msra.gmra.mxu0 %vm586_vm0, %v579_v6  ;;  %4951 = vmatmul.msk.f32.vlgmr.msra.gmra.mxu2 %vm586_vm0, %v579_v6  ;;  %v580_v11 = vld [vmem:[%s6788_s2] sm:$0xf]  ;;  %vm1955_vm15 = vmor %vm1954_vm14, %vm696_vm1  ;;  %s6734_s17 = smov 112   ;;  %s6741_s1 = smov 16   ;;  %vm2439_vm14 = vcmask 76824  }
  0x46   : > { %644 = vmatpush.msrb.mxu2 %v576_v8  ;;  %4953 = vmatmul.msk.f32.vlgmr.msra.gmra.mxu3 %vm586_vm0, %v579_v6  ;;  %s6738_s20 = smov 96   ;;  %s6743_s21 = smov 48  }
  0x47   : > { %583 = vperm.xlu0 %5350, %v580_v11   ;;  %685 = vmatpush.msrb.mxu0 %v573_v12  ;;  %s5508_s14 = smov 11  }
  0x48   : > { %645 = vmatpush.msrb.mxu2 %v571_v10  ;;  %v705_v10 = vld [vmem:[%s6714_s12] sm:$0xf] }
  0x4d   : > { %4952 = vmatmul.msk.f32.vlgmr.msrb.gmra.mxu2 %vm586_vm0, %v579_v6  ;;  %4954 = vmatmul.msk.f32.vlgmr.msrb.gmra.mxu0 %vm586_vm0, %v579_v6 }
  0xb9   : > { %v584_v13 = vpop.permute.xlu0 %583 }
  0xc2   : > { %v607_v14 = vpop.f32.mrf.mxu0 }
  0xc3   : > { %v608_v15 = vadd.f32 %v607_v14, %v584_v13 }
  0xc5   : > { %4955 = vmatpush.msk.msra.mxu1 %vm696_vm1, %v608_v15 }
  0xc6   : > { %4956 = vmatmul.msk.f32.vlgmr.msra.gmra.mxu1 %vm712_vm3, %v705_v10 }
  0xc8   : > { %v627_v16 = vpop.f32.mrf.mxu2 }
  0xc9   : > { %v628_v17 = vadd.f32 %v627_v16, %v584_v13  ;;  %v667_v18 = vpop.f32.mrf.mxu3 }
  0xca   : > { %v687_v19 = vpop.f32.mrf.mxu0  ;;  %v668_v21 = vadd.f32 %v667_v18, %v584_v13 }
  0xcb   : > { %v694_v20 = vrot.slane %v628_v17, 4  ;;  %v688_v22 = vadd.f32 %v687_v19, %v584_v13  ;;  %4957 = vmatpush.msk.msra.mxu2 %vm696_vm1, %v628_v17  ;;  %v4965_v17 = vld [vmem:[%s6789_s3 + $0x4] sm:$0xf] }
  0xcc   : > { %4961 = vmatpush.msk.msra.mxu0 %vm696_vm1, %v668_v21  ;;  %v695_v25 = vrot.slane %v668_v21, 4  ;;  %4958 = vmatmul.msk.f32.vlgmr.msra.gmra.mxu2 %vm712_vm3, %v705_v10 }
  0xcd   : > { %704 = vst.msk [vmem:[#allocation2 + $0x10] sm:$0xf] %vm703_vm2, %v688_v22  ;;  %v5739_v23 = vsel %vm696_vm1, %v608_v15, %v694_v20  ;;  %4963 = vmatpush.msk.msrb.mxu1 %vm696_vm1, %v688_v22  ;;  %4962 = vmatmul.msk.f32.vlgmr.msra.gmra.mxu0 %vm712_vm3, %v705_v10 }
  0xce   : > { %847 = vst [vmem:[#allocation1] ss:$2 sm:$0xff] %v5739_v23  ;;  %4964 = vmatmul.msk.f32.vlgmr.msrb.gmra.mxu1 %vm712_vm3, %v705_v10 }
  0xd0   : > { %v647_v24 = vpop.f32.mrf.mxu2 }
  0xd1   : > { %v648_v26 = vadd.f32 %v647_v24, %v584_v13 }
  0xd3   : > { %v5745_v27 = vsel %vm696_vm1, %v648_v26, %v695_v25  ;;  %4959 = vmatpush.msk.msrb.mxu3 %vm696_vm1, %v648_v26 }
  0xd4   : > { %v1179_v28 = vld [vmem:[#allocation2 + $0x10] sm:$0xf]  ;;  %849 = vst [vmem:[#allocation1 + $0x10] ss:$2 sm:$0xff] %v5745_v27  ;;  %4960 = vmatmul.msk.f32.vlgmr.msrb.gmra.mxu3 %vm712_vm3, %v705_v10 }
  0xd5   : > { %1187 = vst [vmem:[#allocation1 + $0x20] ss:$2 sm:$0xff] %v1179_v28  ;;  %v850_v29 = vld.sshfl [vmem:[#allocation1] sm:$0xff pattern:$0x75316420] }
  0xd6   : > { %v851_v30 = vld.sshfl [vmem:[#allocation1 + $0x8] sm:$0xff pattern:$0x75316420]  ;;  %v1307_v32 = vld [vmem:[#allocation2 + $0x10] sm:$0xf] }
  0xd7   : > { %957 = vst [vmem:[#allocation1] ss:$2 sm:$0xff] %v5739_v23  ;;  %856 = vrot.lane.b32.xlu0 %v851_v30, %s6753_s30  ;;  %v1435_v38 = vld [vmem:[#allocation2 + $0x10] sm:$0xf] }
  0xd8   : > { %v1563_v44 = vld [vmem:[#allocation2 + $0x10] sm:$0xf] }
  0xd9   : > { %v1691_v50 = vld [vmem:[#allocation2 + $0x10] sm:$0xf] }
  0xda   : > { %v1819_v56 = vld [vmem:[#allocation2 + $0x10] sm:$0xf] }
  0xdb   : > { %v852_v35 = vld.sshfl [vmem:[#allocation1 + $0x10] sm:$0xff pattern:$0x75316420]  ;;  %v853_v36 = vld.sshfl [vmem:[#allocation1 + $0x18] sm:$0xff pattern:$0x75316420] }
  0xdc   : > { %v5751_v31 = vld.sshfl [vmem:[#allocation1 + $0x20] sm:$0xff pattern:$0x75316420]  ;;  %858 = vrot.lane.b32.xlu1 %v852_v35, %s6753_s30  ;;  %959 = vst [vmem:[#allocation1 + $0x10] ss:$2 sm:$0xff] %v5745_v27 }
  0xdd   : > { %1315 = vst [vmem:[#allocation1 + $0x20] ss:$2 sm:$0xff] %v1307_v32 }
  0xde   : > { %v5753_v33 = vld.sshfl [vmem:[#allocation1] sm:$0xff pattern:$0x75316420]  ;;  %v5755_v34 = vld.sshfl [vmem:[#allocation1 + $0x8] sm:$0xff pattern:$0x75316420] }
  0xdf   : > { %1061 = vst [vmem:[#allocation1] ss:$2 sm:$0xff] %v5739_v23 }
  0xe3   : > { %v5766_v41 = vld.sshfl [vmem:[#allocation1 + $0x10] sm:$0xff pattern:$0x75316420]  ;;  %v5768_v42 = vld.sshfl [vmem:[#allocation1 + $0x18] sm:$0xff pattern:$0x75316420] }
  0xe4   : > { %v5760_v37 = vld.sshfl [vmem:[#allocation1 + $0x20] sm:$0xff pattern:$0x75316420]  ;;  %854 = vrot.lane.b32.xlu1 %v850_v29, %s6753_s30  ;;  %1063 = vst [vmem:[#allocation1 + $0x10] ss:$2 sm:$0xff] %v5745_v27 }
  0xe5   : > { %1443 = vst [vmem:[#allocation1 + $0x20] ss:$2 sm:$0xff] %v1435_v38  ;;  %v5873_v38 = vld [vmem:[%s6789_s3 + $0xc] sm:$0xf] }
  0xe6   : > { %v1064_v39 = vld.sshfl [vmem:[#allocation1] sm:$0xff pattern:$0x75316420]  ;;  %v1065_v40 = vld.sshfl [vmem:[#allocation1 + $0x8] sm:$0xff pattern:$0x75316420] }
  0xe7   : > { %1183 = vst [vmem:[#allocation1] ss:$2 sm:$0xff] %v5739_v23  ;;  %1070 = vrot.lane.b32.xlu2 %v1065_v40, %s6745_s29  ;;  %1068 = vrot.lane.b32.xlu0 %v1064_v39, %s6745_s29 }
  0xeb   : > { %v1066_v47 = vld.sshfl [vmem:[#allocation1 + $0x10] sm:$0xff pattern:$0x75316420]  ;;  %v1067_v48 = vld.sshfl [vmem:[#allocation1 + $0x18] sm:$0xff pattern:$0x75316420] }
  0xec   : > { %v5771_v43 = vld.sshfl [vmem:[#allocation1 + $0x20] sm:$0xff pattern:$0x75316420]  ;;  %860 = vrot.lane.b32.xlu1 %v853_v36, %s6753_s30  ;;  %1185 = vst [vmem:[#allocation1 + $0x10] ss:$2 sm:$0xff] %v5745_v27 }
  0xed   : > { %1571 = vst [vmem:[#allocation1 + $0x20] ss:$2 sm:$0xff] %v1563_v44  ;;  %v5890_v44 = vld [vmem:[%s6789_s3 + $0x10] sm:$0xf] }
  0xee   : > { %v1188_v45 = vld.sshfl [vmem:[#allocation1] sm:$0xff pattern:$0x75316420]  ;;  %v1189_v46 = vld.sshfl [vmem:[#allocation1 + $0x8] sm:$0xff pattern:$0x75316420] }
  0xef   : > { %1193 = vrot.lane.b32.xlu0 %v1188_v45, %s6733_s19  ;;  %1311 = vst [vmem:[#allocation1] ss:$2 sm:$0xff] %v5739_v23  ;;  %1072 = vrot.lane.b32.xlu2 %v1066_v47, %s6745_s29 }
  0xf3   : > { %v1191_v53 = vld.sshfl [vmem:[#allocation1 + $0x18] sm:$0xff pattern:$0x75316420]  ;;  %v1190_v54 = vld.sshfl [vmem:[#allocation1 + $0x10] sm:$0xff pattern:$0x75316420] }
  0xf4   : > { %v5778_v49 = vld.sshfl [vmem:[#allocation1 + $0x20] sm:$0xff pattern:$0x75316420]  ;;  %1195 = vrot.lane.b32.xlu1 %v1189_v46, %s6733_s19  ;;  %1313 = vst [vmem:[#allocation1 + $0x10] ss:$2 sm:$0xff] %v5745_v27 }
  0xf5   : > { %1699 = vst [vmem:[#allocation1 + $0x20] ss:$2 sm:$0xff] %v1691_v50  ;;  %v5905_v50 = vld [vmem:[%s6789_s3 + $0x14] sm:$0xf] }
  0xf6   : > { %v1317_v51 = vld.sshfl [vmem:[#allocation1 + $0x8] sm:$0xff pattern:$0x75316420]  ;;  %v1316_v52 = vld.sshfl [vmem:[#allocation1] sm:$0xff pattern:$0x75316420] }
  0xf7   : > { %1439 = vst [vmem:[#allocation1] ss:$2 sm:$0xff] %v5739_v23  ;;  %1074 = vrot.lane.b32.xlu2 %v1067_v48, %s6745_s29  ;;  %1199 = vrot.lane.b32.xlu0 %v1191_v53, %s6733_s19 }
  0xfb   : > { %v1318_v59 = vld.sshfl [vmem:[#allocation1 + $0x10] sm:$0xff pattern:$0x75316420]  ;;  %v1319_v60 = vld.sshfl [vmem:[#allocation1 + $0x18] sm:$0xff pattern:$0x75316420] }
  0xfc   : > { %v1704_v55 = vld.sshfl [vmem:[#allocation1 + $0x20] sm:$0xff pattern:$0x75316420]  ;;  %1323 = vrot.lane.b32.xlu1 %v1317_v51, %s5497_s23  ;;  %1441 = vst [vmem:[#allocation1 + $0x10] ss:$2 sm:$0xff] %v5745_v27 }
  0xfd   : > { %1827 = vst [vmem:[#allocation1 + $0x20] ss:$2 sm:$0xff] %v1819_v56  ;;  %v5018_v56 = vld [vmem:[%s6789_s3 + $0x18] sm:$0xf] }
  0xfe   : > { %v1444_v57 = vld.sshfl [vmem:[#allocation1] sm:$0xff pattern:$0x75316420]  ;;  %v1445_v58 = vld.sshfl [vmem:[#allocation1 + $0x8] sm:$0xff pattern:$0x75316420] }
  0xff   : > { %1567 = vst [vmem:[#allocation1] ss:$2 sm:$0xff] %v5739_v23  ;;  %1197 = vrot.lane.b32.xlu2 %v1190_v54, %s6733_s19  ;;  %1321 = vrot.lane.b32.xlu0 %v1316_v52, %s5497_s23 }
 0x103   : > { %v1446_v63 = vld.sshfl [vmem:[#allocation1 + $0x10] sm:$0xff pattern:$0x75316420]  ;;  %v1447_v0 = vld.sshfl [vmem:[#allocation1 + $0x18] sm:$0xff pattern:$0x75316420] }
 0x104   : > { %1449 = vrot.lane.b32.xlu1 %v1444_v57, %s5498_s18  ;;  %1569 = vst [vmem:[#allocation1 + $0x10] ss:$2 sm:$0xff] %v5745_v27  ;;  %v1832_v13 = vld.sshfl [vmem:[#allocation1 + $0x20] sm:$0xff pattern:$0x75316420] }
 0x106   : > { %v1572_v61 = vld.sshfl [vmem:[#allocation1] sm:$0xff pattern:$0x75316420]  ;;  %v1573_v62 = vld.sshfl [vmem:[#allocation1 + $0x8] sm:$0xff pattern:$0x75316420] }
 0x107   : > { %1695 = vst [vmem:[#allocation1] ss:$2 sm:$0xff] %v5739_v23  ;;  %1325 = vrot.lane.b32.xlu2 %v1318_v59, %s5497_s23  ;;  %1453 = vrot.lane.b32.xlu0 %v1446_v63, %s5498_s18 }
 0x10b   : > { %v1575_v3 = vld.sshfl [vmem:[#allocation1 + $0x18] sm:$0xff pattern:$0x75316420]  ;;  %v1574_v4 = vld.sshfl [vmem:[#allocation1 + $0x10] sm:$0xff pattern:$0x75316420] }
 0x10c   : > { %1577 = vrot.lane.b32.xlu1 %v1572_v61, %s6735_s24  ;;  %1697 = vst [vmem:[#allocation1 + $0x10] ss:$2 sm:$0xff] %v5745_v27 }
 0x10e   : > { %v1701_v1 = vld.sshfl [vmem:[#allocation1 + $0x8] sm:$0xff pattern:$0x75316420]  ;;  %v1700_v2 = vld.sshfl [vmem:[#allocation1] sm:$0xff pattern:$0x75316420] }
 0x10f   : > { %1823 = vst [vmem:[#allocation1] ss:$2 sm:$0xff] %v5739_v23  ;;  %1581 = vrot.lane.b32.xlu0 %v1574_v4, %s6735_s24  ;;  %1451 = vrot.lane.b32.xlu2 %v1445_v58, %s5498_s18  ;;  %v840_v23 = vld [vmem:[%s6789_s3] sm:$0xf] }
 0x110   : > { %v5036_v4 = vld [vmem:[%s6789_s3 + $0x20] sm:$0xf] }
 0x113   : > { %v1703_v5 = vld.sshfl [vmem:[#allocation1 + $0x18] sm:$0xff pattern:$0x75316420]  ;;  %v1702_v6 = vld.sshfl [vmem:[#allocation1 + $0x10] sm:$0xff pattern:$0x75316420] }
 0x114   : > { %1709 = vrot.lane.b32.xlu1 %v1702_v6, %s5500_s28  ;;  %1825 = vst [vmem:[#allocation1 + $0x10] ss:$2 sm:$0xff] %v5745_v27 }
 0x116   : > { %v1828_v8 = vld.sshfl [vmem:[#allocation1] sm:$0xff pattern:$0x75316420]  ;;  %v1829_v9 = vld.sshfl [vmem:[#allocation1 + $0x8] sm:$0xff pattern:$0x75316420] }
 0x117   : > { %1579 = vrot.lane.b32.xlu2 %v1573_v62, %s6735_s24  ;;  %1707 = vrot.lane.b32.xlu0 %v1701_v1, %s5500_s28  ;;  %v5027_v62 = vld [vmem:[%s6789_s3 + $0x1c] sm:$0xf] }
 0x11b   : > { %v1830_v7 = vld.sshfl [vmem:[#allocation1 + $0x10] sm:$0xff pattern:$0x75316420]  ;;  %v1831_v11 = vld.sshfl [vmem:[#allocation1 + $0x18] sm:$0xff pattern:$0x75316420] }
 0x11c   : > { %1201 = vrot.lane.b32.xlu1 %v5751_v31, %s6733_s19  ;;  %v4982_v31 = vld [vmem:[%s6789_s3 + $0x8] sm:$0xf]  ;;  %s5510_s19 = smov 33  }
 0x11f   : > { %1705 = vrot.lane.b32.xlu2 %v1700_v2, %s5500_s28  ;;  %1837 = vrot.lane.b32.xlu0 %v1830_v7, %s5501_s16 }
 0x124   : > { %1833 = vrot.lane.b32.xlu1 %v1828_v8, %s5501_s16 }
 0x127   : > { %1835 = vrot.lane.b32.xlu2 %v1829_v9, %s5501_s16  ;;  %1329 = vrot.lane.b32.xlu0 %v5760_v37, %s5497_s23 }
 0x12c   : > { %1455 = vrot.lane.b32.xlu1 %v1447_v0, %s5498_s18 }
 0x12f   : > { %1327 = vrot.lane.b32.xlu2 %v1319_v60, %s5497_s23  ;;  %1583 = vrot.lane.b32.xlu0 %v1575_v3, %s6735_s24  ;;  %s6740_s23 = smov 88  }
 0x134   : > { %1585 = vrot.lane.b32.xlu1 %v5778_v49, %s6735_s24 }
 0x137   : > { %1457 = vrot.lane.b32.xlu2 %v5771_v43, %s5498_s18  ;;  %1713 = vrot.lane.b32.xlu0 %v1704_v55, %s5500_s28  ;;  %s5513_s18 = smov 77  }
 0x13c   : > { %1839 = vrot.lane.b32.xlu1 %v1831_v11, %s5501_s16 }
 0x13f   : > { %1711 = vrot.lane.b32.xlu2 %v1703_v5, %s5500_s28  ;;  %s5509_s28 = smov 22  }
 0x141   : > { %v1071_v12 = vpop.permute.xlu2 %1070 }
 0x147   : > { %1841 = vrot.lane.b32.xlu2 %v1832_v13, %s5501_s16  ;;  %s6737_s16 = smov 32  }
 0x149   : > { %v1073_v14 = vpop.permute.xlu2 %1072  ;;  %v857_v15 = vpop.permute.xlu0 %856 }
 0x14a   : > { %v1078_v20 = vsel %vm1076_vm5, %v1071_v12, %v1073_v14 }
 0x14e   : > { %v859_v16 = vpop.permute.xlu1 %858 }
 0x14f   : > { %v864_v18 = vsel %vm862_vm4, %v857_v15, %v859_v16 }
 0x150   : > { %4968 = vmatpush.msk.msra.mxu3 %vm696_vm1, %v864_v18 }
 0x151   : > { %v1075_v19 = vpop.permute.xlu2 %1074  ;;  %4969 = vmatmul.msk.f32.vlgmr.msra.gmra.mxu3 %vm712_vm3, %v4965_v17 }
 0x152   : > { %4976 = vmatpush.msk.msrb.mxu3 %vm696_vm1, %v5755_v34  ;;  %v1079_v32 = vsel %vm1076_vm5, %v1073_v14, %v1075_v19 }
 0x154   : > { %4985 = vmatpush.msk.msra.mxu3 %vm696_vm1, %v1078_v20 }
 0x156   : > { %v855_v22 = vpop.permute.xlu1 %854 }
 0x157   : > { %v863_v24 = vsel %vm862_vm4, %v855_v22, %v857_v15 }
 0x158   : > { %4966 = vmatpush.msk.msrb.mxu2 %vm696_vm1, %v863_v24 }
 0x159   : > { %v1069_v21 = vpop.permute.xlu0 %1068  ;;  %v1198_v25 = vpop.permute.xlu2 %1197  ;;  %4967 = vmatmul.msk.f32.vlgmr.msrb.gmra.mxu2 %vm712_vm3, %v4965_v17  ;;  %4977 = vmatmul.msk.f32.vlgmr.msrb.gmra.mxu3 %vm712_vm3, %v840_v23 }
 0x15a   : > { %v1077_v26 = vsel %vm1076_vm5, %v1069_v21, %v1071_v12  ;;  %4974 = vmatpush.msk.msra.mxu2 %vm696_vm1, %v5753_v33  ;;  %vm2075_vm5 = vcmask 265392  }
 0x15c   : > { %4983 = vmatpush.msk.msrb.mxu2 %vm696_vm1, %v1077_v26  ;;  %v5985_v26 = vpop.f32.mrf.mxu3 }
 0x15e   : > { %v861_v28 = vpop.permute.xlu1 %860 }
 0x15f   : > { %v865_v29 = vsel %vm862_vm4, %v859_v16, %v861_v28  ;;  %4972 = vmatpush.msk.msra.mxu1 %vm696_vm1, %v861_v28  ;;  %vm1995_vm4 = vcmask 84992  }
 0x160   : > { %4970 = vmatpush.msk.msrb.mxu0 %vm696_vm1, %v865_v29  ;;  %4973 = vmatmul.msk.f32.vlgmr.msra.gmra.mxu1 %vm712_vm3, %v4965_v17 }
 0x161   : > { %v1194_v27 = vpop.permute.xlu0 %1193  ;;  %v5849_v30 = vpop.permute.xlu2 %1325  ;;  %4980 = vmatpush.msk.msrb.mxu1 %vm696_vm1, %v5768_v42  ;;  %4975 = vmatmul.msk.f32.vlgmr.msra.gmra.mxu2 %vm712_vm3, %v840_v23 }
 0x162   : > { %4978 = vmatpush.msk.msra.mxu0 %vm696_vm1, %v5766_v41  ;;  %4986 = vmatmul.msk.f32.vlgmr.msra.gmra.mxu3 %vm712_vm3, %v4982_v31 }
 0x163   : > { %4989 = vmatpush.msk.msra.mxu1 %vm696_vm1, %v1075_v19  ;;  %4971 = vmatmul.msk.f32.vlgmr.msrb.gmra.mxu0 %vm712_vm3, %v4965_v17 }
 0x164   : > { %4987 = vmatpush.msk.msrb.mxu0 %vm696_vm1, %v1079_v32 }
 0x166   : > { %v1196_v33 = vpop.permute.xlu1 %1195 }
 0x167   : > { %v1204_v34 = vsel %vm1203_vm6, %v1194_v27, %v1196_v33  ;;  %v1205_v35 = vsel %vm1203_vm6, %v1196_v33, %v1198_v25  ;;  %v5987_v27 = vpop.f32.mrf.mxu2  ;;  %v5991_v33 = vpop.f32.mrf.mxu0 }
 0x168   : > { %4994 = vmatpush.msk.msrb.mxu3 %vm696_vm1, %v1205_v35  ;;  %4992 = vmatpush.msk.msra.mxu2 %vm696_vm1, %v1204_v34 }
 0x169   : > { %v5868_v36 = vpop.permute.xlu0 %1199  ;;  %v1452_v37 = vpop.permute.xlu2 %1451  ;;  %4984 = vmatmul.msk.f32.vlgmr.msrb.gmra.mxu2 %vm712_vm3, %v4982_v31  ;;  %4981 = vmatmul.msk.f32.vlgmr.msrb.gmra.mxu1 %vm712_vm3, %v840_v23 }
 0x16a   : > { %v1206_v39 = vsel %vm1203_vm6, %v1198_v25, %v5868_v36  ;;  %4995 = vmatmul.msk.f32.vlgmr.msrb.gmra.mxu3 %vm712_vm3, %v5873_v38 }
 0x16b   : > { %4979 = vmatmul.msk.f32.vlgmr.msra.gmra.mxu0 %vm712_vm3, %v840_v23 }
 0x16c   : > { %4996 = vmatpush.msk.msra.mxu0 %vm696_vm1, %v1206_v39 }
 0x16e   : > { %v1324_v40 = vpop.permute.xlu1 %1323 }
 0x16f   : > { %v1333_v41 = vsel %vm1331_vm7, %v1324_v40, %v5849_v30 }
 0x170   : > { %5003 = vmatpush.msk.msra.mxu3 %vm696_vm1, %v1333_v41 }
 0x171   : > { %v1322_v42 = vpop.permute.xlu0 %1321  ;;  %v1580_v43 = vpop.permute.xlu2 %1579  ;;  %4993 = vmatmul.msk.f32.vlgmr.msra.gmra.mxu2 %vm712_vm3, %v5873_v38  ;;  %4990 = vmatmul.msk.f32.vlgmr.msra.gmra.mxu1 %vm712_vm3, %v4982_v31 }
 0x172   : > { %v1332_v45 = vsel %vm1331_vm7, %v1322_v42, %v1324_v40  ;;  %5004 = vmatmul.msk.f32.vlgmr.msra.gmra.mxu3 %vm712_vm3, %v5890_v44 }
 0x173   : > { %5001 = vmatpush.msk.msrb.mxu2 %vm696_vm1, %v1332_v45  ;;  %4988 = vmatmul.msk.f32.vlgmr.msrb.gmra.mxu0 %vm712_vm3, %v4982_v31  ;;  %v5989_v31 = vpop.f32.mrf.mxu1 }
 0x176   : > { %v1450_v46 = vpop.permute.xlu1 %1449 }
 0x177   : > { %v1460_v47 = vsel %vm1459_vm8, %v1450_v46, %v1452_v37 }
 0x178   : > { %5010 = vmatpush.msk.msra.mxu2 %vm696_vm1, %v1460_v47 }
 0x179   : > { %v1454_v48 = vpop.permute.xlu0 %1453  ;;  %v1706_v49 = vpop.permute.xlu2 %1705  ;;  %5002 = vmatmul.msk.f32.vlgmr.msrb.gmra.mxu2 %vm712_vm3, %v5890_v44 }
 0x17a   : > { %v1461_v51 = vsel %vm1459_vm8, %v1452_v37, %v1454_v48 }
 0x17b   : > { %5012 = vmatpush.msk.msrb.mxu3 %vm696_vm1, %v1461_v51  ;;  %4997 = vmatmul.msk.f32.vlgmr.msra.gmra.mxu0 %vm712_vm3, %v5873_v38  ;;  %v5993_v35 = vpop.f32.mrf.mxu1 }
 0x17c   : > { %5013 = vmatmul.msk.f32.vlgmr.msrb.gmra.mxu3 %vm712_vm3, %v5905_v50 }
 0x17e   : > { %v1578_v52 = vpop.permute.xlu1 %1577 }
 0x17f   : > { %v1588_v53 = vsel %vm1587_vm9, %v1578_v52, %v1580_v43  ;;  %v6028_v52 = vld [vmem:[%s6707_s5] sm:$0xff] }
 0x180   : > { %5019 = vmatpush.msk.msrb.mxu2 %vm696_vm1, %v1588_v53 }
 0x181   : > { %v1582_v54 = vpop.permute.xlu0 %1581  ;;  %v1836_v55 = vpop.permute.xlu2 %1835  ;;  %5011 = vmatmul.msk.f32.vlgmr.msra.gmra.mxu2 %vm712_vm3, %v5905_v50 }
 0x182   : > { %v1589_v57 = vsel %vm1587_vm9, %v1580_v43, %v1582_v54 }
 0x183   : > { %5021 = vmatpush.msk.msra.mxu3 %vm696_vm1, %v1589_v57 }
 0x184   : > { %5022 = vmatmul.msk.f32.vlgmr.msra.gmra.mxu3 %vm712_vm3, %v5018_v56 }
 0x186   : > { %v1710_v58 = vpop.permute.xlu1 %1709 }
 0x189   : > { %v1328_v59 = vpop.permute.xlu2 %1327  ;;  %v1708_v60 = vpop.permute.xlu0 %1707  ;;  %5020 = vmatmul.msk.f32.vlgmr.msrb.gmra.mxu2 %vm712_vm3, %v5018_v56 }
 0x18a   : > { %v1334_v61 = vsel %vm1331_vm7, %v5849_v30, %v1328_v59  ;;  %v1716_v63 = vsel %vm1715_vm10, %v1706_v49, %v1708_v60  ;;  %v1717_v0 = vsel %vm1715_vm10, %v1708_v60, %v1710_v58 }
 0x18b   : > { %5005 = vmatpush.msk.msrb.mxu0 %vm696_vm1, %v1334_v61  ;;  %5028 = vmatpush.msk.msra.mxu2 %vm696_vm1, %v1716_v63 }
 0x18c   : > { %5030 = vmatpush.msk.msrb.mxu3 %vm696_vm1, %v1717_v0  ;;  %5006 = vmatmul.msk.f32.vlgmr.msrb.gmra.mxu0 %vm712_vm3, %v5890_v44 }
 0x18d   : > { %5031 = vmatmul.msk.f32.vlgmr.msrb.gmra.mxu3 %vm712_vm3, %v5027_v62 }
 0x18e   : > { %v1202_v1 = vpop.permute.xlu1 %1201 }
 0x18f   : > { %v1207_v2 = vsel %vm1203_vm6, %v5868_v36, %v1202_v1  ;;  %vm2115_vm6 = vcmask 355592  }
 0x190   : > { %4998 = vmatpush.msk.msrb.mxu1 %vm696_vm1, %v1207_v2 }
 0x191   : > { %v1838_v3 = vpop.permute.xlu0 %1837  ;;  %5029 = vmatmul.msk.f32.vlgmr.msra.gmra.mxu2 %vm712_vm3, %v5027_v62  ;;  %4999 = vmatmul.msk.f32.vlgmr.msrb.gmra.mxu1 %vm712_vm3, %v5873_v38  ;;  %v1458_v6 = vpop.permute.xlu2 %1457 }
 0x192   : > { %v1845_v5 = vsel %vm1843_vm11, %v1836_v55, %v1838_v3 }
 0x193   : > { %5039 = vmatpush.msk.msra.mxu3 %vm696_vm1, %v1845_v5 }
 0x195   : > { %5040 = vmatmul.msk.f32.vlgmr.msra.gmra.mxu3 %vm712_vm3, %v5036_v4 }
 0x196   : > { %v1834_v7 = vpop.permute.xlu1 %1833 }
 0x197   : > { %v1844_v8 = vsel %vm1843_vm11, %v1834_v7, %v1836_v55 }
 0x198   : > { %5037 = vmatpush.msk.msrb.mxu2 %vm696_vm1, %v1844_v8 }
 0x199   : > { %v1330_v9 = vpop.permute.xlu0 %1329  ;;  %5038 = vmatmul.msk.f32.vlgmr.msrb.gmra.mxu2 %vm712_vm3, %v5036_v4  ;;  %v1712_v12 = vpop.permute.xlu2 %1711 }
 0x19a   : > { %v1335_v10 = vsel %vm1331_vm7, %v1328_v59, %v1330_v9  ;;  %v1718_v17 = vsel %vm1715_vm10, %v1710_v58, %v1712_v12  ;;  %vm2155_vm7 = vcmask 445792  }
 0x19b   : > { %5007 = vmatpush.msk.msra.mxu1 %vm696_vm1, %v1335_v10 }
 0x19c   : > { %5008 = vmatmul.msk.f32.vlgmr.msra.gmra.mxu1 %vm712_vm3, %v5890_v44 }
 0x19e   : > { %v1456_v11 = vpop.permute.xlu1 %1455 }
 0x19f   : > { %v1462_v13 = vsel %vm1459_vm8, %v1454_v48, %v1456_v11  ;;  %v1463_v14 = vsel %vm1459_vm8, %v1456_v11, %v1458_v6  ;;  %v6008_v48 = vld [vmem:[%s6707_s5 + $0x10] sm:$0x1f]  ;;  %vm2199_vm8 = vcmask 535992  }
 0x1a0   : > { %5014 = vmatpush.msk.msra.mxu0 %vm696_vm1, %v1462_v13  ;;  %5016 = vmatpush.msk.msrb.mxu1 %vm696_vm1, %v1463_v14 }
 0x1a1   : > { %v1584_v15 = vpop.permute.xlu0 %1583  ;;  %5015 = vmatmul.msk.f32.vlgmr.msra.gmra.mxu0 %vm712_vm3, %v5905_v50  ;;  %v1842_v22 = vpop.permute.xlu2 %1841  ;;  %5045 = vmatpush.msk.msra.mxu2 %vm1971_vm12, %v6008_v48 }
 0x1a2   : > { %v1590_v16 = vsel %vm1587_vm9, %v1582_v54, %v1584_v15  ;;  %5047 = vmatpush.msk.msrb.mxu3 %vm1971_vm12, %v6008_v48 }
 0x1a3   : > { %5023 = vmatpush.msk.msrb.mxu0 %vm696_vm1, %v1590_v16 }
 0x1a4   : > { %5017 = vmatmul.msk.f32.vlgmr.msrb.gmra.mxu1 %vm712_vm3, %v5905_v50  ;;  %v6017_v50 = vld [vmem:[%s6707_s5 + $0x8] sm:$0xff] }
 0x1a5   : > { %5032 = vmatpush.msk.msra.mxu0 %vm696_vm1, %v1718_v17  ;;  %1989 = vmatpush.msra.mxu2 %v6017_v50 }
 0x1a6   : > { %v1586_v18 = vpop.permute.xlu1 %1585  ;;  %2025 = vmatpush.msrb.mxu3 %v6017_v50 }
 0x1a7   : > { %v1591_v19 = vsel %vm1587_vm9, %v1584_v15, %v1586_v18  ;;  %1990 = vmatpush.msra.mxu2 %v6028_v52  ;;  %vm2239_vm9 = vcmask 626192  }
 0x1a8   : > { %5025 = vmatpush.msk.msra.mxu1 %vm696_vm1, %v1591_v19  ;;  %2026 = vmatpush.msrb.mxu3 %v6028_v52 }
 0x1a9   : > { %v1714_v20 = vpop.permute.xlu0 %1713  ;;  %5024 = vmatmul.msk.f32.vlgmr.msrb.gmra.mxu0 %vm712_vm3, %v5018_v56  ;;  %5053 = vmatpush.msk.msrb.mxu2 %vm1971_vm12, %v6008_v48 }
 0x1aa   : > { %v1719_v21 = vsel %vm1715_vm10, %v1712_v12, %v1714_v20  ;;  %5055 = vmatpush.msk.msra.mxu3 %vm1971_vm12, %v6008_v48  ;;  %vm2279_vm10 = vcmask 716392  }
 0x1ab   : > { %5034 = vmatpush.msk.msrb.mxu1 %vm696_vm1, %v1719_v21  ;;  %2145 = vmatpush.msrb.mxu2 %v6017_v50 }
 0x1ac   : > { %5026 = vmatmul.msk.f32.vlgmr.msra.gmra.mxu1 %vm712_vm3, %v5018_v56  ;;  %2189 = vmatpush.msra.mxu3 %v6017_v50 }
 0x1ad   : > { %2146 = vmatpush.msrb.mxu2 %v6028_v52 }
 0x1ae   : > { %v1840_v23 = vpop.permute.xlu1 %1839  ;;  %2190 = vmatpush.msra.mxu3 %v6028_v52 }
 0x1af   : > { %v1846_v24 = vsel %vm1843_vm11, %v1838_v3, %v1840_v23  ;;  %v1847_v25 = vsel %vm1843_vm11, %v1840_v23, %v1842_v22  ;;  %vm2315_vm11 = vcmask 806592  }
 0x1b0   : > { %5041 = vmatpush.msk.msrb.mxu0 %vm696_vm1, %v1846_v24  ;;  %5043 = vmatpush.msk.msra.mxu1 %vm696_vm1, %v1847_v25 }
 0x1b1   : > { %5033 = vmatmul.msk.f32.vlgmr.msra.gmra.mxu0 %vm712_vm3, %v5027_v62 }
 0x1b2   : > { %5049 = vmatpush.msk.msra.mxu0 %vm1971_vm12, %v6008_v48 }
 0x1b4   : > { %5035 = vmatmul.msk.f32.vlgmr.msrb.gmra.mxu1 %vm712_vm3, %v5027_v62  ;;  %2065 = vmatpush.msra.mxu0 %v6017_v50 }
 0x1b5   : > { %5051 = vmatpush.msk.msrb.mxu1 %vm1971_vm12, %v6008_v48 }
 0x1b6   : > { %2066 = vmatpush.msra.mxu0 %v6028_v52 }
 0x1b7   : > { %2105 = vmatpush.msrb.mxu1 %v6017_v50 }
 0x1b9   : > { %5042 = vmatmul.msk.f32.vlgmr.msrb.gmra.mxu0 %vm712_vm3, %v5036_v4  ;;  %2106 = vmatpush.msrb.mxu1 %v6028_v52 }
 0x1ba   : > { %5057 = vmatpush.msk.msrb.mxu0 %vm1971_vm12, %v6008_v48 }
 0x1bc   : > { %5044 = vmatmul.msk.f32.vlgmr.msra.gmra.mxu1 %vm712_vm3, %v5036_v4  ;;  %2229 = vmatpush.msrb.mxu0 %v6017_v50 }
 0x1bd   : > { %5059 = vmatpush.msk.msra.mxu1 %vm1971_vm12, %v6008_v48 }
 0x1be   : > { %2230 = vmatpush.msrb.mxu0 %v6028_v52 }
 0x1bf   : > { %2269 = vmatpush.msra.mxu1 %v6017_v50 }
 0x1c1   : > { %2270 = vmatpush.msra.mxu1 %v6028_v52 }
 0x1d4   : > { %v914_v28 = vpop.f32.mrf.mxu3 }
 0x1dc   : > { %v894_v29 = vpop.f32.mrf.mxu2  ;;  %v1012_v30 = vpop.f32.mrf.mxu3 }
 0x1dd   : > { %v5997_v39 = vpop.f32.mrf.mxu1  ;;  %v1013_v53 = vadd.f32 %v1012_v30, %v914_v28 }
 0x1e0   : > { %v5995_v38 = vpop.f32.mrf.mxu0 }
 0x1e4   : > { %v992_v32 = vpop.f32.mrf.mxu2 }
 0x1e5   : > { %v1128_v34 = vpop.f32.mrf.mxu3  ;;  %v993_v58 = vadd.f32 %v992_v32, %v894_v29 }
 0x1e6   : > { %v6001_v45 = vpop.f32.mrf.mxu1  ;;  %v1172_v56 = vadd.f32 %v1128_v34, %v1013_v53 }
 0x1e7   : > { %v1053_v22 = vadd.f32 %v6001_v45, %v5997_v39 }
 0x1e8   : > { %v5999_v42 = vpop.f32.mrf.mxu0 }
 0x1e9   : > { %v1033_v21 = vadd.f32 %v5999_v42, %v5995_v38 }
 0x1ec   : > { %v1108_v36 = vpop.f32.mrf.mxu2 }
 0x1ed   : > { %v1256_v37 = vpop.f32.mrf.mxu3  ;;  %v1171_v61 = vadd.f32 %v1108_v36, %v993_v58 }
 0x1ee   : > { %v1168_v51 = vpop.f32.mrf.mxu1  ;;  %v1300_v59 = vadd.f32 %v1256_v37, %v1172_v56 }
 0x1ef   : > { %v1174_v25 = vadd.f32 %v1168_v51, %v1053_v22 }
 0x1f0   : > { %v6003_v46 = vpop.f32.mrf.mxu0 }
 0x1f1   : > { %v1173_v24 = vadd.f32 %v6003_v46, %v1033_v21  ;;  %v2358_v21 = vld [vmem:[%s6706_s4] sm:$0xf] }
 0x1f4   : > { %v1236_v40 = vpop.f32.mrf.mxu2 }
 0x1f5   : > { %v1384_v41 = vpop.f32.mrf.mxu3  ;;  %v1299_v63 = vadd.f32 %v1236_v40, %v1171_v61 }
 0x1f6   : > { %v1428_v62 = vadd.f32 %v1384_v41, %v1300_v59 }
 0x1f8   : > { %v1276_v55 = vpop.f32.mrf.mxu0 }
 0x1f9   : > { %v1301_v36 = vadd.f32 %v1276_v55, %v1173_v24 }
 0x1fc   : > { %v1364_v43 = vpop.f32.mrf.mxu2 }
 0x1fd   : > { %v1427_v2 = vadd.f32 %v1364_v43, %v1299_v63 }
 0x1ff   : > { %v1512_v44 = vpop.f32.mrf.mxu3 }
 0x200   : > { %v1556_v0 = vadd.f32 %v1512_v44, %v1428_v62 }
 0x204   : > { %v1492_v47 = vpop.f32.mrf.mxu2 }
 0x205   : > { %v1555_v6 = vadd.f32 %v1492_v47, %v1427_v2 }
 0x207   : > { %v1640_v49 = vpop.f32.mrf.mxu3 }
 0x208   : > { %v1684_v3 = vadd.f32 %v1640_v49, %v1556_v0 }
 0x209   : > { %v1404_v4 = vpop.f32.mrf.mxu0 }
 0x20a   : > { %v1429_v38 = vadd.f32 %v1404_v4, %v1301_v36 }
 0x20c   : > { %v1620_v54 = vpop.f32.mrf.mxu2 }
 0x20d   : > { %v1683_v9 = vadd.f32 %v1620_v54, %v1555_v6  ;;  %v2158_v6 = vld [vmem:[%s6706_s4] sm:$0xf] }
 0x20e   : > { %v1296_v60 = vpop.f32.mrf.mxu1 }
 0x20f   : > { %v1302_v28 = vadd.f32 %v1296_v60, %v1174_v25 }
 0x210   : > { %v1768_v57 = vpop.f32.mrf.mxu3 }
 0x211   : > { %v1812_v7 = vadd.f32 %v1768_v57, %v1684_v3  ;;  %v2038_v3 = vld [vmem:[%s6706_s4] sm:$0xf] }
 0x214   : > { %v1748_v1 = vpop.f32.mrf.mxu2 }
 0x215   : > { %v1811_v11 = vadd.f32 %v1748_v1, %v1683_v9  ;;  %v2078_v9 = vld [vmem:[%s6706_s4] sm:$0xf] }
 0x218   : > { %v1896_v5 = vpop.f32.mrf.mxu3 }
 0x219   : > { %v1424_v8 = vpop.f32.mrf.mxu1  ;;  %v1940_v10 = vadd.f32 %v1896_v5, %v1812_v7 }
 0x21a   : > { %v1430_v37 = vadd.f32 %v1424_v8, %v1302_v28  ;;  %v2282_v8 = vld [vmem:[%s6706_s4] sm:$0xf] }
 0x21b   : > { %v1947_v13 = vrot.slane %v1940_v10, 4  ;;  %v1961_v10 = vld [vmem:[%s6706_s4] sm:$0xf] }
 0x21c   : > { %v1876_v12 = vpop.f32.mrf.mxu2 }
 0x21d   : > { %v1939_v14 = vadd.f32 %v1876_v12, %v1811_v11  ;;  %v2202_v11 = vld [vmem:[%s6706_s4] sm:$0xf] }
 0x21e   : > { %v1532_v15 = vpop.f32.mrf.mxu0  ;;  %v2318_v12 = vld [vmem:[%s6706_s4] sm:$0xf] }
 0x21f   : > { %v1949_v16 = vsel %vm696_vm1, %v1939_v14, %v1947_v13  ;;  %v1557_v40 = vadd.f32 %v1532_v15, %v1429_v38  ;;  %v1998_v13 = vld [vmem:[%s6706_s4] sm:$0xf] }
 0x220   : > { %1953 = vst [vmem:[#allocation3] sm:$0xff] %v1949_v16  ;;  %v2118_v14 = vld [vmem:[%s6706_s4] sm:$0xf] }
 0x221   : > { %v1552_v17 = vpop.f32.mrf.mxu1 }
 0x222   : > { %v1558_v39 = vadd.f32 %v1552_v17, %v1430_v37  ;;  %v2242_v17 = vld [vmem:[%s6706_s4] sm:$0xf] }
 0x226   : > { %v1660_v18 = vpop.f32.mrf.mxu0 }
 0x227   : > { %v1997_v19 = vld [vmem:[#allocation3] sm:$0xf]  ;;  %v1685_v42 = vadd.f32 %v1660_v18, %v1557_v40  ;;  %v2077_v44 = vld [vmem:[#allocation3 + $0x4] sm:$0xf] }
 0x228   : > { %2005 = vst [vmem:[#allocation1] ss:$2 sm:$0xff] %v1997_v19  ;;  %v1960_v23 = vld [vmem:[#allocation3] sm:$0xf]  ;;  %v2117_v56 = vld [vmem:[#allocation3 + $0x4] sm:$0xf] }
 0x229   : > { %v1680_v20 = vpop.f32.mrf.mxu1  ;;  %5046 = vmatmul.msk.f32.vlgmr.msra.gmra.mxu2 %vm1967_vm13, %v1960_v23  ;;  %v2037_v30 = vld [vmem:[#allocation3] sm:$0xf] }
 0x22a   : > { %5061 = vmatpush.msk.msra.mxu2 %vm1971_vm12, %v6008_v48  ;;  %v1686_v41 = vadd.f32 %v1680_v20, %v1558_v39 }
 0x22c   : > { %2305 = vmatpush.msra.mxu2 %v6017_v50 }
 0x22e   : > { %v1788_v29 = vpop.f32.mrf.mxu0  ;;  %2306 = vmatpush.msra.mxu2 %v6028_v52 }
 0x22f   : > { %v2006_v34 = vld.sshfl [vmem:[#allocation1] sm:$0xff pattern:$0x75316420]  ;;  %v1813_v49 = vadd.f32 %v1788_v29, %v1685_v42 }
 0x230   : > { %2007 = vrot.lane.b32.xlu0 %v2006_v34, %s6735_s24  ;;  %2045 = vst [vmem:[#allocation1] ss:$2 sm:$0xff] %v2037_v30 }
 0x231   : > { %v1808_v32 = vpop.f32.mrf.mxu1 }
 0x232   : > { %v1814_v43 = vadd.f32 %v1808_v32, %v1686_v41 }
 0x236   : > { %v1916_v45 = vpop.f32.mrf.mxu0 }
 0x237   : > { %v2046_v47 = vld.sshfl [vmem:[#allocation1] sm:$0xff pattern:$0x75316420]  ;;  %v1941_v53 = vadd.f32 %v1916_v45, %v1813_v49 }
 0x238   : > { %2047 = vrot.lane.b32.xlu1 %v2046_v47, %s6737_s16  ;;  %2085 = vst [vmem:[#allocation1] ss:$2 sm:$0xff] %v2077_v44 }
 0x239   : > { %v1936_v46 = vpop.f32.mrf.mxu1 }
 0x23a   : > { %v1942_v51 = vadd.f32 %v1936_v46, %v1814_v43 }
 0x23c   : > { %v1948_v54 = vrot.slane %v1942_v51, 4 }
 0x23e   : > { %v1950_v55 = vsel %vm696_vm1, %v1941_v53, %v1948_v54 }
 0x23f   : > { %1956 = vst.msk [vmem:[#allocation3 + $0x8] sm:$0xff] %vm1955_vm15, %v1950_v55  ;;  %v2086_v57 = vld.sshfl [vmem:[#allocation1] sm:$0xff pattern:$0x75316420]  ;;  %vm2406_vm15 = vcmask 142424  }
 0x240   : > { %2125 = vst [vmem:[#allocation1] ss:$2 sm:$0xff] %v2117_v56 }
 0x246   : > { %v2157_v58 = vld [vmem:[#allocation3 + $0x4] sm:$0xff]  ;;  %v2317_v1 = vld [vmem:[#allocation3 + $0xc] sm:$0xf] }
 0x247   : > { %v2126_v59 = vld.sshfl [vmem:[#allocation1] sm:$0xff pattern:$0x75316420]  ;;  %v2357_v4 = vld [vmem:[#allocation3 + $0xc] sm:$0xf] }
 0x248   : > { %2127 = vrot.lane.b32.xlu2 %v2126_v59, %s6736_s15  ;;  %2165 = vst [vmem:[#allocation1] ss:$2 sm:$0xff] %v2157_v58  ;;  %v2201_v60 = vld [vmem:[#allocation3 + $0x8] sm:$0xf]  ;;  %v2281_v20 = vld [vmem:[#allocation3 + $0xc] sm:$0xf] }
 0x249   : > { %v2241_v63 = vld [vmem:[#allocation3 + $0x8] sm:$0xf]  ;;  %s5516_s15 = smov 99  }
 0x24f   : > { %v2167_v61 = vld.sshfl [vmem:[#allocation1 + $0x8] sm:$0xff pattern:$0x75316420]  ;;  %v2166_v62 = vld.sshfl [vmem:[#allocation1] sm:$0xff pattern:$0x75316420] }
 0x250   : > { %2087 = vrot.lane.b32.xlu2 %v2086_v57, %s6734_s17  ;;  %2170 = vrot.lane.b32.xlu1 %v2167_v61, %s6741_s1  ;;  %2209 = vst [vmem:[#allocation1] ss:$2 sm:$0xff] %v2201_v60  ;;  %s5511_s17 = smov 44  }
 0x251   : > { %2168 = vrot.lane.b32.xlu0 %v2166_v62, %s6741_s1  ;;  %s6751_s1 = smov 116  }
 0x257   : > { %v2210_v0 = vld.sshfl [vmem:[#allocation1] sm:$0xff pattern:$0x75316420] }
 0x258   : > { %2249 = vst [vmem:[#allocation1] ss:$2 sm:$0xff] %v2241_v63 }
 0x259   : > { %2211 = vrot.lane.b32.xlu0 %v2210_v0, %s6738_s20  ;;  %s5517_s20 = smov 110  }
 0x25f   : > { %v2250_v2 = vld.sshfl [vmem:[#allocation1] sm:$0xff pattern:$0x75316420] }
 0x260   : > { %2251 = vrot.lane.b32.xlu2 %v2250_v2, %s6743_s21  ;;  %2325 = vst [vmem:[#allocation1] ss:$2 sm:$0xff] %v2317_v1  ;;  %s6794_s21 = smov 122  }
 0x267   : > { %v2326_v5 = vld.sshfl [vmem:[#allocation1] sm:$0xff pattern:$0x75316420] }
 0x268   : > { %2041 = vperm.xlu2 %5352, %v2038_v3   ;;  %2327 = vrot.lane.b32.xlu1 %v2326_v5, %s6735_s24  ;;  %2365 = vst [vmem:[#allocation1] ss:$2 sm:$0xff] %v2357_v4  ;;  %s5514_s24 = smov 55  }
 0x26f   : > { %v2366_v7 = vld.sshfl [vmem:[#allocation1] sm:$0xff pattern:$0x75316420] }
 0x270   : > { %2161 = vperm.xlu2 %5352, %v2158_v6   ;;  %2367 = vrot.lane.b32.xlu0 %v2366_v7, %s6737_s16  ;;  %s5515_s16 = smov 66  }
 0x271   : > { %2001 = vperm.xlu1 %5351, %v1998_v13  }
 0x278   : > { %2285 = vperm.xlu2 %5352, %v2282_v8   ;;  %2081 = vperm.xlu0 %5350, %v2078_v9  }
 0x279   : > { %2121 = vperm.xlu1 %5351, %v2118_v14  }
 0x280   : > { %1964 = vperm.xlu2 %5352, %v1961_v10   ;;  %2205 = vperm.xlu0 %5350, %v2202_v11  }
 0x281   : > { %2245 = vperm.xlu1 %5351, %v2242_v17  }
 0x288   : > { %2321 = vperm.xlu0 %5350, %v2318_v12  }
 0x289   : > { %2361 = vperm.xlu1 %5351, %v2358_v21  }
 0x2a2   : > { %v2008_v15 = vpop.permute.xlu0 %2007  ;;  %v2128_v16 = vpop.permute.xlu2 %2127 }
 0x2a3   : > { %5048 = vmatmul.msk.f32.vlgmr.msrb.gmra.mxu3 %vm1967_vm13, %v2008_v15  ;;  %5054 = vmatmul.msk.f32.vlgmr.msrb.gmra.mxu2 %vm1967_vm13, %v2128_v16 }
 0x2a4   : > { %5063 = vmatpush.msk.msrb.mxu3 %vm1971_vm12, %v6008_v48 }
 0x2a6   : > { %2345 = vmatpush.msrb.mxu3 %v6017_v50 }
 0x2a8   : > { %2346 = vmatpush.msrb.mxu3 %v6028_v52 }
 0x2aa   : > { %v2048_v18 = vpop.permute.xlu1 %2047  ;;  %v2088_v19 = vpop.permute.xlu2 %2087 }
 0x2ab   : > { %5050 = vmatmul.msk.f32.vlgmr.msra.gmra.mxu0 %vm1967_vm13, %v2048_v18  ;;  %5052 = vmatmul.msk.f32.vlgmr.msrb.gmra.mxu1 %vm1967_vm13, %v2088_v19 }
 0x2ac   : > { %5062 = vmatmul.msk.f32.vlgmr.msra.gmra.mxu2 %vm1967_vm13, %v2281_v20  ;;  %5065 = vmatpush.msk.msra.mxu0 %vm1971_vm12, %v6008_v48  ;;  %vm2355_vm12 = vcmask 896792  }
 0x2ae   : > { %2385 = vmatpush.msra.mxu0 %v6017_v50 }
 0x2b0   : > { %2386 = vmatpush.msra.mxu0 %v6028_v52  ;;  %v1992_v52 = vpop.f32.mrf.mxu2 }
 0x2ba   : > { %v2252_v22 = vpop.permute.xlu2 %2251 }
 0x2bb   : > { %5060 = vmatmul.msk.f32.vlgmr.msra.gmra.mxu1 %vm1967_vm13, %v2252_v22 }
 0x2c2   : > { %v2171_v23 = vpop.permute.xlu1 %2170  ;;  %v2042_v24 = vpop.permute.xlu2 %2041 }
 0x2c3   : > { %v2169_v25 = vpop.permute.xlu0 %2168 }
 0x2c4   : > { %v2172_v28 = vsel %vm586_vm0, %v2169_v25, %v2171_v23  ;;  %vm2035_vm0 = vcmask 175192  }
 0x2c5   : > { %5056 = vmatmul.msk.f32.vlgmr.msra.gmra.mxu3 %vm1967_vm13, %v2172_v28 }
 0x2ca   : > { %v2162_v48 = vpop.permute.xlu2 %2161 }
 0x2cb   : > { %v2212_v29 = vpop.permute.xlu0 %2211 }
 0x2cc   : > { %5058 = vmatmul.msk.f32.vlgmr.msrb.gmra.mxu0 %vm1967_vm13, %v2212_v29 }
 0x2d2   : > { %v2286_v50 = vpop.permute.xlu2 %2285 }
 0x2da   : > { %v1965_v30 = vpop.permute.xlu2 %1964  ;;  %v2328_v32 = vpop.permute.xlu1 %2327 }
 0x2db   : > { %v1993_v34 = vadd.f32 %v1992_v52, %v1965_v30  ;;  %5064 = vmatmul.msk.f32.vlgmr.msrb.gmra.mxu3 %vm1967_vm13, %v2328_v32 }
 0x2dd   : > { %1996 = vst.msk [vmem:[#allocation4] sm:$0xf] %vm1995_vm4, %v1993_v34  ;;  %vm2402_vm4 = vcmask 52224  }
 0x2e2   : > { %v2368_v36 = vpop.permute.xlu0 %2367 }
 0x2e3   : > { %5066 = vmatmul.msk.f32.vlgmr.msra.gmra.mxu0 %vm1967_vm13, %v2368_v36  ;;  %v2002_v37 = vpop.permute.xlu1 %2001  ;;  %vm2395_vm13 = vcmask 986992  }
 0x2ea   : > { %v2082_v40 = vpop.permute.xlu0 %2081 }
 0x2eb   : > { %v2122_v46 = vpop.permute.xlu1 %2121 }
 0x2f2   : > { %v2206_v57 = vpop.permute.xlu0 %2205 }
 0x2f3   : > { %v2246_v53 = vpop.permute.xlu1 %2245 }
 0x2fa   : > { %v2322_v61 = vpop.permute.xlu0 %2321 }
 0x2fb   : > { %v2362_v0 = vpop.permute.xlu1 %2361 }
 0x326   : > { %v2028_v38 = vpop.f32.mrf.mxu3  ;;  %v2148_v39 = vpop.f32.mrf.mxu2 }
 0x327   : > { %v2029_v41 = vadd.f32 %v2028_v38, %v2002_v37  ;;  %v2149_v47 = vadd.f32 %v2148_v39, %v2122_v46 }
 0x328   : > { %v2068_v42 = vpop.f32.mrf.mxu0  ;;  %v2108_v43 = vpop.f32.mrf.mxu1 }
 0x329   : > { %v2069_v44 = vadd.f32 %v2068_v42, %v2042_v24  ;;  %v2109_v45 = vadd.f32 %v2108_v43, %v2082_v40  ;;  %2032 = vrot.lane.b32.xlu0 %v2029_v41, %s5508_s14  ;;  %s6756_s14 = smov 122  }
 0x32b   : > { %2072 = vrot.lane.b32.xlu1 %v2069_v44, %s5509_s28  ;;  %2112 = vrot.lane.b32.xlu2 %v2109_v45, %s5510_s19  ;;  %s6747_s28 = smov 120   ;;  %s6759_s19 = smov 123  }
 0x32f   : > { %v2308_v49 = vpop.f32.mrf.mxu2 }
 0x330   : > { %v2309_v51 = vadd.f32 %v2308_v49, %v2286_v50 }
 0x331   : > { %2152 = vrot.lane.b32.xlu0 %v2149_v47, %s5511_s17  ;;  %s6754_s17 = smov 124  }
 0x333   : > { %2312 = vrot.lane.b32.xlu1 %v2309_v51, %s6740_s23  ;;  %s6758_s23 = smov 115  }
 0x338   : > { %v2272_v54 = vpop.f32.mrf.mxu1 }
 0x339   : > { %v2273_v55 = vadd.f32 %v2272_v54, %v2246_v53 }
 0x33b   : > { %2276 = vrot.lane.b32.xlu0 %v2273_v55, %s5513_s18  ;;  %s6763_s18 = smov 119  }
 0x348   : > { %v2192_v56 = vpop.f32.mrf.mxu3 }
 0x349   : > { %v2193_v58 = vadd.f32 %v2192_v56, %v2162_v48  ;;  %v2232_v59 = vpop.f32.mrf.mxu0 }
 0x34a   : > { %v2233_v60 = vadd.f32 %v2232_v59, %v2206_v57 }
 0x34b   : > { %2196 = vrot.lane.b32.xlu1 %v2193_v58, %s5514_s24  ;;  %s6761_s24 = smov 118  }
 0x34c   : > { %2236 = vrot.lane.b32.xlu2 %v2233_v60, %s5515_s16  ;;  %s6749_s16 = smov 114  }
 0x35e   : > { %v2348_v62 = vpop.f32.mrf.mxu3 }
 0x35f   : > { %v2349_v63 = vadd.f32 %v2348_v62, %v2322_v61  ;;  %v5518_v62 = vmov 0.0  }
 0x360   : > { %v2388_v1 = vpop.f32.mrf.mxu0 }
 0x361   : > { %v2389_v2 = vadd.f32 %v2388_v1, %v2362_v0  ;;  %2352 = vrot.lane.b32.xlu2 %v2349_v63, %s5516_s15  ;;  %s5529_s15 = smov 9  }
 0x363   : > { %2392 = vrot.lane.b32.xlu0 %v2389_v2, %s5517_s20  ;;  %s6791_s20 = smov 120  }
 0x385   : > { %v2113_v5 = vpop.permute.xlu2 %2112 }
 0x39b   : > { %v2033_v3 = vpop.permute.xlu0 %2032 }
 0x39c   : > { %2036 = vst.msk [vmem:[#allocation4] sm:$0xf] %vm2035_vm0, %v2033_v3  ;;  %vm2421_vm0 = vcmask 413024  }
 0x39d   : > { %v2073_v4 = vpop.permute.xlu1 %2072 }
 0x39e   : > { %2076 = vst.msk [vmem:[#allocation4] sm:$0xf] %vm2075_vm5, %v2073_v4  ;;  %vm2443_vm5 = vcmask 167024  }
 0x39f   : > { %2116 = vst.msk [vmem:[#allocation4] sm:$0xf] %vm2115_vm6, %v2113_v5  ;;  %vm2411_vm6 = vcmask 232624  }
 0x3a3   : > { %v2153_v6 = vpop.permute.xlu0 %2152 }
 0x3a4   : > { %2156 = vst.msk [vmem:[#allocation4] sm:$0xf] %vm2155_vm7, %v2153_v6  ;;  %vm2458_vm7 = vcmask 437624  }
 0x3a5   : > { %v2313_v7 = vpop.permute.xlu1 %2312 }
 0x3a6   : > { %v2237_v8 = vpop.permute.xlu2 %2236 }
 0x3ad   : > { %v2277_v10 = vpop.permute.xlu0 %2276 }
 0x3bb   : > { %v2353_v11 = vpop.permute.xlu2 %2352 }
 0x3bd   : > { %v2197_v9 = vpop.permute.xlu1 %2196 }
 0x3be   : > { %2200 = vst.msk [vmem:[#allocation4] sm:$0xf] %vm2199_vm8, %v2197_v9  ;;  %vm2416_vm8 = vcmask 322824  }
 0x3bf   : > { %2240 = vst.msk [vmem:[#allocation4] sm:$0xf] %vm2239_vm9, %v2237_v8  ;;  %vm2448_vm9 = vcmask 257224  }
 0x3c0   : > { %2280 = vst.msk [vmem:[#allocation4] sm:$0xf] %vm2279_vm10, %v2277_v10  ;;  %vm2453_vm10 = vcmask 347424  }
 0x3c1   : > { %2316 = vst.msk [vmem:[#allocation4] sm:$0xf] %vm2315_vm11, %v2313_v7  ;;  %vm2431_vm11 = vcmask 593424  }
 0x3c2   : > { %2356 = vst.msk [vmem:[#allocation4] sm:$0xf] %vm2355_vm12, %v2353_v11  ;;  %vm2426_vm12 = vcmask 503224  }
 0x3d5   : > { %v2393_v12 = vpop.permute.xlu0 %2392 }
 0x3d6   : > { %2396 = vst.msk [vmem:[#allocation4] sm:$0xf] %vm2395_vm13, %v2393_v12  ;;  %vm2463_vm13 = vcmask 527824  }
 0x3dd   : > { %v2438_v13 = vld [vmem:[#allocation4] sm:$0xf] }
 0x3de   : > { %v2401_v14 = vld [vmem:[#allocation4] sm:$0xf]  ;;  %v2440_v15 = vsel %vm2439_vm14, %v2438_v13, -inf  ;;  %v2444_v20 = vsel %vm2443_vm5, %v2438_v13, -inf  ;;  %v2449_v25 = vsel %vm2448_vm9, %v2438_v13, -inf  ;;  %v2454_v28 = vsel %vm2453_vm10, %v2438_v13, -inf }
 0x3df   : > { %v2407_v16 = vsel %vm2406_vm15, %v2401_v14, -inf  ;;  %v2403_v17 = vsel %vm2402_vm4, %v2401_v14, -inf  ;;  %2441 = vmax.xlane.f32.xlu0 %v2440_v15  ;;  %v6128_v18 = vld [vmem:[#allocation4] sm:$0xf]  ;;  %v2412_v21 = vsel %vm2411_vm6, %v2401_v14, -inf  ;;  %v2417_v29 = vsel %vm2416_vm8, %v2401_v14, -inf }
 0x3e0   : > { %2408 = vmax.xlane.f32.xlu2 %v2407_v16  ;;  %2404 = vmax.xlane.f32.xlu1 %v2403_v17  ;;  %v2479_v19 = vsel %vm2421_vm0, %v6128_v18, -inf  ;;  %v2508_v22 = vld [vmem:[#allocation4] sm:$0xf]  ;;  %v2476_v24 = vsel %vm2416_vm8, %v6128_v18, -inf  ;;  %v2487_v50 = vsel %vm2431_vm11, %v6128_v18, -inf  ;;  %v2483_v52 = vsel %vm2426_vm12, %v6128_v18, -inf }
 0x3e1   : > { %v2512_v23 = vsel %vm2458_vm7, %v2508_v22, -inf  ;;  %v2509_v48 = vsel %vm2453_vm10, %v2508_v22, -inf  ;;  %v2516_v30 = vsel %vm2463_vm13, %v2508_v22, -inf  ;;  %v2427_v32 = vsel %vm2426_vm12, %v2401_v14, -inf }
 0x3e2   : > { %v2422_v34 = vsel %vm2421_vm0, %v2401_v14, -inf  ;;  %v2459_v36 = vsel %vm2458_vm7, %v2438_v13, -inf  ;;  %vm2524_vm14 = vcmask 708224   ;;  %vm2468_vm15 = vcmask 618024  }
 0x3e3   : > { %vm2491_vm4 = vcmask 683624   ;;  %v2525_v37 = vsel %vm2524_vm14, %v2508_v22, -inf  ;;  %v2520_v38 = vsel %vm2468_vm15, %v2508_v22, -inf  ;;  %v2469_v40 = vsel %vm2468_vm15, %v2438_v13, -inf }
 0x3e4   : > { %v2492_v39 = vsel %vm2491_vm4, %v6128_v18, -inf  ;;  %v2464_v41 = vsel %vm2463_vm13, %v2438_v13, -inf  ;;  %v2432_v42 = vsel %vm2431_vm11, %v2401_v14, -inf  ;;  %vm2534_vm0 = vcmask 888624  }
 0x3e5   : > { %vm2496_vm5 = vcmask 773824   ;;  %vm2529_vm6 = vcmask 798424   ;;  %v2535_v43 = vsel %vm2534_vm0, %v2508_v22, -inf  ;;  %vm2501_vm7 = vcmask 864024  }
 0x3e6   : > { %v2497_v44 = vsel %vm2496_vm5, %v6128_v18, -inf  ;;  %v2530_v45 = vsel %vm2529_vm6, %v2508_v22, -inf  ;;  %v2502_v46 = vsel %vm2501_vm7, %v6128_v18, -inf  ;;  %vm2397_vm8 = vcmask 125952  }
 0x3e7   : > { %2480 = vmax.xlane.f32.xlu0 %v2479_v19  ;;  %2398 = vst.msk [vmem:[#allocation5] sm:$0xf] %vm2397_vm8, %v5518_v62  ;;  %vm2436_vm9 = vcmask 44072   ;;  %vm2473_vm10 = vcmask 52272   ;;  %vm2506_vm11 = vcmask 76872   ;;  %vm2539_vm12 = vcmask 85072  }
 0x3e8   : > { %2445 = vmax.xlane.f32.xlu2 %v2444_v20  ;;  %2413 = vmax.xlane.f32.xlu1 %v2412_v21  ;;  %2399 = vst.msk [vmem:[#allocation6] sm:$0xf] %vm2397_vm8, %v5518_v62  ;;  %vm2820_vm13 = vcmask 52264   ;;  %vm3095_vm14 = vcmask 85064   ;;  %vm4211_vm15 = vcmask 1041408   ;;  %vm4208_vm4 = vcmask 15360  }
 0x3e9   : > { %2400 = vst.msk [vmem:[#allocation7] sm:$0xf] %vm2397_vm8, %v5518_v62  ;;  %vm4269_vm0 = vcmask 388288   ;;  %vm4276_vm5 = vcmask 585088   ;;  %vm4283_vm6 = vcmask 781888   ;;  %vm4290_vm7 = vcmask 978688  }
 0x3ea   : > { %vm4296_vm8 = vcmask 982016  }
 0x3ef   : > { %2513 = vmax.xlane.f32.xlu0 %v2512_v23 }
 0x3f0   : > { %2477 = vmax.xlane.f32.xlu2 %v2476_v24  ;;  %2450 = vmax.xlane.f32.xlu1 %v2449_v25 }
 0x3f7   : > { %2455 = vmax.xlane.f32.xlu0 %v2454_v28 }
 0x3f8   : > { %2510 = vmax.xlane.f32.xlu2 %v2509_v48  ;;  %2418 = vmax.xlane.f32.xlu1 %v2417_v29 }
 0x3ff   : > { %2488 = vmax.xlane.f32.xlu0 %v2487_v50 }
 0x400   : > { %2484 = vmax.xlane.f32.xlu2 %v2483_v52  ;;  %2517 = vmax.xlane.f32.xlu1 %v2516_v30 }
 0x407   : > { %2428 = vmax.xlane.f32.xlu0 %v2427_v32 }
 0x408   : > { %2423 = vmax.xlane.f32.xlu2 %v2422_v34  ;;  %2460 = vmax.xlane.f32.xlu1 %v2459_v36 }
 0x40f   : > { %2526 = vmax.xlane.f32.xlu0 %v2525_v37 }
 0x410   : > { %2521 = vmax.xlane.f32.xlu2 %v2520_v38  ;;  %2493 = vmax.xlane.f32.xlu1 %v2492_v39 }
 0x417   : > { %2470 = vmax.xlane.f32.xlu0 %v2469_v40 }
 0x418   : > { %2465 = vmax.xlane.f32.xlu2 %v2464_v41  ;;  %2433 = vmax.xlane.f32.xlu1 %v2432_v42 }
 0x41f   : > { %2536 = vmax.xlane.f32.xlu0 %v2535_v43  ;;  %v2808_v43 = vld [vmem:[%s6709_s7] sm:$0xf] }
 0x420   : > { %2498 = vmax.xlane.f32.xlu2 %v2497_v44  ;;  %2531 = vmax.xlane.f32.xlu1 %v2530_v45  ;;  %v3083_v44 = vld [vmem:[%s6709_s7] sm:$0xf] }
 0x421   : > { %v2541_v45 = vld [vmem:[%s6708_s6] sm:$0xf] }
 0x428   : > { %2503 = vmax.xlane.f32.xlu2 %v2502_v46 }
 0x452   : > { %v2442_v47 = vpop.xlane.xlu0 %2441 }
 0x453   : > { %v2409_v49 = vpop.xlane.xlu2 %2408  ;;  %v2405_v51 = vpop.xlane.xlu1 %2404 }
 0x454   : > { %v2410_v5 = vmax.f32 %v2405_v51, %v2409_v49  ;;  %v5078_v51 = vld [vmem:[%s6708_s6 + $0x10] sm:$0xf] }
 0x45a   : > { %v2481_v53 = vpop.xlane.xlu0 %2480 }
 0x45b   : > { %v2446_v54 = vpop.xlane.xlu2 %2445  ;;  %v2414_v55 = vpop.xlane.xlu1 %2413 }
 0x45c   : > { %v2415_v6 = vmax.f32 %v2410_v5, %v2414_v55  ;;  %v2447_v9 = vmax.f32 %v2442_v47, %v2446_v54  ;;  %v5067_v47 = vld [vmem:[%s6708_s6 + $0x4] sm:$0xf]  ;;  %v5072_v55 = vld [vmem:[%s6708_s6 + $0x8] sm:$0xf]  ;;  %v5090_v5 = vld [vmem:[%s6708_s6 + $0x20] sm:$0xf] }
 0x462   : > { %v2514_v56 = vpop.xlane.xlu0 %2513 }
 0x463   : > { %v2478_v57 = vpop.xlane.xlu2 %2477  ;;  %v2451_v58 = vpop.xlane.xlu1 %2450 }
 0x464   : > { %v2452_v12 = vmax.f32 %v2447_v9, %v2451_v58  ;;  %v2482_v24 = vmax.f32 %v2478_v57, %v2481_v53  ;;  %v5081_v53 = vld [vmem:[%s6708_s6 + $0x14] sm:$0xf]  ;;  %v5098_v9 = vld [vmem:[%s6708_s6 + $0x8] sm:$0xf] }
 0x46a   : > { %v2456_v59 = vpop.xlane.xlu0 %2455 }
 0x46b   : > { %v2511_v60 = vpop.xlane.xlu2 %2510  ;;  %v2419_v61 = vpop.xlane.xlu1 %2418  ;;  %v2457_v14 = vmax.f32 %v2452_v12, %v2456_v59  ;;  %v5075_v59 = vld [vmem:[%s6708_s6 + $0xc] sm:$0xf] }
 0x46c   : > { %v2420_v11 = vmax.f32 %v2415_v6, %v2419_v61  ;;  %v2515_v23 = vmax.f32 %v2511_v60, %v2514_v56  ;;  %v5084_v60 = vld [vmem:[%s6708_s6 + $0x18] sm:$0xf]  ;;  %v5104_v6 = vld [vmem:[%s6708_s6 + $0x10] sm:$0xf]  ;;  %v5101_v12 = vld [vmem:[%s6708_s6 + $0xc] sm:$0xf] }
 0x472   : > { %v2489_v63 = vpop.xlane.xlu0 %2488 }
 0x473   : > { %v2485_v0 = vpop.xlane.xlu2 %2484  ;;  %v2518_v1 = vpop.xlane.xlu1 %2517 }
 0x474   : > { %v2519_v25 = vmax.f32 %v2515_v23, %v2518_v1  ;;  %v2486_v28 = vmax.f32 %v2482_v24, %v2485_v0  ;;  %v5087_v0 = vld [vmem:[%s6708_s6 + $0x1c] sm:$0xf]  ;;  %v5093_v1 = vld [vmem:[%s6708_s6 + $0x4] sm:$0xf] }
 0x476   : > { %v2490_v50 = vmax.f32 %v2486_v28, %v2489_v63 }
 0x47a   : > { %v2429_v2 = vpop.xlane.xlu0 %2428 }
 0x47b   : > { %v2424_v3 = vpop.xlane.xlu2 %2423  ;;  %v2461_v4 = vpop.xlane.xlu1 %2460 }
 0x47c   : > { %v2425_v13 = vmax.f32 %v2420_v11, %v2424_v3  ;;  %v2462_v15 = vmax.f32 %v2457_v14, %v2461_v4  ;;  %v2822_v3 = vld [vmem:[%s6708_s6] sm:$0xf]  ;;  %v5107_v11 = vld [vmem:[%s6708_s6 + $0x14] sm:$0xf] }
 0x47d   : > { %v5116_v14 = vld [vmem:[%s6708_s6 + $0x20] sm:$0xf] }
 0x47e   : > { %v2430_v17 = vmax.f32 %v2425_v13, %v2429_v2 }
 0x482   : > { %v2527_v7 = vpop.xlane.xlu0 %2526 }
 0x483   : > { %v2522_v8 = vpop.xlane.xlu2 %2521  ;;  %v2494_v10 = vpop.xlane.xlu1 %2493 }
 0x484   : > { %v2523_v48 = vmax.f32 %v2519_v25, %v2522_v8  ;;  %v2495_v32 = vmax.f32 %v2490_v50, %v2494_v10 }
 0x486   : > { %v2528_v30 = vmax.f32 %v2523_v48, %v2527_v7 }
 0x48a   : > { %v2471_v20 = vpop.xlane.xlu0 %2470 }
 0x48b   : > { %v2466_v16 = vpop.xlane.xlu2 %2465  ;;  %v2434_v19 = vpop.xlane.xlu1 %2433 }
 0x48c   : > { %v2467_v18 = vmax.f32 %v2462_v15, %v2466_v16  ;;  %v2435_v21 = vmax.f32 %v2430_v17, %v2434_v19  ;;  %v5110_v16 = vld [vmem:[%s6708_s6 + $0x18] sm:$0xf]  ;;  %v5113_v17 = vld [vmem:[%s6708_s6 + $0x1c] sm:$0xf] }
 0x48e   : > { %v2472_v22 = vmax.f32 %v2467_v18, %v2471_v20  ;;  %2437 = vst.msk [vmem:[#allocation5] sm:$0xf] %vm2436_vm9, %v2435_v21  ;;  %vm4300_vm9 = vcmask 1044416  }
 0x490   : > { %2474 = vst.msk [vmem:[#allocation5] sm:$0xf] %vm2473_vm10, %v2472_v22  ;;  %vm4301_vm10 = vcmask 130052  }
 0x492   : > { %v2537_v38 = vpop.xlane.xlu0 %2536 }
 0x493   : > { %v2499_v29 = vpop.xlane.xlu2 %2498  ;;  %v2532_v52 = vpop.xlane.xlu1 %2531 }
 0x494   : > { %v2533_v34 = vmax.f32 %v2528_v30, %v2532_v52  ;;  %v2500_v36 = vmax.f32 %v2495_v32, %v2499_v29 }
 0x496   : > { %v2538_v40 = vmax.f32 %v2533_v34, %v2537_v38 }
 0x49b   : > { %v2504_v37 = vpop.xlane.xlu2 %2503 }
 0x49c   : > { %v2505_v39 = vmax.f32 %v2500_v36, %v2504_v37 }
 0x49e   : > { %2507 = vst.msk [vmem:[#allocation5] sm:$0xf] %vm2506_vm11, %v2505_v39  ;;  %vm6567_vm11 = vmor %vm4301_vm10, %vm4300_vm9  ;;  %vm4406_vm9 = vcmask 847488   ;;  %vm4417_vm10 = vcmask 1044288  }
 0x49f   : > { %2540 = vst.msk [vmem:[#allocation5] sm:$0xf] %vm2539_vm12, %v2538_v40  ;;  %vm4313_vm12 = vcmask 322688  }
 0x4a6   : > { %v2542_v41 = vld [vmem:[#allocation5] sm:$0xf] }
 0x4a7   : > { %2690 = vrot.lane.b32.xlu0 %v2542_v41, %s6756_s14  ;;  %2546 = vrot.lane.b32.xlu2 %v2542_v41, %s6753_s30  ;;  %v2823_v42 = vld [vmem:[#allocation5] sm:$0xf] }
 0x4a8   : > { %2600 = vrot.lane.b32.xlu1 %v2542_v41, %s6745_s29  ;;  %5070 = vmatpush.msk.msrb.mxu2 %vm696_vm1, %v2542_v41  ;;  %s6792_s29 = smov 116  }
 0x4a9   : > { %5071 = vmatmul.msk.f32.vlgmr.msrb.gmra.mxu2 %vm712_vm3, %v2541_v45 }
 0x4af   : > { %2720 = vrot.lane.b32.xlu0 %v2542_v41, %s6747_s28  ;;  %2660 = vrot.lane.b32.xlu2 %v2542_v41, %s6759_s19 }
 0x4b0   : > { %2630 = vrot.lane.b32.xlu1 %v2542_v41, %s6754_s17 }
 0x4b7   : > { %2750 = vrot.lane.b32.xlu0 %v2542_v41, %s6763_s18  ;;  %2853 = vrot.lane.b32.xlu2 %v2823_v42, %s6754_s17 }
 0x4b8   : > { %2826 = vrot.lane.b32.xlu1 %v2823_v42, %s6759_s19 }
 0x4bf   : > { %2939 = vrot.lane.b32.xlu0 %v2823_v42, %s6763_s18  ;;  %2881 = vrot.lane.b32.xlu2 %v2823_v42, %s6756_s14 }
 0x4c0   : > { %2780 = vrot.lane.b32.xlu1 %v2542_v41, %s6761_s24 }
 0x4c7   : > { %2910 = vrot.lane.b32.xlu0 %v2823_v42, %s6747_s28  ;;  %3055 = vrot.lane.b32.xlu2 %v2823_v42, %s6749_s16  ;;  %s5528_s16 = smov 5   ;;  %s6795_s28 = smov 127  }
 0x4c8   : > { %2968 = vrot.lane.b32.xlu1 %v2823_v42, %s6761_s24 }
 0x4cf   : > { %3026 = vrot.lane.b32.xlu0 %v2823_v42, %s6758_s23  ;;  %2811 = vperm.xlu2 %5352, %v2808_v43  }
 0x4d0   : > { %2997 = vrot.lane.b32.xlu1 %v2823_v42, %s6751_s1  ;;  %s6790_s1 = smov 126  }
 0x4d8   : > { %3086 = vperm.xlu1 %5351, %v3083_v44  }
 0x501   : > { %v2547_v46 = vpop.permute.xlu2 %2546 }
 0x502   : > { %5068 = vmatpush.msk.msrb.mxu1 %vm696_vm1, %v2547_v46 }
 0x503   : > { %5069 = vmatmul.msk.f32.vlgmr.msrb.gmra.mxu1 %vm712_vm3, %v5067_v47 }
 0x509   : > { %v2661_v49 = vpop.permute.xlu2 %2660 }
 0x50a   : > { %5079 = vmatpush.msk.msra.mxu1 %vm696_vm1, %v2661_v49 }
 0x50b   : > { %5080 = vmatmul.msk.f32.vlgmr.msra.gmra.mxu1 %vm712_vm3, %v5078_v51 }
 0x511   : > { %v2854_v57 = vpop.permute.xlu2 %2853 }
 0x519   : > { %v2691_v54 = vpop.permute.xlu0 %2690  ;;  %v2882_v62 = vpop.permute.xlu2 %2881 }
 0x51a   : > { %v2601_v56 = vpop.permute.xlu1 %2600  ;;  %5082 = vmatpush.msk.msra.mxu2 %vm696_vm1, %v2691_v54 }
 0x51b   : > { %5073 = vmatpush.msk.msra.mxu3 %vm696_vm1, %v2601_v56  ;;  %5083 = vmatmul.msk.f32.vlgmr.msra.gmra.mxu2 %vm712_vm3, %v5081_v53 }
 0x51c   : > { %5074 = vmatmul.msk.f32.vlgmr.msra.gmra.mxu3 %vm712_vm3, %v5072_v55 }
 0x521   : > { %v2721_v58 = vpop.permute.xlu0 %2720  ;;  %v3056_v7 = vpop.permute.xlu2 %3055 }
 0x522   : > { %v2631_v61 = vpop.permute.xlu1 %2630  ;;  %5085 = vmatpush.msk.msrb.mxu3 %vm696_vm1, %v2721_v58 }
 0x523   : > { %5076 = vmatpush.msk.msrb.mxu0 %vm696_vm1, %v2631_v61 }
 0x524   : > { %5096 = vmatpush.msk.msra.mxu3 %vm696_vm1, %v2854_v57  ;;  %5077 = vmatmul.msk.f32.vlgmr.msrb.gmra.mxu0 %vm712_vm3, %v5075_v59 }
 0x525   : > { %5086 = vmatmul.msk.f32.vlgmr.msrb.gmra.mxu3 %vm712_vm3, %v5084_v60 }
 0x529   : > { %v2751_v63 = vpop.permute.xlu0 %2750  ;;  %v2812_v41 = vpop.permute.xlu2 %2811 }
 0x52a   : > { %v2827_v2 = vpop.permute.xlu1 %2826  ;;  %5088 = vmatpush.msk.msra.mxu0 %vm696_vm1, %v2751_v63 }
 0x52b   : > { %5094 = vmatpush.msk.msrb.mxu2 %vm696_vm1, %v2827_v2 }
 0x52c   : > { %5099 = vmatpush.msk.msrb.mxu0 %vm696_vm1, %v2882_v62  ;;  %5095 = vmatmul.msk.f32.vlgmr.msrb.gmra.mxu2 %vm712_vm3, %v5093_v1  ;;  %v2595_v20 = vpop.f32.mrf.mxu2 }
 0x52d   : > { %5089 = vmatmul.msk.f32.vlgmr.msra.gmra.mxu0 %vm712_vm3, %v5087_v0  ;;  %5097 = vmatmul.msk.f32.vlgmr.msra.gmra.mxu3 %vm712_vm3, %v2822_v3 }
 0x531   : > { %v2940_v4 = vpop.permute.xlu0 %2939 }
 0x532   : > { %v2781_v8 = vpop.permute.xlu1 %2780  ;;  %5105 = vmatpush.msk.msra.mxu2 %vm696_vm1, %v2940_v4  ;;  %v3364_v4 = vld [vmem:[%s6711_s9] sm:$0xf] }
 0x533   : > { %5091 = vmatpush.msk.msrb.mxu1 %vm696_vm1, %v2781_v8 }
 0x534   : > { %5117 = vmatpush.msk.msrb.mxu2 %vm696_vm1, %v3056_v7  ;;  %5092 = vmatmul.msk.f32.vlgmr.msrb.gmra.mxu1 %vm712_vm3, %v5090_v5  ;;  %v3638_v5 = vld [vmem:[%s6711_s9] sm:$0xf] }
 0x535   : > { %5106 = vmatmul.msk.f32.vlgmr.msra.gmra.mxu2 %vm712_vm3, %v5104_v6  ;;  %5100 = vmatmul.msk.f32.vlgmr.msrb.gmra.mxu0 %vm712_vm3, %v5098_v9  ;;  %v3097_v7 = vld [vmem:[%s6710_s8] sm:$0xf]  ;;  %v5133_v9 = vld [vmem:[%s6710_s8 + $0x14] sm:$0xf] }
 0x539   : > { %v2911_v10 = vpop.permute.xlu0 %2910 }
 0x53a   : > { %v2969_v13 = vpop.permute.xlu1 %2968  ;;  %5102 = vmatpush.msk.msra.mxu1 %vm696_vm1, %v2911_v10  ;;  %v5127_v10 = vld [vmem:[%s6710_s8 + $0xc] sm:$0xf] }
 0x53b   : > { %5108 = vmatpush.msk.msrb.mxu3 %vm696_vm1, %v2969_v13 }
 0x53c   : > { %5109 = vmatmul.msk.f32.vlgmr.msrb.gmra.mxu3 %vm712_vm3, %v5107_v11  ;;  %5103 = vmatmul.msk.f32.vlgmr.msra.gmra.mxu1 %vm712_vm3, %v5101_v12  ;;  %v5119_v12 = vld [vmem:[%s6710_s8 + $0x4] sm:$0xf] }
 0x53d   : > { %5118 = vmatmul.msk.f32.vlgmr.msrb.gmra.mxu2 %vm712_vm3, %v5116_v14 }
 0x541   : > { %v3027_v15 = vpop.permute.xlu0 %3026 }
 0x542   : > { %v2998_v18 = vpop.permute.xlu1 %2997  ;;  %5114 = vmatpush.msk.msrb.mxu1 %vm696_vm1, %v3027_v15 }
 0x543   : > { %5111 = vmatpush.msk.msra.mxu0 %vm696_vm1, %v2998_v18 }
 0x544   : > { %5112 = vmatmul.msk.f32.vlgmr.msra.gmra.mxu0 %vm712_vm3, %v5110_v16  ;;  %5115 = vmatmul.msk.f32.vlgmr.msrb.gmra.mxu1 %vm712_vm3, %v5113_v17  ;;  %v5124_v16 = vld [vmem:[%s6710_s8 + $0x8] sm:$0xf]  ;;  %v5130_v17 = vld [vmem:[%s6710_s8 + $0x10] sm:$0xf] }
 0x54a   : > { %v3087_v61 = vpop.permute.xlu1 %3086 }
 0x580   : > { %v2570_v19 = vpop.f32.mrf.mxu1 }
 0x581   : > { %v2596_v21 = vadd.f32 %v2595_v20, %v2570_v19  ;;  %v5139_v19 = vld [vmem:[%s6710_s8 + $0x1c] sm:$0xf] }
 0x588   : > { %v2684_v25 = vpop.f32.mrf.mxu1 }
 0x59e   : > { %v2714_v29 = vpop.f32.mrf.mxu2 }
 0x59f   : > { %v2624_v22 = vpop.f32.mrf.mxu3 }
 0x5a0   : > { %v2627_v23 = vadd.f32 %v2624_v22, %v2596_v21  ;;  %v5142_v22 = vld [vmem:[%s6710_s8 + $0x20] sm:$0xf] }
 0x5a1   : > { %v2654_v24 = vpop.f32.mrf.mxu0 }
 0x5a2   : > { %v2657_v28 = vadd.f32 %v2654_v24, %v2627_v23  ;;  %v5136_v23 = vld [vmem:[%s6710_s8 + $0x18] sm:$0xf] }
 0x5a4   : > { %v2687_v48 = vadd.f32 %v2684_v25, %v2657_v28  ;;  %v5150_v25 = vld [vmem:[%s6710_s8 + $0x8] sm:$0xf] }
 0x5a6   : > { %v2717_v50 = vadd.f32 %v2714_v29, %v2687_v48  ;;  %v5145_v48 = vld [vmem:[%s6710_s8 + $0x4] sm:$0xf]  ;;  %v5153_v29 = vld [vmem:[%s6710_s8 + $0xc] sm:$0xf] }
 0x5a8   : > { %v2744_v52 = vpop.f32.mrf.mxu3 }
 0x5a9   : > { %v2747_v32 = vadd.f32 %v2744_v52, %v2717_v50 }
 0x5aa   : > { %v2774_v30 = vpop.f32.mrf.mxu0 }
 0x5ab   : > { %v2777_v36 = vadd.f32 %v2774_v30, %v2747_v32  ;;  %v3377_v30 = vld [vmem:[%s6710_s8] sm:$0xf] }
 0x5af   : > { %v2850_v34 = vpop.f32.mrf.mxu2 }
 0x5b0   : > { %v2877_v37 = vpop.f32.mrf.mxu3 }
 0x5b1   : > { %v2804_v38 = vpop.f32.mrf.mxu1  ;;  %v2878_v40 = vadd.f32 %v2877_v37, %v2850_v34  ;;  %v5162_v34 = vld [vmem:[%s6710_s8 + $0x18] sm:$0xf] }
 0x5b2   : > { %v2807_v39 = vadd.f32 %v2804_v38, %v2777_v36  ;;  %v2905_v42 = vpop.f32.mrf.mxu0  ;;  %v5156_v36 = vld [vmem:[%s6710_s8 + $0x10] sm:$0xf]  ;;  %v5165_v38 = vld [vmem:[%s6710_s8 + $0x1c] sm:$0xf] }
 0x5b3   : > { %v2908_v45 = vadd.f32 %v2905_v42, %v2878_v40  ;;  %v5159_v40 = vld [vmem:[%s6710_s8 + $0x14] sm:$0xf] }
 0x5b4   : > { %v2814_v43 = vadd.f32 %v2812_v41, %v2807_v39  ;;  %v5168_v41 = vld [vmem:[%s6710_s8 + $0x20] sm:$0xf] }
 0x5b6   : > { %v2815_v44 = vmax.f32 %v2814_v43, 0.0 }
 0x5b8   : > { %2817 = vrot.lane.b32.xlu0 %v2815_v44, %s5528_s16  ;;  %v2963_v47 = vpop.f32.mrf.mxu2 }
 0x5b9   : > { %v2934_v46 = vpop.f32.mrf.mxu1 }
 0x5ba   : > { %v2937_v49 = vadd.f32 %v2934_v46, %v2908_v45 }
 0x5bc   : > { %v2966_v51 = vadd.f32 %v2963_v47, %v2937_v49 }
 0x5bf   : > { %v2992_v53 = vpop.f32.mrf.mxu3 }
 0x5c0   : > { %v2995_v54 = vadd.f32 %v2992_v53, %v2966_v51  ;;  %v3079_v58 = vpop.f32.mrf.mxu2 }
 0x5c1   : > { %v3021_v55 = vpop.f32.mrf.mxu0  ;;  %v3050_v56 = vpop.f32.mrf.mxu1 }
 0x5c2   : > { %v3024_v57 = vadd.f32 %v3021_v55, %v2995_v54 }
 0x5c4   : > { %v3053_v59 = vadd.f32 %v3050_v56, %v3024_v57 }
 0x5c6   : > { %v3082_v60 = vadd.f32 %v3079_v58, %v3053_v59 }
 0x5c8   : > { %v3089_v62 = vadd.f32 %v3087_v61, %v3082_v60 }
 0x5ca   : > { %v3090_v63 = vmax.f32 %v3089_v62, 0.0 }
 0x5cc   : > { %3092 = vrot.lane.b32.xlu2 %v3090_v63, %s5529_s15 }
 0x626   : > { %v3093_v1 = vpop.permute.xlu2 %3092 }
 0x62a   : > { %v2818_v0 = vpop.permute.xlu0 %2817 }
 0x62b   : > { %2821 = vst.msk [vmem:[#allocation6] sm:$0xf] %vm2820_vm13, %v2818_v0 }
 0x62c   : > { %3096 = vst.msk [vmem:[#allocation6] sm:$0xf] %vm3095_vm14, %v3093_v1 }
 0x633   : > { %v3098_v2 = vld [vmem:[#allocation6] sm:$0xf] }
 0x634   : > { %3216 = vrot.lane.b32.xlu2 %v3098_v2, %s6759_s19  ;;  %3186 = vrot.lane.b32.xlu0 %v3098_v2, %s6754_s17  ;;  %v3378_v3 = vld [vmem:[#allocation6] sm:$0xf] }
 0x635   : > { %3102 = vrot.lane.b32.xlu1 %v3098_v2, %s6753_s30  ;;  %5122 = vmatpush.msk.msrb.mxu0 %vm696_vm1, %v3098_v2  ;;  %s6793_s30 = smov 114  }
 0x636   : > { %5123 = vmatmul.msk.f32.vlgmr.msrb.gmra.mxu0 %vm712_vm3, %v3097_v7 }
 0x63c   : > { %3246 = vrot.lane.b32.xlu2 %v3098_v2, %s6756_s14  ;;  %3306 = vrot.lane.b32.xlu0 %v3098_v2, %s6763_s18 }
 0x63d   : > { %3156 = vrot.lane.b32.xlu1 %v3098_v2, %s6790_s1 }
 0x644   : > { %3436 = vrot.lane.b32.xlu2 %v3378_v3, %s6756_s14  ;;  %3276 = vrot.lane.b32.xlu0 %v3098_v2, %s6791_s20  ;;  %s6796_s14 = smov 123  }
 0x645   : > { %3336 = vrot.lane.b32.xlu1 %v3098_v2, %s6761_s24 }
 0x64c   : > { %3408 = vrot.lane.b32.xlu2 %v3378_v3, %s6754_s17  ;;  %3465 = vrot.lane.b32.xlu0 %v3378_v3, %s6791_s20  ;;  %s6797_s17 = smov 124  }
 0x64d   : > { %3381 = vrot.lane.b32.xlu1 %v3378_v3, %s6759_s19  ;;  %s6801_s19 = sld [smem:[#allocation26_spill]] }
 0x654   : > { %3581 = vrot.lane.b32.xlu2 %v3378_v3, %s6758_s23  ;;  %3494 = vrot.lane.b32.xlu0 %v3378_v3, %s6763_s18  ;;  %s6798_s23 = smov 119   ;;  %s6800_s18 = smov 115  }
 0x655   : > { %3552 = vrot.lane.b32.xlu1 %v3378_v3, %s6792_s29 }
 0x65c   : > { %3367 = vperm.xlu2 %5352, %v3364_v4   ;;  %3610 = vrot.lane.b32.xlu0 %v3378_v3, %s6793_s30 }
 0x65d   : > { %3523 = vrot.lane.b32.xlu1 %v3378_v3, %s6761_s24  ;;  %s5531_s24 = smov 24  }
 0x665   : > { %3641 = vperm.xlu1 %5351, %v3638_v5  }
 0x68e   : > { %v3217_v6 = vpop.permute.xlu2 %3216 }
 0x696   : > { %v3247_v8 = vpop.permute.xlu2 %3246 }
 0x697   : > { %5134 = vmatpush.msk.msra.mxu0 %vm696_vm1, %v3247_v8 }
 0x698   : > { %5135 = vmatmul.msk.f32.vlgmr.msra.gmra.mxu0 %vm712_vm3, %v5133_v9 }
 0x69e   : > { %v3437_v14 = vpop.permute.xlu2 %3436 }
 0x6a6   : > { %v3187_v11 = vpop.permute.xlu0 %3186  ;;  %v3409_v20 = vpop.permute.xlu2 %3408 }
 0x6a7   : > { %v3103_v13 = vpop.permute.xlu1 %3102  ;;  %5128 = vmatpush.msk.msra.mxu2 %vm696_vm1, %v3187_v11 }
 0x6a8   : > { %5120 = vmatpush.msk.msra.mxu3 %vm696_vm1, %v3103_v13  ;;  %5129 = vmatmul.msk.f32.vlgmr.msra.gmra.mxu2 %vm712_vm3, %v5127_v10 }
 0x6a9   : > { %5121 = vmatmul.msk.f32.vlgmr.msra.gmra.mxu3 %vm712_vm3, %v5119_v12 }
 0x6aa   : > { %5131 = vmatpush.msk.msrb.mxu3 %vm696_vm1, %v3217_v6 }
 0x6ae   : > { %v3307_v15 = vpop.permute.xlu0 %3306  ;;  %v3582_v50 = vpop.permute.xlu2 %3581 }
 0x6af   : > { %v3157_v18 = vpop.permute.xlu1 %3156  ;;  %5140 = vmatpush.msk.msrb.mxu2 %vm696_vm1, %v3307_v15 }
 0x6b0   : > { %5125 = vmatpush.msk.msra.mxu1 %vm696_vm1, %v3157_v18  ;;  %5141 = vmatmul.msk.f32.vlgmr.msrb.gmra.mxu2 %vm712_vm3, %v5139_v19 }
 0x6b1   : > { %5151 = vmatpush.msk.msra.mxu2 %vm696_vm1, %v3437_v14  ;;  %5126 = vmatmul.msk.f32.vlgmr.msra.gmra.mxu1 %vm712_vm3, %v5124_v16 }
 0x6b2   : > { %5132 = vmatmul.msk.f32.vlgmr.msrb.gmra.mxu3 %vm712_vm3, %v5130_v17 }
 0x6b3   : > { %v3151_v43 = vpop.f32.mrf.mxu0 }
 0x6b6   : > { %v3277_v21 = vpop.permute.xlu0 %3276  ;;  %v3368_v63 = vpop.permute.xlu2 %3367 }
 0x6b7   : > { %v3337_v24 = vpop.permute.xlu1 %3336  ;;  %5137 = vmatpush.msk.msrb.mxu1 %vm696_vm1, %v3277_v21 }
 0x6b8   : > { %5143 = vmatpush.msk.msra.mxu3 %vm696_vm1, %v3337_v24  ;;  %5152 = vmatmul.msk.f32.vlgmr.msra.gmra.mxu2 %vm712_vm3, %v5150_v25 }
 0x6b9   : > { %5148 = vmatpush.msk.msra.mxu1 %vm696_vm1, %v3409_v20 }
 0x6ba   : > { %5144 = vmatmul.msk.f32.vlgmr.msra.gmra.mxu3 %vm712_vm3, %v5142_v22  ;;  %5138 = vmatmul.msk.f32.vlgmr.msrb.gmra.mxu1 %vm712_vm3, %v5136_v23 }
 0x6be   : > { %v3466_v28 = vpop.permute.xlu0 %3465 }
 0x6bf   : > { %v3382_v52 = vpop.permute.xlu1 %3381  ;;  %5154 = vmatpush.msk.msrb.mxu3 %vm696_vm1, %v3466_v28  ;;  %v3918_v28 = vld [vmem:[%s6713_s11] sm:$0xf] }
 0x6c0   : > { %5146 = vmatpush.msk.msrb.mxu0 %vm696_vm1, %v3382_v52  ;;  %v5185_v52 = vld [vmem:[%s6712_s10 + $0x14] sm:$0xf] }
 0x6c1   : > { %5166 = vmatpush.msk.msra.mxu3 %vm696_vm1, %v3582_v50  ;;  %5147 = vmatmul.msk.f32.vlgmr.msrb.gmra.mxu0 %vm712_vm3, %v5145_v48  ;;  %v4191_v48 = vld [vmem:[%s6713_s11] sm:$0xf] }
 0x6c2   : > { %5155 = vmatmul.msk.f32.vlgmr.msrb.gmra.mxu3 %vm712_vm3, %v5153_v29  ;;  %5149 = vmatmul.msk.f32.vlgmr.msra.gmra.mxu1 %vm712_vm3, %v3377_v30  ;;  %v3651_v29 = vld [vmem:[%s6712_s10] sm:$0xf] }
 0x6c6   : > { %v3495_v32 = vpop.permute.xlu0 %3494 }
 0x6c7   : > { %v3553_v37 = vpop.permute.xlu1 %3552  ;;  %5157 = vmatpush.msk.msra.mxu0 %vm696_vm1, %v3495_v32 }
 0x6c8   : > { %5163 = vmatpush.msk.msrb.mxu2 %vm696_vm1, %v3553_v37 }
 0x6c9   : > { %5164 = vmatmul.msk.f32.vlgmr.msrb.gmra.mxu2 %vm712_vm3, %v5162_v34  ;;  %5158 = vmatmul.msk.f32.vlgmr.msra.gmra.mxu0 %vm712_vm3, %v5156_v36  ;;  %v5176_v34 = vld [vmem:[%s6712_s10 + $0x8] sm:$0xf]  ;;  %v5171_v36 = vld [vmem:[%s6712_s10 + $0x4] sm:$0xf] }
 0x6ca   : > { %5167 = vmatmul.msk.f32.vlgmr.msra.gmra.mxu3 %vm712_vm3, %v5165_v38 }
 0x6ce   : > { %v3611_v39 = vpop.permute.xlu0 %3610 }
 0x6cf   : > { %v3524_v42 = vpop.permute.xlu1 %3523  ;;  %5169 = vmatpush.msk.msrb.mxu0 %vm696_vm1, %v3611_v39 }
 0x6d0   : > { %5160 = vmatpush.msk.msrb.mxu1 %vm696_vm1, %v3524_v42 }
 0x6d1   : > { %5161 = vmatmul.msk.f32.vlgmr.msrb.gmra.mxu1 %vm712_vm3, %v5159_v40  ;;  %5170 = vmatmul.msk.f32.vlgmr.msrb.gmra.mxu0 %vm712_vm3, %v5168_v41  ;;  %v5179_v40 = vld [vmem:[%s6712_s10 + $0xc] sm:$0xf]  ;;  %v5188_v41 = vld [vmem:[%s6712_s10 + $0x18] sm:$0xf] }
 0x6d7   : > { %v3642_v19 = vpop.permute.xlu1 %3641 }
 0x715   : > { %v3270_v54 = vpop.f32.mrf.mxu0 }
 0x72b   : > { %v3210_v49 = vpop.f32.mrf.mxu2 }
 0x72c   : > { %v3126_v44 = vpop.f32.mrf.mxu3 }
 0x72d   : > { %v3152_v45 = vadd.f32 %v3151_v43, %v3126_v44  ;;  %v5182_v43 = vld [vmem:[%s6712_s10 + $0x10] sm:$0xf] }
 0x72e   : > { %v3180_v46 = vpop.f32.mrf.mxu1 }
 0x72f   : > { %v3183_v47 = vadd.f32 %v3180_v46, %v3152_v45  ;;  %v5191_v46 = vld [vmem:[%s6712_s10 + $0x1c] sm:$0xf] }
 0x731   : > { %v3213_v51 = vadd.f32 %v3210_v49, %v3183_v47  ;;  %v5197_v47 = vld [vmem:[%s6712_s10 + $0x4] sm:$0xf] }
 0x733   : > { %v3330_v58 = vpop.f32.mrf.mxu2 }
 0x735   : > { %v3240_v53 = vpop.f32.mrf.mxu3 }
 0x736   : > { %v3243_v55 = vadd.f32 %v3240_v53, %v3213_v51  ;;  %v3930_v51 = vld [vmem:[%s6712_s10] sm:$0xf] }
 0x737   : > { %v3300_v56 = vpop.f32.mrf.mxu1 }
 0x738   : > { %v3273_v57 = vadd.f32 %v3270_v54, %v3243_v55  ;;  %v5194_v54 = vld [vmem:[%s6712_s10 + $0x20] sm:$0xf]  ;;  %v5208_v55 = vld [vmem:[%s6712_s10 + $0x10] sm:$0xf] }
 0x73a   : > { %v3303_v59 = vadd.f32 %v3300_v56, %v3273_v57 }
 0x73b   : > { %v3460_v4 = vpop.f32.mrf.mxu2 }
 0x73c   : > { %v3333_v60 = vadd.f32 %v3330_v58, %v3303_v59  ;;  %v5202_v58 = vld [vmem:[%s6712_s10 + $0x8] sm:$0xf] }
 0x73d   : > { %v3360_v61 = vpop.f32.mrf.mxu3 }
 0x73e   : > { %v3363_v62 = vadd.f32 %v3360_v61, %v3333_v60  ;;  %v3405_v0 = vpop.f32.mrf.mxu0  ;;  %v5211_v60 = vld [vmem:[%s6712_s10 + $0x14] sm:$0xf]  ;;  %v5205_v61 = vld [vmem:[%s6712_s10 + $0xc] sm:$0xf] }
 0x73f   : > { %v3432_v2 = vpop.f32.mrf.mxu1 }
 0x740   : > { %v3370_v1 = vadd.f32 %v3368_v63, %v3363_v62  ;;  %v3433_v3 = vadd.f32 %v3432_v2, %v3405_v0  ;;  %v5220_v63 = vld [vmem:[%s6712_s10 + $0x20] sm:$0xf]  ;;  %v5217_v2 = vld [vmem:[%s6712_s10 + $0x1c] sm:$0xf] }
 0x742   : > { %v3371_v5 = vmax.f32 %v3370_v1, 0.0  ;;  %v3463_v6 = vadd.f32 %v3460_v4, %v3433_v3  ;;  %v5214_v1 = vld [vmem:[%s6712_s10 + $0x18] sm:$0xf] }
 0x744   : > { %3373 = vrot.lane.b32.xlu0 %v3371_v5, %s5528_s16 }
 0x745   : > { %v3489_v7 = vpop.f32.mrf.mxu3 }
 0x746   : > { %v3492_v8 = vadd.f32 %v3489_v7, %v3463_v6  ;;  %v3518_v9 = vpop.f32.mrf.mxu0 }
 0x748   : > { %v3521_v10 = vadd.f32 %v3518_v9, %v3492_v8 }
 0x74c   : > { %v3576_v12 = vpop.f32.mrf.mxu2 }
 0x74d   : > { %v3605_v14 = vpop.f32.mrf.mxu3 }
 0x74e   : > { %v3547_v11 = vpop.f32.mrf.mxu1  ;;  %v3634_v16 = vpop.f32.mrf.mxu0 }
 0x74f   : > { %v3550_v13 = vadd.f32 %v3547_v11, %v3521_v10 }
 0x751   : > { %v3579_v15 = vadd.f32 %v3576_v12, %v3550_v13 }
 0x753   : > { %v3608_v17 = vadd.f32 %v3605_v14, %v3579_v15 }
 0x755   : > { %v3637_v18 = vadd.f32 %v3634_v16, %v3608_v17 }
 0x757   : > { %v3644_v20 = vadd.f32 %v3642_v19, %v3637_v18 }
 0x759   : > { %v3645_v21 = vmax.f32 %v3644_v20, 0.0 }
 0x75b   : > { %3647 = vrot.lane.b32.xlu2 %v3645_v21, %s5529_s15 }
 0x7b5   : > { %v3648_v22 = vpop.permute.xlu2 %3647 }
 0x7b6   : > { %v3374_v23 = vpop.permute.xlu0 %3373 }
 0x7b7   : > { %3376 = vst.msk [vmem:[#allocation7] sm:$0xf] %vm2820_vm13, %v3374_v23 }
 0x7b8   : > { %3650 = vst.msk [vmem:[#allocation7] sm:$0xf] %vm3095_vm14, %v3648_v22 }
 0x7bf   : > { %v3652_v24 = vld [vmem:[#allocation7] sm:$0xf] }
 0x7c0   : > { %3800 = vrot.lane.b32.xlu2 %v3652_v24, %s6794_s21  ;;  %3656 = vrot.lane.b32.xlu0 %v3652_v24, %s6795_s28  ;;  %v3931_v25 = vld [vmem:[#allocation7] sm:$0xf]  ;;  %s6765_s28 = smov 40  }
 0x7c1   : > { %3710 = vrot.lane.b32.xlu1 %v3652_v24, %s6790_s1  ;;  %5174 = vmatpush.msk.msra.mxu2 %vm696_vm1, %v3652_v24  ;;  %s6799_s1 = smov 118  }
 0x7c2   : > { %5175 = vmatmul.msk.f32.vlgmr.msra.gmra.mxu2 %vm712_vm3, %v3651_v29 }
 0x7c8   : > { %3770 = vrot.lane.b32.xlu2 %v3652_v24, %s6796_s14  ;;  %3830 = vrot.lane.b32.xlu0 %v3652_v24, %s6791_s20 }
 0x7c9   : > { %3740 = vrot.lane.b32.xlu1 %v3652_v24, %s6797_s17 }
 0x7d0   : > { %3961 = vrot.lane.b32.xlu2 %v3931_v25, %s6797_s17  ;;  %3860 = vrot.lane.b32.xlu0 %v3652_v24, %s6798_s23  ;;  %s6807_s17 = smov 112  }
 0x7d1   : > { %3934 = vrot.lane.b32.xlu1 %v3931_v25, %s6796_s14 }
 0x7d8   : > { %3989 = vrot.lane.b32.xlu2 %v3931_v25, %s6794_s21  ;;  %4047 = vrot.lane.b32.xlu0 %v3931_v25, %s6798_s23  ;;  %s6806_s21 = smov 88  }
 0x7d9   : > { %3890 = vrot.lane.b32.xlu1 %v3652_v24, %s6799_s1 }
 0x7e0   : > { %4163 = vrot.lane.b32.xlu2 %v3931_v25, %s6793_s30  ;;  %4018 = vrot.lane.b32.xlu0 %v3931_v25, %s6791_s20  ;;  %s6808_s30 = smov 32  }
 0x7e1   : > { %4076 = vrot.lane.b32.xlu1 %v3931_v25, %s6799_s1  ;;  %s5534_s1 = smov 56  }
 0x7e8   : > { %3921 = vperm.xlu2 %5352, %v3918_v28   ;;  %4134 = vrot.lane.b32.xlu0 %v3931_v25, %s6800_s18  ;;  %s6805_s18 = smov 64  }
 0x7e9   : > { %4105 = vrot.lane.b32.xlu1 %v3931_v25, %s6792_s29  ;;  %s6802_s29 = smov 48  }
 0x7f1   : > { %4194 = vperm.xlu1 %5351, %v4191_v48  }
 0x81a   : > { %v3801_v50 = vpop.permute.xlu2 %3800 }
 0x81b   : > { %5186 = vmatpush.msk.msrb.mxu2 %vm696_vm1, %v3801_v50 }
 0x81c   : > { %5187 = vmatmul.msk.f32.vlgmr.msrb.gmra.mxu2 %vm712_vm3, %v5185_v52 }
 0x822   : > { %v3771_v30 = vpop.permute.xlu2 %3770 }
 0x82a   : > { %v3962_v38 = vpop.permute.xlu2 %3961 }
 0x832   : > { %v3657_v32 = vpop.permute.xlu0 %3656  ;;  %v3990_v44 = vpop.permute.xlu2 %3989 }
 0x833   : > { %v3711_v37 = vpop.permute.xlu1 %3710  ;;  %5172 = vmatpush.msk.msra.mxu1 %vm696_vm1, %v3657_v32 }
 0x834   : > { %5177 = vmatpush.msk.msrb.mxu3 %vm696_vm1, %v3711_v37  ;;  %5173 = vmatmul.msk.f32.vlgmr.msra.gmra.mxu1 %vm712_vm3, %v5171_v36 }
 0x835   : > { %5183 = vmatpush.msk.msrb.mxu1 %vm696_vm1, %v3771_v30  ;;  %5178 = vmatmul.msk.f32.vlgmr.msrb.gmra.mxu3 %vm712_vm3, %v5176_v34 }
 0x83a   : > { %v3831_v39 = vpop.permute.xlu0 %3830  ;;  %v4164_v56 = vpop.permute.xlu2 %4163 }
 0x83b   : > { %v3741_v42 = vpop.permute.xlu1 %3740  ;;  %5189 = vmatpush.msk.msra.mxu3 %vm696_vm1, %v3831_v39 }
 0x83c   : > { %5180 = vmatpush.msk.msra.mxu0 %vm696_vm1, %v3741_v42  ;;  %5184 = vmatmul.msk.f32.vlgmr.msrb.gmra.mxu1 %vm712_vm3, %v5182_v43 }
 0x83d   : > { %5200 = vmatpush.msk.msrb.mxu3 %vm696_vm1, %v3962_v38  ;;  %5181 = vmatmul.msk.f32.vlgmr.msra.gmra.mxu0 %vm712_vm3, %v5179_v40 }
 0x83e   : > { %5190 = vmatmul.msk.f32.vlgmr.msra.gmra.mxu3 %vm712_vm3, %v5188_v41 }
 0x842   : > { %v3861_v45 = vpop.permute.xlu0 %3860  ;;  %v3922_v24 = vpop.permute.xlu2 %3921 }
 0x843   : > { %v3935_v49 = vpop.permute.xlu1 %3934  ;;  %5192 = vmatpush.msk.msrb.mxu0 %vm696_vm1, %v3861_v45  ;;  %v4203_v45 = vld [vmem:[%s6801_s19] sm:$0x3]  ;;  %s6809_s19 = smov 104  }
 0x844   : > { %5198 = vmatpush.msk.msra.mxu2 %vm696_vm1, %v3935_v49 }
 0x845   : > { %5203 = vmatpush.msk.msra.mxu0 %vm696_vm1, %v3990_v44  ;;  %5199 = vmatmul.msk.f32.vlgmr.msra.gmra.mxu2 %vm712_vm3, %v5197_v47  ;;  %v3705_v5 = vpop.f32.mrf.mxu2  ;;  %v706_v44 = vld [vmem:[%s6715_s13] sm:$0xf] }
 0x846   : > { %5193 = vmatmul.msk.f32.vlgmr.msrb.gmra.mxu0 %vm712_vm3, %v5191_v46  ;;  %5201 = vmatmul.msk.f32.vlgmr.msrb.gmra.mxu3 %vm712_vm3, %v3930_v51 }
 0x84a   : > { %v4048_v53 = vpop.permute.xlu0 %4047 }
 0x84b   : > { %v3891_v57 = vpop.permute.xlu1 %3890  ;;  %5209 = vmatpush.msk.msrb.mxu2 %vm696_vm1, %v4048_v53 }
 0x84c   : > { %5195 = vmatpush.msk.msra.mxu1 %vm696_vm1, %v3891_v57 }
 0x84d   : > { %5221 = vmatpush.msk.msra.mxu2 %vm696_vm1, %v4164_v56  ;;  %5196 = vmatmul.msk.f32.vlgmr.msra.gmra.mxu1 %vm712_vm3, %v5194_v54 }
 0x84e   : > { %5210 = vmatmul.msk.f32.vlgmr.msrb.gmra.mxu2 %vm712_vm3, %v5208_v55  ;;  %5204 = vmatmul.msk.f32.vlgmr.msra.gmra.mxu0 %vm712_vm3, %v5202_v58 }
 0x852   : > { %v4019_v59 = vpop.permute.xlu0 %4018 }
 0x853   : > { %v4077_v62 = vpop.permute.xlu1 %4076  ;;  %5206 = vmatpush.msk.msrb.mxu1 %vm696_vm1, %v4019_v59 }
 0x854   : > { %5212 = vmatpush.msk.msra.mxu3 %vm696_vm1, %v4077_v62 }
 0x855   : > { %5213 = vmatmul.msk.f32.vlgmr.msra.gmra.mxu3 %vm712_vm3, %v5211_v60  ;;  %5207 = vmatmul.msk.f32.vlgmr.msrb.gmra.mxu1 %vm712_vm3, %v5205_v61 }
 0x856   : > { %5222 = vmatmul.msk.f32.vlgmr.msra.gmra.mxu2 %vm712_vm3, %v5220_v63  ;;  %5223 = vmatpush.msk.msrb.mxu3 %vm4211_vm15, %v4203_v45 }
 0x85a   : > { %v4135_v0 = vpop.permute.xlu0 %4134 }
 0x85b   : > { %v4106_v3 = vpop.permute.xlu1 %4105  ;;  %5218 = vmatpush.msk.msra.mxu1 %vm696_vm1, %v4135_v0 }
 0x85c   : > { %5215 = vmatpush.msk.msrb.mxu0 %vm696_vm1, %v4106_v3 }
 0x85d   : > { %5216 = vmatmul.msk.f32.vlgmr.msrb.gmra.mxu0 %vm712_vm3, %v5214_v1  ;;  %5219 = vmatmul.msk.f32.vlgmr.msra.gmra.mxu1 %vm712_vm3, %v5217_v2 }
 0x85e   : > { %5225 = vmatpush.msk.msra.mxu0 %vm4211_vm15, %v4203_v45  ;;  %vm4346_vm15 = vcmask 913088  }
 0x863   : > { %v4195_v42 = vpop.permute.xlu1 %4194 }
 0x89f   : > { %v3824_v13 = vpop.f32.mrf.mxu2 }
 0x8b1   : > { %v3680_v4 = vpop.f32.mrf.mxu1 }
 0x8b2   : > { %v3706_v6 = vadd.f32 %v3705_v5, %v3680_v4 }
 0x8b8   : > { %v3734_v7 = vpop.f32.mrf.mxu3 }
 0x8b9   : > { %v3737_v8 = vadd.f32 %v3734_v7, %v3706_v6  ;;  %v3794_v11 = vpop.f32.mrf.mxu1 }
 0x8ba   : > { %v3764_v9 = vpop.f32.mrf.mxu0 }
 0x8bb   : > { %v3767_v10 = vadd.f32 %v3764_v9, %v3737_v8 }
 0x8bd   : > { %v3797_v12 = vadd.f32 %v3794_v11, %v3767_v10 }
 0x8bf   : > { %v3827_v14 = vadd.f32 %v3824_v13, %v3797_v12 }
 0x8c1   : > { %v3854_v15 = vpop.f32.mrf.mxu3 }
 0x8c2   : > { %v3857_v17 = vadd.f32 %v3854_v15, %v3827_v14 }
 0x8c3   : > { %v3884_v16 = vpop.f32.mrf.mxu0 }
 0x8c4   : > { %v3887_v19 = vadd.f32 %v3884_v16, %v3857_v17 }
 0x8c8   : > { %v3958_v18 = vpop.f32.mrf.mxu2 }
 0x8c9   : > { %v3985_v20 = vpop.f32.mrf.mxu3 }
 0x8ca   : > { %v3914_v21 = vpop.f32.mrf.mxu1  ;;  %v3986_v23 = vadd.f32 %v3985_v20, %v3958_v18 }
 0x8cb   : > { %v3917_v22 = vadd.f32 %v3914_v21, %v3887_v19  ;;  %v4013_v25 = vpop.f32.mrf.mxu0 }
 0x8cc   : > { %v4016_v48 = vadd.f32 %v4013_v25, %v3986_v23 }
 0x8cd   : > { %v3924_v28 = vadd.f32 %v3922_v24, %v3917_v22 }
 0x8cf   : > { %3926 = vrot.lane.b32.xlu0 %v3924_v28, %s5528_s16  ;;  %s5533_s16 = smov 8  }
 0x8d1   : > { %v4071_v50 = vpop.f32.mrf.mxu2 }
 0x8d2   : > { %v4042_v29 = vpop.f32.mrf.mxu1 }
 0x8d3   : > { %v4045_v52 = vadd.f32 %v4042_v29, %v4016_v48 }
 0x8d5   : > { %v4074_v30 = vadd.f32 %v4071_v50, %v4045_v52 }
 0x8d8   : > { %v4100_v32 = vpop.f32.mrf.mxu3 }
 0x8d9   : > { %v4103_v34 = vadd.f32 %v4100_v32, %v4074_v30  ;;  %v4187_v39 = vpop.f32.mrf.mxu2 }
 0x8da   : > { %v4129_v36 = vpop.f32.mrf.mxu0  ;;  %v4158_v37 = vpop.f32.mrf.mxu1 }
 0x8db   : > { %v4132_v38 = vadd.f32 %v4129_v36, %v4103_v34 }
 0x8dd   : > { %v4161_v40 = vadd.f32 %v4158_v37, %v4132_v38 }
 0x8df   : > { %v4190_v41 = vadd.f32 %v4187_v39, %v4161_v40 }
 0x8e1   : > { %v4197_v43 = vadd.f32 %v4195_v42, %v4190_v41 }
 0x8e3   : > { %4199 = vrot.lane.b32.xlu2 %v4197_v43, %s5529_s15  ;;  %s5530_s15 = smov 72  }
 0x8eb   : > { %709 = vperm.xlu2 %5352, %v706_v44  }
 0x93d   : > { %v4200_v46 = vpop.permute.xlu2 %4199 }
 0x941   : > { %v3927_v47 = vpop.permute.xlu0 %3926 }
 0x942   : > { %3929 = vst.msk [vmem:[#allocation5] sm:$0xf] %vm2820_vm13, %v3927_v47  ;;  %vm4324_vm13 = vcmask 519488  }
 0x943   : > { %4202 = vst.msk [vmem:[#allocation5] sm:$0xf] %vm3095_vm14, %v4200_v46  ;;  %vm4335_vm14 = vcmask 716288  }
 0x945   : > { %v710_v49 = vpop.permute.xlu2 %709 }
 0x946   : > { %v765_v51 = vadd.f32 %v5987_v27, %v710_v49  ;;  %v805_v53 = vadd.f32 %v5991_v33, %v710_v49  ;;  %v825_v54 = vadd.f32 %v5993_v35, %v710_v49  ;;  %v745_v55 = vadd.f32 %v5989_v31, %v710_v49 }
 0x947   : > { %v785_v56 = vadd.f32 %v5985_v26, %v710_v49 }
 0x948   : > { %v831_v57 = vrot.slane %v765_v51, 4  ;;  %v832_v58 = vrot.slane %v805_v53, 4  ;;  %839 = vst.msk [vmem:[#allocation8 + $0x10] sm:$0xf] %vm703_vm2, %v825_v54  ;;  %vm4261_vm2 = vcmask 191488  }
 0x94a   : > { %v833_v59 = vsel %vm696_vm1, %v745_v55, %v831_v57  ;;  %v834_v60 = vsel %vm696_vm1, %v785_v56, %v832_v58  ;;  %v4204_v61 = vld [vmem:[#allocation5] sm:$0xf] }
 0x94b   : > { %837 = vst [vmem:[#allocation8] sm:$0xff] %v833_v59  ;;  %4235 = vrot.lane.b32.xlu0 %v4204_v61, %s6798_s23  ;;  %4206 = vrot.lane.b32.xlu1 %v4204_v61, %s6796_s14  ;;  %s6803_s14 = smov 16   ;;  %s6804_s23 = smov 96  }
 0x94c   : > { %838 = vst [vmem:[#allocation8 + $0x8] sm:$0xff] %v834_v60 }
 0x952   : > { %v4259_v33 = vld [vmem:[#allocation8] sm:$0xf] }
 0x953   : > { %v4422_v5 = vld [vmem:[#allocation8 + $0xc] sm:$0xf] }
 0x9bd   : > { %v4236_v27 = vpop.permute.xlu0 %4235  ;;  %v4207_v31 = vpop.permute.xlu1 %4206 }
 0x9be   : > { %5224 = vmatmul.msk.f32.vlgmr.msrb.gmra.mxu3 %vm4208_vm4, %v4207_v31  ;;  %5226 = vmatmul.msk.f32.vlgmr.msra.gmra.mxu0 %vm4208_vm4, %v4236_v27  ;;  %vm4356_vm4 = vcmask 916480  }
 0xa3b   : > { %v6514_v35 = vpop.f32.mrf.mxu0 }
 0xa3c   : > { %v4305_v0 = vmul.f32 0.041666668, %v6514_v35  ;;  %v4420_v2 = vmul.f32 0.875, %v6514_v35  ;;  %v4327_v10 = vmul.f32 0.20833333, %v6514_v35  ;;  %v4316_v12 = vmul.f32 0.125, %v6514_v35 }
 0xa3d   : > { %v4338_v11 = vmul.f32 0.29166666, %v6514_v35  ;;  %v4349_v18 = vmul.f32 0.375, %v6514_v35  ;;  %v4426_v19 = vmul.f32 0.9583333, %v6514_v35  ;;  %v4387_v50 = vmul.f32 0.625, %v6514_v35 }
 0xa3e   : > { %v4376_v24 = vmul.f32 0.5416667, %v6514_v35  ;;  %v4365_v25 = vmul.f32 0.45833334, %v6514_v35  ;;  %v4409_v34 = vmul.f32 0.7916667, %v6514_v35 }
 0xa3f   : > { %v4398_v36 = vmul.f32 0.7083333, %v6514_v35 }
 0xa41   : > { %v4232_v26 = vpop.f32.mrf.mxu3 }
 0xa42   : > { %4279 = vrot.lane.b32.xlu2 %v4232_v26, %s5530_s15  ;;  %4272 = vrot.lane.b32.xlu0 %v4232_v26, %s6802_s29  ;;  %v4260_v62 = vadd.f32 %v4259_v33, %v4232_v26  ;;  %v4304_v63 = vmul.f32 0.9583333, %v4232_v26  ;;  %v4419_v1 = vmul.f32 0.125, %v4232_v26  ;;  %v4326_v7 = vmul.f32 0.7916667, %v4232_v26 }
 0xa43   : > { %4265 = vrot.lane.b32.xlu1 %v4232_v26, %s5531_s24  ;;  %v4337_v8 = vmul.f32 0.7083333, %v4232_v26  ;;  %v4315_v9 = vmul.f32 0.875, %v4232_v26  ;;  %v4348_v16 = vmul.f32 0.625, %v4232_v26  ;;  %v4425_v17 = vmul.f32 0.041666668, %v4232_v26 }
 0xa44   : > { %4262 = vst.msk [vmem:[#allocation8] sm:$0xf] %vm4261_vm2, %v4260_v62  ;;  %v4306_v3 = vadd.f32 %v4305_v0, %v4304_v63  ;;  %v4421_v4 = vadd.f32 %v4420_v2, %v4419_v1  ;;  %v4328_v13 = vadd.f32 %v4327_v10, %v4326_v7  ;;  %v4375_v22 = vmul.f32 0.45833334, %v4232_v26 }
 0xa45   : > { %v4339_v14 = vadd.f32 %v4338_v11, %v4337_v8  ;;  %v4317_v15 = vadd.f32 %v4316_v12, %v4315_v9  ;;  %v4350_v20 = vadd.f32 %v4349_v18, %v4348_v16  ;;  %v4427_v21 = vadd.f32 %v4426_v19, %v4425_v17 }
 0xa46   : > { %v4423_v6 = vadd.f32 %v4422_v5, %v4421_v4  ;;  %v4364_v23 = vmul.f32 0.5416667, %v4232_v26  ;;  %v4377_v28 = vadd.f32 %v4376_v24, %v4375_v22  ;;  %v4386_v29 = vmul.f32 0.375, %v4232_v26 }
 0xa47   : > { %v4408_v30 = vmul.f32 0.20833333, %v4232_v26  ;;  %v4397_v32 = vmul.f32 0.29166666, %v4232_v26 }
 0xa48   : > { %4424 = vst.msk [vmem:[#allocation8 + $0xc] sm:$0xf] %vm4261_vm2, %v4423_v6  ;;  %v4366_v48 = vadd.f32 %v4365_v25, %v4364_v23  ;;  %v4388_v52 = vadd.f32 %v4387_v50, %v4386_v29  ;;  %vm4360_vm2 = vcmask 1044352  }
 0xa49   : > { %v4410_v37 = vadd.f32 %v4409_v34, %v4408_v30  ;;  %v4399_v38 = vadd.f32 %v4398_v36, %v4397_v32 }
 0xa4a   : > { %4293 = vrot.lane.b32.xlu0 %v4232_v26, %s6791_s20  ;;  %4309 = vrot.lane.b32.xlu2 %v4306_v3, %s6803_s14 }
 0xa4b   : > { %4286 = vrot.lane.b32.xlu1 %v4232_v26, %s6804_s23  ;;  %v4263_v42 = vld [vmem:[#allocation8] sm:$0xf] }
 0xa4f   : > { %v4428_v59 = vld [vmem:[#allocation8 + $0xc] sm:$0xf] }
 0xa52   : > { %4331 = vrot.lane.b32.xlu0 %v4328_v13, %s6805_s18  ;;  %4342 = vrot.lane.b32.xlu2 %v4339_v14, %s6806_s21  ;;  %s6818_s21 = sld [smem:[#allocation29_spill]] }
 0xa53   : > { %4320 = vrot.lane.b32.xlu1 %v4317_v15, %s6765_s28 }
 0xa5a   : > { %4353 = vrot.lane.b32.xlu0 %v4350_v20, %s6807_s17  ;;  %4437 = vrot.lane.b32.xlu2 %v6514_v35, %s6802_s29  ;;  %s6817_s29 = sld [smem:[#allocation17_spill]] }
 0xa5b   : > { %4430 = vrot.lane.b32.xlu1 %v4427_v21, %s5531_s24  ;;  %s6811_s24 = sld [smem:[#allocation28_spill]] }
 0xa61   : > { %s6812_s18 = smov %s6811_s24  ;;  %v4479_v39 = vld [vmem:[%s6811_s24] sm:$0xff] }
 0xa62   : > { %4443 = vrot.lane.b32.xlu0 %v6514_v35, %s5530_s15  ;;  %4380 = vrot.lane.b32.xlu2 %v4377_v28, %s6808_s30  ;;  %s6810_s15 = smov 80   ;;  %v4480_v40 = vld [vmem:[%s6812_s18 + $0x8] sm:$0xff]  ;;  %s6815_s30 = sld [smem:[#allocation27_spill]] }
 0xa63   : > { %4369 = vrot.lane.b32.xlu1 %v4366_v48, %s5533_s16 }
 0xa6a   : > { %4391 = vrot.lane.b32.xlu0 %v4388_v52, %s5534_s1  ;;  %4455 = vrot.lane.b32.xlu2 %v6514_v35, %s6791_s20  ;;  %s5258_s20 = smul.u32 80, %s6817_s29 }
 0xa6b   : > { %4449 = vrot.lane.b32.xlu1 %v6514_v35, %s6804_s23  ;;  %s5443_s23 = scalar_lea.hbm %s6818_s21, 160 }
 0xa72   : > { %4463 = vrot.lane.b32.xlu0 %v6514_v35, %s6803_s14  ;;  %4413 = vrot.lane.b32.xlu2 %v4410_v37, %s6809_s19  ;;  %s6816_s19 = smul.u32 80, %s5702_s22  ;;  %s4868_s14 = scalar_lea.hbm %s6818_s21, %s5258_s20 }
 0xa73   : > { %4402 = vrot.lane.b32.xlu1 %v4399_v38, %s6810_s15  ;;  %s4871_s1 = sshll.u32 %s4868_s14, 4  ;;  %s4872_s1 = int_to_ptr.hbm [resolvable:$true] %s4871_s1 }
 0xa74   : > { %s6625_s15 = scalar_lea.vmem [#allocation12], %s6816_s19  ;;  %s4857_s19 = scalar_lea.sflag [#allocation11], %s5702_s22 }
 0xa75   : > { %s4869_s17 = sshll.u32 %s6625_s15, 4  ;;  %s5437_s29 = sshra.s32 %s4872_s1, 4  ;;  %s4870_s17 = int_to_ptr.vmem [resolvable:$true] %s4869_s17  ;;  %s5438_s29 = int_to_ptr.hbm [resolvable:$true] %s5437_s29 }
 0xa76   : > { %s5439_s20 = scalar_lea.hbm %s5438_s29, 80  ;;  %p5444_p3 = scmp.lt.s32.totalorder %s5438_s29, %s6818_s21 }
 0xa77   : > { %p5440_p6 = scmp.ne.s32.totalorder %s5438_s29, %s5439_s20  ;;  %p5445_p4 = scmp.lt.s32.totalorder %s5443_s23, %s5439_s20 }
 0xa79   : > { %p5441_p13 = pnand %p5440_p6, %p5672_p11  ;;  %p5446_p5 = por %p5445_p4, %p5444_p3 }
 0xa7a   : > { %4483 = vperm.xlu0 %5350, %v4479_v39   ;;  %4488 = vperm.xlu2 %5352, %v4480_v40  }
 0xa7b   : > { %4469 = vrot.lane.b32.xlu1 %v6514_v35, %s6765_s28  ;;  %p5442_p2 = pneg %p5441_p13 }
 0xa7d   : > { %p5447_p7 = pnand %p5446_p5, %p5442_p2 }
 0xa9c   : > { %v4280_v44 = vpop.permute.xlu2 %4279 }
 0xaa4   : > { %v4310_v51 = vpop.permute.xlu2 %4309 }
 0xaac   : > { %v4343_v57 = vpop.permute.xlu2 %4342 }
 0xab4   : > { %v4273_v45 = vpop.permute.xlu0 %4272  ;;  %v4438_v26 = vpop.permute.xlu2 %4437 }
 0xab5   : > { %v4266_v41 = vpop.permute.xlu1 %4265 }
 0xab6   : > { %v4268_v43 = vadd.f32 %v4266_v41, %v4263_v42 }
 0xab8   : > { %4270 = vst.msk [vmem:[#allocation8] sm:$0xf] %vm4269_vm0, %v4268_v43  ;;  %v4474_v43 = vld [vmem:[%s6815_s30] sm:$0xff] }
 0xabc   : > { %v4294_v53 = vpop.permute.xlu0 %4293  ;;  %v6573_v8 = vpop.permute.xlu2 %4380 }
 0xabd   : > { %v4287_v46 = vpop.permute.xlu1 %4286  ;;  %v4295_v63 = vrot.slane %v4294_v53, 4 }
 0xabf   : > { %v4271_v47 = vld [vmem:[#allocation8] sm:$0xf]  ;;  %v4297_v0 = vsel %vm4296_vm8, %v4295_v63, %v4294_v53 }
 0xac0   : > { %v4275_v49 = vadd.f32 %v4273_v45, %v4271_v47 }
 0xac2   : > { %4277 = vst.msk [vmem:[#allocation8] sm:$0xf] %vm4276_vm5, %v4275_v49 }
 0xac4   : > { %v4332_v58 = vpop.permute.xlu0 %4331  ;;  %v4456_v14 = vpop.permute.xlu2 %4455 }
 0xac5   : > { %v4321_v54 = vpop.permute.xlu1 %4320  ;;  %v4457_v16 = vrot.slane %v4456_v14, 4 }
 0xac7   : > { %v4458_v18 = vsel %vm4296_vm8, %v4457_v16, %v4456_v14  ;;  %vm4395_vm8 = vcmask 650688  }
 0xac9   : > { %v4278_v55 = vld [vmem:[#allocation8] sm:$0xf] }
 0xaca   : > { %v4282_v56 = vadd.f32 %v4280_v44, %v4278_v55 }
 0xacc   : > { %4284 = vst.msk [vmem:[#allocation8] sm:$0xf] %vm4283_vm6, %v4282_v56  ;;  %v4354_v33 = vpop.permute.xlu0 %4353 }
 0xacd   : > { %v4431_v60 = vpop.permute.xlu1 %4430  ;;  %v4355_v34 = vrot.slane %v4354_v33, 4 }
 0xace   : > { %v4433_v61 = vadd.f32 %v4431_v60, %v4428_v59 }
 0xacf   : > { %v4357_v37 = vsel %vm4356_vm4, %v4355_v34, %v4354_v33 }
 0xad0   : > { %4434 = vst.msk [vmem:[#allocation8 + $0xc] sm:$0xf] %vm4269_vm0, %v4433_v61  ;;  %vm4361_vm0 = vcmask 64516  }
 0xad3   : > { %v4285_v27 = vld [vmem:[#allocation8] sm:$0xf] }
 0xad4   : > { %v4289_v31 = vadd.f32 %v4287_v46, %v4285_v27  ;;  %v4444_v4 = vpop.permute.xlu0 %4443 }
 0xad5   : > { %v4370_v6 = vpop.permute.xlu1 %4369 }
 0xad6   : > { %4291 = vst.msk [vmem:[#allocation8] sm:$0xf] %vm4290_vm7, %v4289_v31 }
 0xad7   : > { %v4435_v35 = vld [vmem:[#allocation8 + $0xc] sm:$0xf] }
 0xad8   : > { %v4440_v62 = vadd.f32 %v4438_v26, %v4435_v35 }
 0xada   : > { %4441 = vst.msk [vmem:[#allocation8 + $0xc] sm:$0xf] %vm4276_vm5, %v4440_v62  ;;  %vm4362_vm5 = vmor %vm4361_vm0, %vm4360_vm2 }
 0xadc   : > { %v4392_v19 = vpop.permute.xlu0 %4391 }
 0xadd   : > { %v4292_v1 = vld [vmem:[#allocation8] sm:$0xff]  ;;  %v4450_v11 = vpop.permute.xlu1 %4449 }
 0xade   : > { %v4299_v3 = vadd.f32 %v4297_v0, %v4292_v1 }
 0xae0   : > { %4303 = vst.msk [vmem:[#allocation8] sm:$0xff] %vm6567_vm11, %v4299_v3 }
 0xae1   : > { %v4442_v5 = vld [vmem:[#allocation8 + $0xc] sm:$0xf] }
 0xae2   : > { %v4446_v7 = vadd.f32 %v4444_v4, %v4442_v5 }
 0xae4   : > { %4447 = vst.msk [vmem:[#allocation8 + $0xc] sm:$0xf] %vm4283_vm6, %v4446_v7  ;;  %v4464_v24 = vpop.permute.xlu0 %4463  ;;  %vm4373_vm6 = vcmask 257088  }
 0xae5   : > { %v4403_v28 = vpop.permute.xlu1 %4402 }
 0xae7   : > { %v4307_v9 = vld [vmem:[#allocation8 + $0x4] sm:$0xf] }
 0xae8   : > { %v4312_v10 = vadd.f32 %v4310_v51, %v4307_v9  ;;  %v4475_v51 = vld [vmem:[%s6815_s30 + $0x8] sm:$0xff] }
 0xaea   : > { %4314 = vst.msk [vmem:[#allocation8 + $0x4] sm:$0xf] %vm4313_vm12, %v4312_v10 }
 0xaeb   : > { %v4448_v12 = vld [vmem:[#allocation8 + $0xc] sm:$0xf] }
 0xaec   : > { %v4452_v13 = vadd.f32 %v4450_v11, %v4448_v12  ;;  %v6606_v31 = vpop.permute.xlu0 %4483 }
 0xaed   : > { %v4470_v52 = vpop.permute.xlu1 %4469 }
 0xaee   : > { %4453 = vst.msk [vmem:[#allocation8 + $0xc] sm:$0xf] %vm4290_vm7, %v4452_v13  ;;  %vm4384_vm7 = vcmask 453888  }
 0xaf1   : > { %v4318_v15 = vld [vmem:[#allocation8 + $0x4] sm:$0xf] }
 0xaf2   : > { %v4323_v17 = vadd.f32 %v4321_v54, %v4318_v15 }
 0xaf4   : > { %4325 = vst.msk [vmem:[#allocation8 + $0x4] sm:$0xf] %vm4324_vm13, %v4323_v17 }
 0xaf5   : > { %v4454_v20 = vld [vmem:[#allocation8 + $0xc] sm:$0xff] }
 0xaf6   : > { %v4460_v21 = vadd.f32 %v4458_v18, %v4454_v20 }
 0xaf8   : > { %4461 = vst.msk [vmem:[#allocation8 + $0xc] sm:$0xff] %vm6567_vm11, %v4460_v21 }
 0xafb   : > { %v4329_v22 = vld [vmem:[#allocation8 + $0x4] sm:$0xf] }
 0xafc   : > { %v4334_v23 = vadd.f32 %v4332_v58, %v4329_v22 }
 0xafe   : > { %4336 = vst.msk [vmem:[#allocation8 + $0x4] sm:$0xf] %vm4335_vm14, %v4334_v23 }
 0xaff   : > { %v4462_v25 = vld [vmem:[#allocation8 + $0x10] sm:$0xf] }
 0xb00   : > { %v4466_v48 = vadd.f32 %v4464_v24, %v4462_v25 }
 0xb02   : > { %4467 = vst.msk [vmem:[#allocation8 + $0x10] sm:$0xf] %vm4313_vm12, %v4466_v48 }
 0xb05   : > { %v4340_v29 = vld [vmem:[#allocation8 + $0x4] sm:$0xf] }
 0xb06   : > { %v4345_v50 = vadd.f32 %v4343_v57, %v4340_v29  ;;  %v4414_v57 = vpop.permute.xlu2 %4413 }
 0xb08   : > { %4347 = vst.msk [vmem:[#allocation8 + $0x4] sm:$0xf] %vm4346_vm15, %v4345_v50 }
 0xb09   : > { %v4468_v30 = vld [vmem:[#allocation8 + $0x10] sm:$0xf] }
 0xb0a   : > { %v4472_v32 = vadd.f32 %v4470_v52, %v4468_v30 }
 0xb0c   : > { %4473 = vst.msk [vmem:[#allocation8 + $0x10] sm:$0xf] %vm4324_vm13, %v4472_v32  ;;  %v4635_v32 = vld [vmem:[%s5708_s26] sm:$0xff] }
 0xb0e   : > { %v6610_v0 = vpop.permute.xlu2 %4488 }
 0xb0f   : > { %v4351_v36 = vld [vmem:[#allocation8 + $0x4] sm:$0xff] }
 0xb10   : > { %v4359_v38 = vadd.f32 %v4357_v37, %v4351_v36 }
 0xb12   : > { %4363 = vst.msk [vmem:[#allocation8 + $0x4] sm:$0xff] %vm4362_vm5, %v4359_v38 }
 0xb13   : > { %v4478_v39 = vld [vmem:[#allocation8 + $0x10] sm:$0xf] }
 0xb14   : > { %4498 = vst [vmem:[#allocation1 + $0x20] ss:$2 sm:$0xff] %v4478_v39 }
 0xb19   : > { %v4367_v40 = vld [vmem:[#allocation8 + $0x8] sm:$0xf]  ;;  %v4476_v41 = vld [vmem:[#allocation8] sm:$0xff] }
 0xb1a   : > { %v4372_v42 = vadd.f32 %v4370_v6, %v4367_v40  ;;  %4494 = vst [vmem:[#allocation1] ss:$2 sm:$0xff] %v4476_v41 }
 0xb1b   : > { %v4503_v47 = vld.sshfl [vmem:[#allocation1 + $0x20] sm:$0xff pattern:$0x75316420] }
 0xb1c   : > { %4374 = vst.msk [vmem:[#allocation8 + $0x8] sm:$0xf] %vm4373_vm6, %v4372_v42 }
 0xb21   : > { %v4499_v44 = vld.sshfl [vmem:[#allocation1] sm:$0xff pattern:$0x75316420]  ;;  %v4500_v45 = vld.sshfl [vmem:[#allocation1 + $0x8] sm:$0xff pattern:$0x75316420] }
 0xb22   : > { %5227 = vmatpush.msk.msrb.mxu1 %vm696_vm1, %v4499_v44  ;;  %5230 = vmatpush.msk.msrb.mxu2 %vm696_vm1, %v4500_v45 }
 0xb23   : > { %v4378_v46 = vld [vmem:[#allocation8 + $0x8] sm:$0xf]  ;;  %5228 = vmatmul.msk.f32.vlgmr.msrb.gmra.mxu1 %vm712_vm3, %v4474_v43  ;;  %5231 = vmatmul.msk.f32.vlgmr.msrb.gmra.mxu2 %vm712_vm3, %v4474_v43 }
 0xb24   : > { %v4383_v49 = vadd.f32 %v6573_v8, %v4378_v46  ;;  %5239 = vmatpush.msk.msra.mxu1 %vm696_vm1, %v4503_v47 }
 0xb26   : > { %4385 = vst.msk [vmem:[#allocation8 + $0x8] sm:$0xf] %vm4384_vm7, %v4383_v49 }
 0xb2b   : > { %5229 = vmatmul.msk.f32.gmra.mxu1 %vm712_vm3, %v4475_v51  ;;  %5232 = vmatmul.msk.f32.gmra.mxu2 %vm712_vm3, %v4475_v51 }
 0xb2d   : > { %v4389_v53 = vld [vmem:[#allocation8 + $0x8] sm:$0xf] }
 0xb2e   : > { %v4394_v54 = vadd.f32 %v4392_v19, %v4389_v53 }
 0xb30   : > { %4396 = vst.msk [vmem:[#allocation8 + $0x8] sm:$0xf] %vm4395_vm8, %v4394_v54  ;;  %v4636_v54 = vld [vmem:[%s5708_s26 + $0x8] sm:$0xff] }
 0xb33   : > { %5240 = vmatmul.msk.f32.vlgmr.msra.gmra.mxu1 %vm712_vm3, %v4474_v43 }
 0xb37   : > { %v4400_v55 = vld [vmem:[#allocation8 + $0x8] sm:$0xf] }
 0xb38   : > { %v4405_v56 = vadd.f32 %v4403_v28, %v4400_v55 }
 0xb3a   : > { %4407 = vst.msk [vmem:[#allocation8 + $0x8] sm:$0xf] %vm4406_vm9, %v4405_v56 }
 0xb3b   : > { %5241 = vmatmul.msk.f32.gmra.mxu1 %vm712_vm3, %v4475_v51 }
 0xb41   : > { %v4411_v58 = vld [vmem:[#allocation8 + $0x8] sm:$0xf] }
 0xb42   : > { %v4416_v59 = vadd.f32 %v4414_v57, %v4411_v58 }
 0xb44   : > { %4418 = vst.msk [vmem:[#allocation8 + $0x8] sm:$0xf] %vm4417_vm10, %v4416_v59 }
 0xb4b   : > { %v4477_v60 = vld [vmem:[#allocation8 + $0x8] sm:$0xff] }
 0xb4c   : > { %4496 = vst [vmem:[#allocation1 + $0x10] ss:$2 sm:$0xff] %v4477_v60 }
 0xb53   : > { %v4501_v61 = vld.sshfl [vmem:[#allocation1 + $0x10] sm:$0xff pattern:$0x75316420]  ;;  %v4502_v27 = vld.sshfl [vmem:[#allocation1 + $0x18] sm:$0xff pattern:$0x75316420] }
 0xb54   : > { %5233 = vmatpush.msk.msra.mxu3 %vm696_vm1, %v4501_v61  ;;  %5236 = vmatpush.msk.msrb.mxu0 %vm696_vm1, %v4502_v27 }
 0xb55   : > { %5234 = vmatmul.msk.f32.vlgmr.msra.gmra.mxu3 %vm712_vm3, %v4474_v43  ;;  %5237 = vmatmul.msk.f32.vlgmr.msrb.gmra.mxu0 %vm712_vm3, %v4474_v43 }
 0xb5d   : > { %5235 = vmatmul.msk.f32.gmra.mxu3 %vm712_vm3, %v4475_v51  ;;  %5238 = vmatmul.msk.f32.gmra.mxu0 %vm712_vm3, %v4475_v51 }
 0xba0   : > { %v4537_v26 = vpop.f32.mrf.mxu1 }
 0xba1   : > { %v4538_v33 = vadd.f32 %v4537_v26, %v6606_v31 }
 0xba3   : > { %v5242_v35 = vmul.f32 -1.442695, %v4538_v33 }
 0xba5   : > { %5353 = vpow2.f32 %v5242_v35  ;;  %v4640_v35 = vld [vmem:[%s5708_s26 + $0x28] sm:$0xff] }
 0xba6   : > { %v4560_v62 = vpop.f32.mrf.mxu2 }
 0xba7   : > { %v4561_v63 = vadd.f32 %v4560_v62, %v6606_v31 }
 0xba8   : > { %v4540_v1 = vpop.f32.mrf.mxu1 }
 0xba9   : > { %v5243_v2 = vmul.f32 -1.442695, %v4561_v63  ;;  %v4541_v3 = vadd.f32 %v4540_v1, %v6610_v0 }
 0xbab   : > { %v5354_v4 = vpop.eup %5353  ;;  %5355 = vpow2.f32 %v5243_v2  ;;  %v5247_v5 = vmul.f32 -1.442695, %v4541_v3 }
 0xbac   : > { %v4675_v6 = vadd.f32 1.0, %v5354_v4 }
 0xbad   : > { %5357 = vpow2.f32 %v5247_v5 }
 0xbae   : > { %5359 = vrcp.f32 %v4675_v6  ;;  %v4563_v7 = vpop.f32.mrf.mxu2  ;;  %v4694_v20 = vand.u32 2147483647, %v4675_v6  ;;  %v4696_v21 = vand.u32 2147483648, %v4675_v6  ;;  %vm4690_vm3 = vweird.f32 %v4675_v6 }
 0xbaf   : > { %v4564_v8 = vadd.f32 %v4563_v7, %v6610_v0 }
 0xbb0   : > { %v4629_v9 = vpop.f32.mrf.mxu1  ;;  %vm4695_vm12 = vcmp.eq.f32.partialorder %v4694_v20, 8.507059e+37  ;;  %v4697_v34 = vor.u32 1.1754944e-38, %v4696_v21  ;;  %v4639_v20 = vld [vmem:[%s5708_s26 + $0x20] sm:$0xff] }
 0xbb1   : > { %v5356_v10 = vpop.eup %5355  ;;  %v5248_v11 = vmul.f32 -1.442695, %v4564_v8  ;;  %v4630_v12 = vadd.f32 %v4629_v9, %v6606_v31 }
 0xbb2   : > { %v4676_v13 = vadd.f32 1.0, %v5356_v10 }
 0xbb3   : > { %v5358_v14 = vpop.eup %5357  ;;  %5361 = vpow2.f32 %v5248_v11  ;;  %v5246_v15 = vmul.f32 -1.442695, %v4630_v12  ;;  %v4641_v11 = vld [vmem:[%s5708_s26 + $0x30] sm:$0xff] }
 0xbb4   : > { %v5360_v16 = vpop.eup %5359  ;;  %5363 = vrcp.f32 %v4676_v13  ;;  %v4680_v18 = vadd.f32 1.0, %v5358_v14  ;;  %v4709_v41 = vand.u32 2147483647, %v4676_v13  ;;  %v4711_v42 = vand.u32 2147483648, %v4676_v13 }
 0xbb5   : > { %v4686_v17 = vmul.f32 %v5360_v16, %v4675_v6  ;;  %5365 = vpow2.f32 %v5246_v15  ;;  %vm4691_vm1 = vweird.f32 %v5360_v16  ;;  %vm4705_vm14 = vweird.f32 %v4676_v13 }
 0xbb6   : > { %5367 = vrcp.f32 %v4680_v18  ;;  %vm4692_vm11 = vmor %vm4690_vm3, %vm4691_vm1  ;;  %v4769_v49 = vand.u32 2147483647, %v4680_v18  ;;  %v4771_v51 = vand.u32 2147483648, %v4680_v18  ;;  %v4712_v55 = vor.u32 1.1754944e-38, %v4711_v42 }
 0xbb7   : > { %v4687_v19 = vsub.f32 1.0, %v4686_v17  ;;  %vm4710_vm2 = vcmp.eq.f32.partialorder %v4709_v41, 8.507059e+37  ;;  %vm4765_vm0 = vweird.f32 %v4680_v18 }
 0xbb8   : > { %v4632_v22 = vpop.f32.mrf.mxu1  ;;  %vm4770_vm6 = vcmp.eq.f32.partialorder %v4769_v49, 8.507059e+37  ;;  %v4772_v62 = vor.u32 1.1754944e-38, %v4771_v51 }
 0xbb9   : > { %v5362_v23 = vpop.eup %5361  ;;  %v4688_v24 = vmul.f32 %v5360_v16, %v4687_v19  ;;  %v4633_v25 = vadd.f32 %v4632_v22, %v6610_v0 }
 0xbba   : > { %v5364_v28 = vpop.eup %5363  ;;  %v6616_v48 = vadd.f32 1.0, %v5362_v23 }
 0xbbb   : > { %v5366_v29 = vpop.eup %5365  ;;  %v4689_v50 = vadd.f32 %v5360_v16, %v4688_v24  ;;  %v4701_v52 = vmul.f32 %v5364_v28, %v4676_v13  ;;  %v5251_v30 = vmul.f32 -1.442695, %v4633_v25  ;;  %vm4706_vm13 = vweird.f32 %v5364_v28 }
 0xbbc   : > { %5369 = vrcp.f32 %v6616_v48  ;;  %v5368_v36 = vpop.eup %5367  ;;  %v6620_v39 = vadd.f32 1.0, %v5366_v29  ;;  %vm4707_vm15 = vmor %vm4705_vm14, %vm4706_vm13  ;;  %v4786_v2 = vand.u32 2147483648, %v6616_v48  ;;  %v4784_v6 = vand.u32 2147483647, %v6616_v48 }
 0xbbd   : > { %v4693_v37 = vsel %vm4692_vm11, %v5360_v16, %v4689_v50  ;;  %v4702_v38 = vsub.f32 1.0, %v4701_v52  ;;  %5371 = vpow2.f32 %v5251_v30  ;;  %v4761_v43 = vmul.f32 %v5368_v36, %v4680_v18 }
 0xbbe   : > { %v4698_v40 = vsel %vm4695_vm12, %v4697_v34, %v4693_v37  ;;  %5373 = vrcp.f32 %v6620_v39  ;;  %vm4766_vm4 = vweird.f32 %v5368_v36  ;;  %vm4780_vm8 = vweird.f32 %v6616_v48  ;;  %v4644_v34 = vld [vmem:[%s5708_s26 + $0x48] sm:$0xff] }
 0xbbf   : > { %v4835_v44 = vmul.f32 %v4698_v40, %v4635_v32  ;;  %v4703_v45 = vmul.f32 %v5364_v28, %v4702_v38  ;;  %v4762_v46 = vsub.f32 1.0, %v4761_v43  ;;  %vm4767_vm5 = vmor %vm4765_vm0, %vm4766_vm4  ;;  %v4756_v10 = vand.u32 2147483648, %v6620_v39 }
 0xbc0   : > { %v4787_v12 = vor.u32 1.1754944e-38, %v4786_v2  ;;  %v4754_v14 = vand.u32 2147483647, %v6620_v39  ;;  %vm4785_vm1 = vcmp.eq.f32.partialorder %v4784_v6, 8.507059e+37  ;;  %vm4750_vm3 = vweird.f32 %v6620_v39 }
 0xbc1   : > { %4845 = vst [vmem:[%s6625_s15] sm:$0xff] %v4835_v44  ;;  %v4704_v47 = vadd.f32 %v5364_v28, %v4703_v45  ;;  %v4763_v56 = vmul.f32 %v5368_v36, %v4762_v46  ;;  %v4757_v21 = vor.u32 1.1754944e-38, %v4756_v10  ;;  %vm4849_vm13 = vcmask 523264  }
 0xbc2   : > { %v5370_v53 = vpop.eup %5369  ;;  %vm4755_vm12 = vcmp.eq.f32.partialorder %v4754_v14, 8.507059e+37 }
 0xbc3   : > { %v5372_v57 = vpop.eup %5371  ;;  %v4708_v58 = vsel %vm4707_vm15, %v5364_v28, %v4704_v47  ;;  %v4776_v59 = vmul.f32 %v5370_v53, %v6616_v48  ;;  %v4764_v61 = vadd.f32 %v5368_v36, %v4763_v56  ;;  %vm4781_vm7 = vweird.f32 %v5370_v53 }
 0xbc4   : > { %v4713_v60 = vsel %vm4710_vm2, %v4712_v55, %v4708_v58  ;;  %v4684_v27 = vadd.f32 1.0, %v5372_v57  ;;  %v5374_v26 = vpop.eup %5373  ;;  %vm4782_vm9 = vmor %vm4780_vm8, %vm4781_vm7 }
 0xbc5   : > { %v4836_v33 = vmul.f32 %v4713_v60, %v4636_v54  ;;  %v4777_v63 = vsub.f32 1.0, %v4776_v59  ;;  %v4768_v1 = vsel %vm4767_vm5, %v5368_v36, %v4764_v61  ;;  %v4746_v3 = vmul.f32 %v5374_v26, %v6620_v39 }
 0xbc6   : > { %5375 = vrcp.f32 %v4684_v27  ;;  %v4773_v4 = vsel %vm4770_vm6, %v4772_v62, %v4768_v1  ;;  %vm4751_vm10 = vweird.f32 %v5374_v26  ;;  %v4831_v48 = vand.u32 2147483648, %v4684_v27  ;;  %v4638_v1 = vld [vmem:[%s5708_s26 + $0x18] sm:$0xff] }
 0xbc7   : > { %4846 = vst [vmem:[%s6625_s15 + $0x8] sm:$0xff] %v4836_v33  ;;  %v4778_v5 = vmul.f32 %v5370_v53, %v4777_v63  ;;  %v4840_v7 = vmul.f32 %v4773_v4, %v4640_v35  ;;  %v4747_v8 = vsub.f32 1.0, %v4746_v3  ;;  %vm4752_vm11 = vmor %vm4750_vm3, %vm4751_vm10  ;;  %v4829_v50 = vand.u32 2147483647, %v4684_v27 }
 0xbc8   : > { %vm4825_vm15 = vweird.f32 %v4684_v27  ;;  %v4832_v36 = vor.u32 1.1754944e-38, %v4831_v48 }
 0xbc9   : > { %v4779_v9 = vadd.f32 %v5370_v53, %v4778_v5  ;;  %4851 = vst [vmem:[%s6625_s15 + $0x28] sm:$0xff] %v4840_v7  ;;  %v4748_v13 = vmul.f32 %v5374_v26, %v4747_v8  ;;  %vm4830_vm2 = vcmp.eq.f32.partialorder %v4829_v50, 8.507059e+37 }
 0xbcb   : > { %v4783_v15 = vsel %vm4782_vm9, %v5370_v53, %v4779_v9  ;;  %v4749_v18 = vadd.f32 %v5374_v26, %v4748_v13 }
 0xbcc   : > { %v5376_v16 = vpop.eup %5375  ;;  %v4788_v17 = vsel %vm4785_vm1, %v4787_v12, %v4783_v15 }
 0xbcd   : > { %v4841_v19 = vmul.f32 %v4788_v17, %v4641_v11  ;;  %v4821_v22 = vmul.f32 %v5376_v16, %v4684_v27  ;;  %v4753_v23 = vsel %vm4752_vm11, %v5374_v26, %v4749_v18  ;;  %vm4826_vm14 = vweird.f32 %v5376_v16 }
 0xbce   : > { %v4758_v24 = vsel %vm4755_vm12, %v4757_v21, %v4753_v23  ;;  %vm4827_vm4 = vmor %vm4825_vm15, %vm4826_vm14 }
 0xbcf   : > { %4852 = vst [vmem:[%s6625_s15 + $0x30] sm:$0xff] %v4841_v19  ;;  %v4822_v25 = vsub.f32 1.0, %v4821_v22  ;;  %v4839_v28 = vmul.f32 %v4758_v24, %v4639_v20 }
 0xbd1   : > { %v4823_v29 = vmul.f32 %v5376_v16, %v4822_v25  ;;  %4850 = vst.msk [vmem:[%s6625_s15 + $0x20] sm:$0xff] %vm4849_vm13, %v4839_v28  ;;  %v4643_v25 = vld [vmem:[%s5708_s26 + $0x40] sm:$0xff] }
 0xbd2   : > { %v4606_v52 = vpop.f32.mrf.mxu0 }
 0xbd3   : > { %v4824_v30 = vadd.f32 %v5376_v16, %v4823_v29  ;;  %v4607_v32 = vadd.f32 %v4606_v52, %v6606_v31 }
 0xbd5   : > { %v4828_v37 = vsel %vm4827_vm4, %v5376_v16, %v4824_v30  ;;  %v5245_v38 = vmul.f32 -1.442695, %v4607_v32  ;;  %v4637_v16 = vld [vmem:[%s5708_s26 + $0x10] sm:$0xff] }
 0xbd6   : > { %v4833_v39 = vsel %vm4830_vm2, %v4832_v36, %v4828_v37  ;;  %v4642_v37 = vld [vmem:[%s5708_s26 + $0x38] sm:$0xff] }
 0xbd7   : > { %v4844_v40 = vmul.f32 %v4833_v39, %v4644_v34  ;;  %5377 = vpow2.f32 %v5245_v38 }
 0xbd8   : > { %v4583_v41 = vpop.f32.mrf.mxu3 }
 0xbd9   : > { %4855 = vst.msk [vmem:[%s6625_s15 + $0x48] sm:$0xff] %vm4849_vm13, %v4844_v40  ;;  %v4584_v42 = vadd.f32 %v4583_v41, %v6606_v31 }
 0xbda   : > { %v4609_v43 = vpop.f32.mrf.mxu0 }
 0xbdb   : > { %v5244_v44 = vmul.f32 -1.442695, %v4584_v42  ;;  %v4610_v45 = vadd.f32 %v4609_v43, %v6610_v0 }
 0xbdd   : > { %v5378_v46 = vpop.eup %5377  ;;  %5379 = vpow2.f32 %v5244_v44  ;;  %v5250_v47 = vmul.f32 -1.442695, %v4610_v45 }
 0xbde   : > { %v4678_v49 = vadd.f32 1.0, %v5378_v46 }
 0xbdf   : > { %5381 = vpow2.f32 %v5250_v47 }
 0xbe0   : > { %5383 = vrcp.f32 %v4678_v49  ;;  %v4586_v51 = vpop.f32.mrf.mxu3  ;;  %v4741_v61 = vand.u32 2147483648, %v4678_v49  ;;  %v4739_v33 = vand.u32 2147483647, %v4678_v49  ;;  %vm4735_vm5 = vweird.f32 %v4678_v49 }
 0xbe1   : > { %v4587_v53 = vadd.f32 %v4586_v51, %v6610_v0 }
 0xbe2   : > { %v4742_v2 = vor.u32 1.1754944e-38, %v4741_v61  ;;  %vm4740_vm7 = vcmp.eq.f32.partialorder %v4739_v33, 8.507059e+37 }
 0xbe3   : > { %v5380_v54 = vpop.eup %5379  ;;  %v5249_v55 = vmul.f32 -1.442695, %v4587_v53 }
 0xbe4   : > { %v4677_v56 = vadd.f32 1.0, %v5380_v54 }
 0xbe5   : > { %v5382_v57 = vpop.eup %5381  ;;  %5385 = vpow2.f32 %v5249_v55 }
 0xbe6   : > { %v5384_v58 = vpop.eup %5383  ;;  %5387 = vrcp.f32 %v4677_v56  ;;  %v4683_v59 = vadd.f32 1.0, %v5382_v57  ;;  %v4726_v7 = vand.u32 2147483648, %v4677_v56  ;;  %v4724_v11 = vand.u32 2147483647, %v4677_v56 }
 0xbe7   : > { %v4731_v31 = vmul.f32 %v5384_v58, %v4678_v49  ;;  %vm4736_vm0 = vweird.f32 %v5384_v58  ;;  %vm4720_vm9 = vweird.f32 %v4677_v56 }
 0xbe8   : > { %5389 = vrcp.f32 %v4683_v59  ;;  %vm4737_vm6 = vmor %vm4735_vm5, %vm4736_vm0  ;;  %v4816_v14 = vand.u32 2147483648, %v4683_v59  ;;  %v4727_v17 = vor.u32 1.1754944e-38, %v4726_v7  ;;  %v4814_v19 = vand.u32 2147483647, %v4683_v59 }
 0xbe9   : > { %v4732_v60 = vsub.f32 1.0, %v4731_v31  ;;  %vm4725_vm3 = vcmp.eq.f32.partialorder %v4724_v11, 8.507059e+37  ;;  %vm4810_vm11 = vweird.f32 %v4683_v59 }
 0xbea   : > { %v4817_v28 = vor.u32 1.1754944e-38, %v4816_v14  ;;  %vm4815_vm13 = vcmp.eq.f32.partialorder %v4814_v19, 8.507059e+37 }
 0xbeb   : > { %v5386_v27 = vpop.eup %5385  ;;  %v4733_v26 = vmul.f32 %v5384_v58, %v4732_v60 }
 0xbec   : > { %v5388_v35 = vpop.eup %5387  ;;  %v6652_v62 = vadd.f32 1.0, %v5386_v27 }
 0xbed   : > { %v4734_v0 = vadd.f32 %v5384_v58, %v4733_v26  ;;  %v4716_v63 = vmul.f32 %v5388_v35, %v4677_v56  ;;  %vm4721_vm8 = vweird.f32 %v5388_v35 }
 0xbee   : > { %5391 = vrcp.f32 %v6652_v62  ;;  %v5390_v3 = vpop.eup %5389  ;;  %vm4722_vm10 = vmor %vm4720_vm9, %vm4721_vm8  ;;  %v4801_v50 = vand.u32 2147483648, %v6652_v62  ;;  %v4799_v32 = vand.u32 2147483647, %v6652_v62  ;;  %vm4795_vm15 = vweird.f32 %v6652_v62 }
 0xbef   : > { %v4738_v4 = vsel %vm4737_vm6, %v5384_v58, %v4734_v0  ;;  %v4717_v5 = vsub.f32 1.0, %v4716_v63  ;;  %v4806_v8 = vmul.f32 %v5390_v3, %v4683_v59  ;;  %vm4811_vm1 = vweird.f32 %v5390_v3 }
 0xbf0   : > { %v4743_v6 = vsel %vm4740_vm7, %v4742_v2, %v4738_v4  ;;  %vm4812_vm12 = vmor %vm4810_vm11, %vm4811_vm1  ;;  %v4802_v38 = vor.u32 1.1754944e-38, %v4801_v50  ;;  %vm4800_vm2 = vcmp.eq.f32.partialorder %v4799_v32, 8.507059e+37 }
 0xbf1   : > { %v4838_v9 = vmul.f32 %v4743_v6, %v4638_v1  ;;  %v4718_v10 = vmul.f32 %v5388_v35, %v4717_v5  ;;  %v4807_v12 = vsub.f32 1.0, %v4806_v8 }
 0xbf3   : > { %4848 = vst [vmem:[%s6625_s15 + $0x18] sm:$0xff] %v4838_v9  ;;  %v4719_v13 = vadd.f32 %v5388_v35, %v4718_v10  ;;  %v4808_v18 = vmul.f32 %v5390_v3, %v4807_v12 }
 0xbf4   : > { %v5392_v15 = vpop.eup %5391 }
 0xbf5   : > { %v4723_v20 = vsel %vm4722_vm10, %v5388_v35, %v4719_v13  ;;  %v4791_v21 = vmul.f32 %v5392_v15, %v6652_v62  ;;  %v4809_v23 = vadd.f32 %v5390_v3, %v4808_v18  ;;  %vm4796_vm14 = vweird.f32 %v5392_v15 }
 0xbf6   : > { %v4728_v22 = vsel %vm4725_vm3, %v4727_v17, %v4723_v20  ;;  %vm4797_vm4 = vmor %vm4795_vm15, %vm4796_vm14 }
 0xbf7   : > { %v4837_v24 = vmul.f32 %v4728_v22, %v4637_v16  ;;  %v4792_v48 = vsub.f32 1.0, %v4791_v21  ;;  %v4813_v29 = vsel %vm4812_vm12, %v5390_v3, %v4809_v23 }
 0xbf8   : > { %v4818_v52 = vsel %vm4815_vm13, %v4817_v28, %v4813_v29 }
 0xbf9   : > { %4847 = vst [vmem:[%s6625_s15 + $0x10] sm:$0xff] %v4837_v24  ;;  %v4793_v30 = vmul.f32 %v5392_v15, %v4792_v48  ;;  %v4843_v34 = vmul.f32 %v4818_v52, %v4643_v25 }
 0xbfb   : > { %v4794_v36 = vadd.f32 %v5392_v15, %v4793_v30  ;;  %4854 = vst [vmem:[%s6625_s15 + $0x40] sm:$0xff] %v4843_v34 }
 0xbfd   : > { %v4798_v39 = vsel %vm4797_vm4, %v5392_v15, %v4794_v36 }
 0xbfe   : > { %v4803_v40 = vsel %vm4800_vm2, %v4802_v38, %v4798_v39 }
 0xbff   : > { %v4842_v41 = vmul.f32 %v4803_v40, %v4642_v37 }
 0xc01   : > { %4853 = vst [vmem:[%s6625_s15 + $0x38] sm:$0xff] %v4842_v41 }
 0xc02   : > { %5450 = shalt.err (!%p5447_p7)
}
 0xc03   : > { %s5535_s22 = smov 640   ;;  %s6820_s15 = smov 40  }
 0xc04   : > { %5261 = dma.vmem_to_hbm [thread:$0]  (%p5672_p11), %s4870_s17, 1280, %s4872_s1, %s4857_s19, %s5535_s22, %s5535_s22, %s6820_s15  }
 0xc05 PF: > { %s6821_s0 = sld [smem:[#allocation15_spill]]  ;;  %p5268_p8 = pnand %p4947_p9, %p5676_p12 }
 0xc07   : > { %p5269_p10 = pneg %p5268_p8 }
 0xc0b   : > { %s4886_s3 = sand.u32 1, %s6821_s0  }
 0xc0c   : > { %s4887_s28 = scalar_lea.sflag [#allocation11], %s4886_s3 }
 0xc0d   : > { %5472 = dma.done.wait (%p5269_p10), %s4887_s28, 1280  }
 0xc0e   : > { %5474 = vsyncadd (%p5269_p10), %s4887_s28, 4294966016  ;;  %s6823_s27 = sld [smem:[#allocation18_spill]]  ;;  %s6826_s24 = smov %s5481_s25 }
 0xc0f   : > { %s6824_s29 = sld [smem:[#allocation16_spill]] }
 0xc10   : > { %s6825_s26 = sld [smem:[#allocation19_spill]] }
 0xc14   : > { %p30_p0 = scmp.ge.s32.totalorder %s6823_s27, 4  }
 0xc15   : > { %s6827_s25 = smov %s6824_s29 }
 0xc16   :  { %32 = sbr.rel (!%p30_p0) target bundleno = 14 (0xe), region = 182 }
 0xc1b   :  { %4893 = vsyncpa [#allocation10], 1 }
 0xc1c   :  { %4895 = vsyncpa [#allocation10 + $0x1], 1 }
 0xc1d   :  { %4896 = vsyncpa [#allocation11], 1 }
 0xc1e   :  { %4898 = vsyncpa [#allocation11 + $0x1], 1 }

</bundles_post_ra>
